<compile_context>
chip_gen: v5e
topology: v5e:2x2
jax: 0.10.0
libtpu: 0.0.40
codegen_flags: <defaults>
</compile_context>

<pallas_src>
import numpy as np
import jax
import jax.numpy as jnp
from jax.experimental import pallas as pl
from jax.experimental.pallas import tpu as pltpu


# ---------------------------------------------------------------------------
# Static index bookkeeping (host-side numpy, computed once at import time)
# ---------------------------------------------------------------------------
def _wslot(w):
    # Parity-split position of pool1-output column w in 0..12:
    # even w -> slots 0..6, odd w -> slots 7..12.  This makes conv2's in-kernel
    # patch gather a set of *contiguous* 5-row slices.
    return (w // 2) if (w % 2 == 0) else (7 + w // 2)


def _build_pool1_perm():
    # Permutation applied to conv1 im2col rows (natural order oh1*26 + ow1) so
    # the kernel sees rows ordered (d = dh*2+dw, h, wslot(w)):
    #   - maxpool1 == elementwise max over 4 contiguous blocks of 169 rows,
    #   - pooled1 row (h, w) lands at h*13 + wslot(w).
    perm = np.zeros(676, dtype=np.int32)
    for dh in range(2):
        for dw in range(2):
            d = dh * 2 + dw
            for h in range(13):
                for w in range(13):
                    new = d * 169 + h * 13 + _wslot(w)
                    perm[new] = (2 * h + dh) * 26 + (2 * w + dw)
    return perm


_POOL1_PERM = _build_pool1_perm()


# ---------------------------------------------------------------------------
# The single fused Pallas kernel (one image per grid step)
# ---------------------------------------------------------------------------
def _fused_net_kernel(p_ref, w1_ref, b1_ref, w2_ref, b2_ref,
                      fc1w_ref, fc1b_ref, fc2w_ref, fc2b_ref,
                      o_ref, p1_s):
    f32 = jnp.float32
    patches = p_ref[0]                                        # (676, 9)

    # ---- conv1 (3x3, 1->10) + bias + ReLU + maxpool(2,2), fused ------------
    pooled1 = None
    for d in range(4):                                        # d = dh*2 + dw
        lhs1 = patches[d * 169:(d + 1) * 169, :]              # (169, 9)
        y = jnp.dot(lhs1, w1_ref[...], preferred_element_type=f32)
        y = jnp.maximum(y + b1_ref[...], 0.0)
        pooled1 = y if pooled1 is None else jnp.maximum(pooled1, y)
    p1_s[...] = pooled1            # rows: h*13 + wslot(w); lanes: 10 channels

    # ---- conv2 (3x3, 10->20) + bias + ReLU ----------------------------------
    # Output rows ordered (dw, oh2, c) with ow2 = 2*c + dw; only the 10x10
    # positions that survive the following 2x2 maxpool are computed.
    acc2 = None
    for i in range(3):
        for j in range(3):
            k = i * 3 + j
            pieces = []
            for dw in range(2):
                off = (7 if (dw + j) % 2 else 0) + (dw + j) // 2
                for oh2 in range(10):
                    s = (oh2 + i) * 13 + off
                    pieces.append(p1_s[s:s + 5, :])           # (5, 10)
            lhs2 = jnp.concatenate(pieces, axis=0)            # (100, 10)
            y = jnp.dot(lhs2, w2_ref[k], preferred_element_type=f32)
            acc2 = y if acc2 is None else acc2 + y
    y2 = jnp.maximum(acc2 + b2_ref[...], 0.0)                 # (100, 20)

    # ---- maxpool(2,2) on the 10x10 conv2 output -----------------------------
    m = jnp.maximum(y2[0:50, :], y2[50:100, :])               # max over dw
    rows = [jnp.maximum(m[10 * r2:10 * r2 + 5, :],
                        m[10 * r2 + 5:10 * r2 + 10, :])       # max over dh
            for r2 in range(5)]
    pooled2 = jnp.concatenate(rows, axis=0)                   # (25, 20)

    # ---- fc1 (500 -> 50) + ReLU ---------------------------------------------
    # fc1_drop (Dropout p=0.4) is identity in eval/inference mode.
    # TODO(synk): train-mode dropout (RNG masking) not implemented.
    acc = fc1b_ref[...]                                       # (1, 50)
    for q in range(25):
        acc = acc + jnp.dot(pooled2[q:q + 1, :],
                            fc1w_ref[q * 20:(q + 1) * 20, :],
                            preferred_element_type=f32)
    h1 = jnp.maximum(acc, 0.0)                                # (1, 50)

    # ---- fc2 (50 -> 10) + log_softmax ---------------------------------------
    logits = jnp.dot(h1, fc2w_ref[...], preferred_element_type=f32)
    logits = logits + fc2b_ref[...]
    mx = jnp.max(logits, axis=-1, keepdims=True)
    lse = jnp.log(jnp.sum(jnp.exp(logits - mx), axis=-1, keepdims=True))
    o_ref[0] = logits - mx - lse


# ---------------------------------------------------------------------------
# Wrappers
# ---------------------------------------------------------------------------
def _conv1_patches(x):
    # x: (B, 1, 28, 28) -> (B, 676, 9) conv1 im2col patches, rows permuted
    # into the pooling-friendly order (tiny: ~24 KB/image of XLA glue).
    B = x.shape[0]
    xi = x.reshape(B, 28, 28).astype(jnp.float32)
    cols = [xi[:, i:i + 26, j:j + 26] for i in range(3) for j in range(3)]
    p = jnp.stack(cols, axis=-1).reshape(B, 676, 9)           # rows: oh1*26+ow1
    return jnp.take(p, jnp.asarray(_POOL1_PERM), axis=1)


def preprocess_params(params):
    # One-time weight re-layouts, hoisted out of the per-batch forward.
    fc1w = params["fc1_w"].reshape(50, 20, 5, 5)
    fc1w = fc1w.transpose(2, 3, 1, 0).reshape(500, 50)        # rows: (h*5+w)*20+c
    return {
        "w1": params["conv1_w"].reshape(10, 9).T,                          # (9, 10)
        "b1": params["conv1_b"].reshape(1, 10).astype(jnp.float32),
        "w2": params["conv2_w"].transpose(2, 3, 1, 0).reshape(9, 10, 20),  # (k, ci, co)
        "b2": params["conv2_b"].reshape(1, 20).astype(jnp.float32),
        "fc1w": fc1w,
        "fc1b": params["fc1_b"].reshape(1, 50).astype(jnp.float32),
        "fc2w": params["fc2_w"].T,                                         # (50, 10)
        "fc2b": params["fc2_b"].reshape(1, 10).astype(jnp.float32),
    }


def net_forward(prep, x):
    # x: (B, 1, 28, 28) float32, NCHW -> (B, 10) log-probabilities.
    B = x.shape[0]
    patches = _conv1_patches(x)                               # (B, 676, 9)
    out = pl.pallas_call(
        _fused_net_kernel,
        out_shape=jax.ShapeDtypeStruct((B, 1, 10), jnp.float32),
        grid=(B,),
        in_specs=[
            pl.BlockSpec((1, 676, 9), lambda b: (b, 0, 0)),
            pl.BlockSpec((9, 10), lambda b: (0, 0)),
            pl.BlockSpec((1, 10), lambda b: (0, 0)),
            pl.BlockSpec((9, 10, 20), lambda b: (0, 0, 0)),
            pl.BlockSpec((1, 20), lambda b: (0, 0)),
            pl.BlockSpec((500, 50), lambda b: (0, 0)),
            pl.BlockSpec((1, 50), lambda b: (0, 0)),
            pl.BlockSpec((50, 10), lambda b: (0, 0)),
            pl.BlockSpec((1, 10), lambda b: (0, 0)),
        ],
        out_specs=pl.BlockSpec((1, 1, 10), lambda b: (b, 0, 0)),
        scratch_shapes=[pltpu.VMEM((169, 10), jnp.float32)],
        compiler_params=pltpu.CompilerParams(
            dimension_semantics=("parallel",)),
    )(patches, prep["w1"], prep["b1"], prep["w2"], prep["b2"],
      prep["fc1w"], prep["fc1b"], prep["fc2w"], prep["fc2b"])
    return out.reshape(B, 10)


# ---------------------------------------------------------------------------
# Pure-JAX reference (mirrors the PyTorch module) and parameter init
# ---------------------------------------------------------------------------
def net_forward_reference(params, x):
    hp = jax.lax.Precision.HIGHEST

    def conv(x, w, b):
        y = jax.lax.conv_general_dilated(
            x, w, window_strides=(1, 1), padding="VALID",
            dimension_numbers=("NCHW", "OIHW", "NCHW"), precision=hp)
        return y + b.reshape(1, -1, 1, 1)

    def pool(x):
        return jax.lax.reduce_window(x, -jnp.inf, jax.lax.max,
                                     (1, 1, 2, 2), (1, 1, 2, 2), "VALID")

    x = pool(jax.nn.relu(conv(x, params["conv1_w"], params["conv1_b"])))
    x = pool(jax.nn.relu(conv(x, params["conv2_w"], params["conv2_b"])))
    x = x.reshape(x.shape[0], -1)
    x = jax.nn.relu(jnp.dot(x, params["fc1_w"].T, precision=hp) + params["fc1_b"])
    x = jnp.dot(x, params["fc2_w"].T, precision=hp) + params["fc2_b"]
    return jax.nn.log_softmax(x, axis=-1)


def init_params(key):
    keys = jax.random.split(key, 8)

    def u(k, shape, fan_in):
        bound = 1.0 / jnp.sqrt(jnp.float32(fan_in))
        return jax.random.uniform(k, shape, jnp.float32, -bound, bound)

    return {
        "conv1_w": u(keys[0], (10, 1, 3, 3), 1 * 3 * 3),
        "conv1_b": u(keys[1], (10,), 1 * 3 * 3),
        "conv2_w": u(keys[2], (20, 10, 3, 3), 10 * 3 * 3),
        "conv2_b": u(keys[3], (20,), 10 * 3 * 3),
        "fc1_w": u(keys[4], (50, 20 * 5 * 5), 20 * 5 * 5),
        "fc1_b": u(keys[5], (50,), 20 * 5 * 5),
        "fc2_w": u(keys[6], (10, 50), 50),
        "fc2_b": u(keys[7], (10,), 50),
    }


if __name__ == "__main__":
    key = jax.random.PRNGKey(0)
    pkey, xkey = jax.random.split(key)
    params = init_params(pkey)
    prep = preprocess_params(params)
    x = jax.random.normal(xkey, (2, 1, 28, 28), dtype=jnp.float32)

    out = jax.jit(net_forward)(prep, x)
    out = jax.block_until_ready(out)

    assert out.shape == (2, 10), out.shape
    # log_softmax rows must sum to ~1 in prob space
    assert bool(jnp.allclose(jnp.sum(jnp.exp(out), axis=1), 1.0, atol=1e-4))
    # cross-check against a pure-JAX reference of the PyTorch forward
    ref = jax.jit(net_forward_reference)(params, x)
    err = float(jnp.max(jnp.abs(out - ref)))
    assert err < 1e-2, err
    print("KERNEL_OK")
</pallas_src>

<mosaic_0001>
module attributes {stable_mosaic.version = 11 : i64} {
  func.func @_fused_net_kernel(%arg0: i32, %arg1: memref<1x676x9xf32, #tpu.memory_space<vmem>>, %arg2: memref<9x10xf32, #tpu.memory_space<vmem>>, %arg3: memref<1x10xf32, #tpu.memory_space<vmem>>, %arg4: memref<9x10x20xf32, #tpu.memory_space<vmem>>, %arg5: memref<1x20xf32, #tpu.memory_space<vmem>>, %arg6: memref<500x50xf32, #tpu.memory_space<vmem>>, %arg7: memref<1x50xf32, #tpu.memory_space<vmem>>, %arg8: memref<50x10xf32, #tpu.memory_space<vmem>>, %arg9: memref<1x10xf32, #tpu.memory_space<vmem>>, %arg10: memref<1x1x10xf32, #tpu.memory_space<vmem>>, %arg11: memref<169x10xf32, #tpu.memory_space<vmem>>) attributes {dimension_semantics = [#tpu.dimension_semantics<parallel>], iteration_bounds = array<i64: 2>, scalar_prefetch = 0 : i64, scratch_operands = 1 : i64, tpu.core_type = #tpu.core_type<tc>, window_params = [{transform_indices = @transform_0, window_bounds = array<i64: 1, 676, 9>}, {pipeline_mode = #tpu.pipeline_mode<synchronous>, transform_indices = @transform_1, window_bounds = array<i64: 9, 10>}, {pipeline_mode = #tpu.pipeline_mode<synchronous>, transform_indices = @transform_2, window_bounds = array<i64: 1, 10>}, {pipeline_mode = #tpu.pipeline_mode<synchronous>, transform_indices = @transform_3, window_bounds = array<i64: 9, 10, 20>}, {pipeline_mode = #tpu.pipeline_mode<synchronous>, transform_indices = @transform_4, window_bounds = array<i64: 1, 20>}, {pipeline_mode = #tpu.pipeline_mode<synchronous>, transform_indices = @transform_5, window_bounds = array<i64: 500, 50>}, {pipeline_mode = #tpu.pipeline_mode<synchronous>, transform_indices = @transform_6, window_bounds = array<i64: 1, 50>}, {pipeline_mode = #tpu.pipeline_mode<synchronous>, transform_indices = @transform_7, window_bounds = array<i64: 50, 10>}, {pipeline_mode = #tpu.pipeline_mode<synchronous>, transform_indices = @transform_8, window_bounds = array<i64: 1, 10>}, {transform_indices = @transform_9, window_bounds = array<i64: 1, 1, 10>}]} {
    %c0 = arith.constant 0 : index
    %c0_0 = arith.constant 0 : index
    %c0_1 = arith.constant 0 : index
    %0 = vector.load %arg1[%c0, %c0_0, %c0_1] : memref<1x676x9xf32, #tpu.memory_space<vmem>>, vector<1x676x9xf32>
    %1 = vector.shape_cast %0 : vector<1x676x9xf32> to vector<676x9xf32>
    %2 = vector.extract_strided_slice %1 {offsets = [0, 0], sizes = [169, 9], strides = [1, 1]} : vector<676x9xf32> to vector<169x9xf32>
    %c0_2 = arith.constant 0 : index
    %c0_3 = arith.constant 0 : index
    %3 = vector.load %arg2[%c0_2, %c0_3] : memref<9x10xf32, #tpu.memory_space<vmem>>, vector<9x10xf32>
    %cst = arith.constant dense<0.000000e+00> : vector<169x10xf32>
    %4 = tpu.matmul %2, %3, %cst {dimension_numbers = #tpu.dot_dimension_numbers<[1], [0], [0], [1], [0, 0, 1, 1], [], []>} : vector<169x9xf32>, vector<9x10xf32>, vector<169x10xf32> -> vector<169x10xf32>
    %c0_4 = arith.constant 0 : index
    %c0_5 = arith.constant 0 : index
    %5 = vector.load %arg3[%c0_4, %c0_5] : memref<1x10xf32, #tpu.memory_space<vmem>>, vector<1x10xf32>
    %6 = vector.broadcast %5 : vector<1x10xf32> to vector<169x10xf32>
    %7 = arith.addf %4, %6 : vector<169x10xf32>
    %cst_6 = arith.constant 0.000000e+00 : f32
    %8 = vector.broadcast %cst_6 : f32 to vector<169x10xf32>
    %9 = arith.maximumf %7, %8 : vector<169x10xf32>
    %10 = vector.extract_strided_slice %1 {offsets = [169, 0], sizes = [169, 9], strides = [1, 1]} : vector<676x9xf32> to vector<169x9xf32>
    %c0_7 = arith.constant 0 : index
    %c0_8 = arith.constant 0 : index
    %11 = vector.load %arg2[%c0_7, %c0_8] : memref<9x10xf32, #tpu.memory_space<vmem>>, vector<9x10xf32>
    %cst_9 = arith.constant dense<0.000000e+00> : vector<169x10xf32>
    %12 = tpu.matmul %10, %11, %cst_9 {dimension_numbers = #tpu.dot_dimension_numbers<[1], [0], [0], [1], [0, 0, 1, 1], [], []>} : vector<169x9xf32>, vector<9x10xf32>, vector<169x10xf32> -> vector<169x10xf32>
    %c0_10 = arith.constant 0 : index
    %c0_11 = arith.constant 0 : index
    %13 = vector.load %arg3[%c0_10, %c0_11] : memref<1x10xf32, #tpu.memory_space<vmem>>, vector<1x10xf32>
    %14 = vector.broadcast %13 : vector<1x10xf32> to vector<169x10xf32>
    %15 = arith.addf %12, %14 : vector<169x10xf32>
    %cst_12 = arith.constant 0.000000e+00 : f32
    %16 = vector.broadcast %cst_12 : f32 to vector<169x10xf32>
    %17 = arith.maximumf %15, %16 : vector<169x10xf32>
    %18 = arith.maximumf %9, %17 : vector<169x10xf32>
    %19 = vector.extract_strided_slice %1 {offsets = [338, 0], sizes = [169, 9], strides = [1, 1]} : vector<676x9xf32> to vector<169x9xf32>
    %c0_13 = arith.constant 0 : index
    %c0_14 = arith.constant 0 : index
    %20 = vector.load %arg2[%c0_13, %c0_14] : memref<9x10xf32, #tpu.memory_space<vmem>>, vector<9x10xf32>
    %cst_15 = arith.constant dense<0.000000e+00> : vector<169x10xf32>
    %21 = tpu.matmul %19, %20, %cst_15 {dimension_numbers = #tpu.dot_dimension_numbers<[1], [0], [0], [1], [0, 0, 1, 1], [], []>} : vector<169x9xf32>, vector<9x10xf32>, vector<169x10xf32> -> vector<169x10xf32>
    %c0_16 = arith.constant 0 : index
    %c0_17 = arith.constant 0 : index
    %22 = vector.load %arg3[%c0_16, %c0_17] : memref<1x10xf32, #tpu.memory_space<vmem>>, vector<1x10xf32>
    %23 = vector.broadcast %22 : vector<1x10xf32> to vector<169x10xf32>
    %24 = arith.addf %21, %23 : vector<169x10xf32>
    %cst_18 = arith.constant 0.000000e+00 : f32
    %25 = vector.broadcast %cst_18 : f32 to vector<169x10xf32>
    %26 = arith.maximumf %24, %25 : vector<169x10xf32>
    %27 = arith.maximumf %18, %26 : vector<169x10xf32>
    %28 = vector.extract_strided_slice %1 {offsets = [507, 0], sizes = [169, 9], strides = [1, 1]} : vector<676x9xf32> to vector<169x9xf32>
    %c0_19 = arith.constant 0 : index
    %c0_20 = arith.constant 0 : index
    %29 = vector.load %arg2[%c0_19, %c0_20] : memref<9x10xf32, #tpu.memory_space<vmem>>, vector<9x10xf32>
    %cst_21 = arith.constant dense<0.000000e+00> : vector<169x10xf32>
    %30 = tpu.matmul %28, %29, %cst_21 {dimension_numbers = #tpu.dot_dimension_numbers<[1], [0], [0], [1], [0, 0, 1, 1], [], []>} : vector<169x9xf32>, vector<9x10xf32>, vector<169x10xf32> -> vector<169x10xf32>
    %c0_22 = arith.constant 0 : index
    %c0_23 = arith.constant 0 : index
    %31 = vector.load %arg3[%c0_22, %c0_23] : memref<1x10xf32, #tpu.memory_space<vmem>>, vector<1x10xf32>
    %32 = vector.broadcast %31 : vector<1x10xf32> to vector<169x10xf32>
    %33 = arith.addf %30, %32 : vector<169x10xf32>
    %cst_24 = arith.constant 0.000000e+00 : f32
    %34 = vector.broadcast %cst_24 : f32 to vector<169x10xf32>
    %35 = arith.maximumf %33, %34 : vector<169x10xf32>
    %36 = arith.maximumf %27, %35 : vector<169x10xf32>
    %c0_25 = arith.constant 0 : index
    %c0_26 = arith.constant 0 : index
    %37 = vector.load %arg11[%c0_25, %c0_26] : memref<169x10xf32, #tpu.memory_space<vmem>>, vector<169x10xf32>
    tpu.vector_store %arg11[%c0_25, %c0_26], %36 {strides = array<i32>} : memref<169x10xf32, #tpu.memory_space<vmem>>, vector<169x10xf32>,
    %c0_27 = arith.constant 0 : index
    %c0_28 = arith.constant 0 : index
    %38 = vector.load %arg11[%c0_27, %c0_28] : memref<169x10xf32, #tpu.memory_space<vmem>>, vector<5x10xf32>
    %c13 = arith.constant 13 : index
    %c0_29 = arith.constant 0 : index
    %39 = vector.load %arg11[%c13, %c0_29] : memref<169x10xf32, #tpu.memory_space<vmem>>, vector<5x10xf32>
    %c26 = arith.constant 26 : index
    %c0_30 = arith.constant 0 : index
    %40 = vector.load %arg11[%c26, %c0_30] : memref<169x10xf32, #tpu.memory_space<vmem>>, vector<5x10xf32>
    %c39 = arith.constant 39 : index
    %c0_31 = arith.constant 0 : index
    %41 = vector.load %arg11[%c39, %c0_31] : memref<169x10xf32, #tpu.memory_space<vmem>>, vector<5x10xf32>
    %c52 = arith.constant 52 : index
    %c0_32 = arith.constant 0 : index
    %42 = vector.load %arg11[%c52, %c0_32] : memref<169x10xf32, #tpu.memory_space<vmem>>, vector<5x10xf32>
    %c65 = arith.constant 65 : index
    %c0_33 = arith.constant 0 : index
    %43 = vector.load %arg11[%c65, %c0_33] : memref<169x10xf32, #tpu.memory_space<vmem>>, vector<5x10xf32>
    %c78 = arith.constant 78 : index
    %c0_34 = arith.constant 0 : index
    %44 = vector.load %arg11[%c78, %c0_34] : memref<169x10xf32, #tpu.memory_space<vmem>>, vector<5x10xf32>
    %c91 = arith.constant 91 : index
    %c0_35 = arith.constant 0 : index
    %45 = vector.load %arg11[%c91, %c0_35] : memref<169x10xf32, #tpu.memory_space<vmem>>, vector<5x10xf32>
    %c104 = arith.constant 104 : index
    %c0_36 = arith.constant 0 : index
    %46 = vector.load %arg11[%c104, %c0_36] : memref<169x10xf32, #tpu.memory_space<vmem>>, vector<5x10xf32>
    %c117 = arith.constant 117 : index
    %c0_37 = arith.constant 0 : index
    %47 = vector.load %arg11[%c117, %c0_37] : memref<169x10xf32, #tpu.memory_space<vmem>>, vector<5x10xf32>
    %c7 = arith.constant 7 : index
    %c0_38 = arith.constant 0 : index
    %48 = vector.load %arg11[%c7, %c0_38] : memref<169x10xf32, #tpu.memory_space<vmem>>, vector<5x10xf32>
    %c20 = arith.constant 20 : index
    %c0_39 = arith.constant 0 : index
    %49 = vector.load %arg11[%c20, %c0_39] : memref<169x10xf32, #tpu.memory_space<vmem>>, vector<5x10xf32>
    %c33 = arith.constant 33 : index
    %c0_40 = arith.constant 0 : index
    %50 = vector.load %arg11[%c33, %c0_40] : memref<169x10xf32, #tpu.memory_space<vmem>>, vector<5x10xf32>
    %c46 = arith.constant 46 : index
    %c0_41 = arith.constant 0 : index
    %51 = vector.load %arg11[%c46, %c0_41] : memref<169x10xf32, #tpu.memory_space<vmem>>, vector<5x10xf32>
    %c59 = arith.constant 59 : index
    %c0_42 = arith.constant 0 : index
    %52 = vector.load %arg11[%c59, %c0_42] : memref<169x10xf32, #tpu.memory_space<vmem>>, vector<5x10xf32>
    %c72 = arith.constant 72 : index
    %c0_43 = arith.constant 0 : index
    %53 = vector.load %arg11[%c72, %c0_43] : memref<169x10xf32, #tpu.memory_space<vmem>>, vector<5x10xf32>
    %c85 = arith.constant 85 : index
    %c0_44 = arith.constant 0 : index
    %54 = vector.load %arg11[%c85, %c0_44] : memref<169x10xf32, #tpu.memory_space<vmem>>, vector<5x10xf32>
    %c98 = arith.constant 98 : index
    %c0_45 = arith.constant 0 : index
    %55 = vector.load %arg11[%c98, %c0_45] : memref<169x10xf32, #tpu.memory_space<vmem>>, vector<5x10xf32>
    %c111 = arith.constant 111 : index
    %c0_46 = arith.constant 0 : index
    %56 = vector.load %arg11[%c111, %c0_46] : memref<169x10xf32, #tpu.memory_space<vmem>>, vector<5x10xf32>
    %c124 = arith.constant 124 : index
    %c0_47 = arith.constant 0 : index
    %57 = vector.load %arg11[%c124, %c0_47] : memref<169x10xf32, #tpu.memory_space<vmem>>, vector<5x10xf32>
    %58 = tpu.concatenate %38, %39, %40, %41, %42, %43, %44, %45, %46, %47, %48, %49, %50, %51, %52, %53 in 0 : vector<5x10xf32>, vector<5x10xf32>, vector<5x10xf32>, vector<5x10xf32>, vector<5x10xf32>, vector<5x10xf32>, vector<5x10xf32>, vector<5x10xf32>, vector<5x10xf32>, vector<5x10xf32>, vector<5x10xf32>, vector<5x10xf32>, vector<5x10xf32>, vector<5x10xf32>, vector<5x10xf32>, vector<5x10xf32> -> vector<80x10xf32>
    %59 = tpu.concatenate %54, %55, %56, %57 in 0 : vector<5x10xf32>, vector<5x10xf32>, vector<5x10xf32>, vector<5x10xf32> -> vector<20x10xf32>
    %60 = tpu.concatenate %58, %59 in 0 : vector<80x10xf32>, vector<20x10xf32> -> vector<100x10xf32>
    %c0_48 = arith.constant 0 : index
    %c0_49 = arith.constant 0 : index
    %c0_50 = arith.constant 0 : index
    %61 = vector.load %arg4[%c0_48, %c0_49, %c0_50] : memref<9x10x20xf32, #tpu.memory_space<vmem>>, vector<1x10x20xf32>
    %62 = vector.shape_cast %61 : vector<1x10x20xf32> to vector<10x20xf32>
    %cst_51 = arith.constant dense<0.000000e+00> : vector<100x20xf32>
    %63 = tpu.matmul %60, %62, %cst_51 {dimension_numbers = #tpu.dot_dimension_numbers<[1], [0], [0], [1], [0, 0, 1, 1], [], []>} : vector<100x10xf32>, vector<10x20xf32>, vector<100x20xf32> -> vector<100x20xf32>
    %c7_52 = arith.constant 7 : index
    %c0_53 = arith.constant 0 : index
    %64 = vector.load %arg11[%c7_52, %c0_53] : memref<169x10xf32, #tpu.memory_space<vmem>>, vector<5x10xf32>
    %c20_54 = arith.constant 20 : index
    %c0_55 = arith.constant 0 : index
    %65 = vector.load %arg11[%c20_54, %c0_55] : memref<169x10xf32, #tpu.memory_space<vmem>>, vector<5x10xf32>
    %c33_56 = arith.constant 33 : index
    %c0_57 = arith.constant 0 : index
    %66 = vector.load %arg11[%c33_56, %c0_57] : memref<169x10xf32, #tpu.memory_space<vmem>>, vector<5x10xf32>
    %c46_58 = arith.constant 46 : index
    %c0_59 = arith.constant 0 : index
    %67 = vector.load %arg11[%c46_58, %c0_59] : memref<169x10xf32, #tpu.memory_space<vmem>>, vector<5x10xf32>
    %c59_60 = arith.constant 59 : index
    %c0_61 = arith.constant 0 : index
    %68 = vector.load %arg11[%c59_60, %c0_61] : memref<169x10xf32, #tpu.memory_space<vmem>>, vector<5x10xf32>
    %c72_62 = arith.constant 72 : index
    %c0_63 = arith.constant 0 : index
    %69 = vector.load %arg11[%c72_62, %c0_63] : memref<169x10xf32, #tpu.memory_space<vmem>>, vector<5x10xf32>
    %c85_64 = arith.constant 85 : index
    %c0_65 = arith.constant 0 : index
    %70 = vector.load %arg11[%c85_64, %c0_65] : memref<169x10xf32, #tpu.memory_space<vmem>>, vector<5x10xf32>
    %c98_66 = arith.constant 98 : index
    %c0_67 = arith.constant 0 : index
    %71 = vector.load %arg11[%c98_66, %c0_67] : memref<169x10xf32, #tpu.memory_space<vmem>>, vector<5x10xf32>
    %c111_68 = arith.constant 111 : index
    %c0_69 = arith.constant 0 : index
    %72 = vector.load %arg11[%c111_68, %c0_69] : memref<169x10xf32, #tpu.memory_space<vmem>>, vector<5x10xf32>
    %c124_70 = arith.constant 124 : index
    %c0_71 = arith.constant 0 : index
    %73 = vector.load %arg11[%c124_70, %c0_71] : memref<169x10xf32, #tpu.memory_space<vmem>>, vector<5x10xf32>
    %c1 = arith.constant 1 : index
    %c0_72 = arith.constant 0 : index
    %74 = vector.load %arg11[%c1, %c0_72] : memref<169x10xf32, #tpu.memory_space<vmem>>, vector<5x10xf32>
    %c14 = arith.constant 14 : index
    %c0_73 = arith.constant 0 : index
    %75 = vector.load %arg11[%c14, %c0_73] : memref<169x10xf32, #tpu.memory_space<vmem>>, vector<5x10xf32>
    %c27 = arith.constant 27 : index
    %c0_74 = arith.constant 0 : index
    %76 = vector.load %arg11[%c27, %c0_74] : memref<169x10xf32, #tpu.memory_space<vmem>>, vector<5x10xf32>
    %c40 = arith.constant 40 : index
    %c0_75 = arith.constant 0 : index
    %77 = vector.load %arg11[%c40, %c0_75] : memref<169x10xf32, #tpu.memory_space<vmem>>, vector<5x10xf32>
    %c53 = arith.constant 53 : index
    %c0_76 = arith.constant 0 : index
    %78 = vector.load %arg11[%c53, %c0_76] : memref<169x10xf32, #tpu.memory_space<vmem>>, vector<5x10xf32>
    %c66 = arith.constant 66 : index
    %c0_77 = arith.constant 0 : index
    %79 = vector.load %arg11[%c66, %c0_77] : memref<169x10xf32, #tpu.memory_space<vmem>>, vector<5x10xf32>
    %c79 = arith.constant 79 : index
    %c0_78 = arith.constant 0 : index
    %80 = vector.load %arg11[%c79, %c0_78] : memref<169x10xf32, #tpu.memory_space<vmem>>, vector<5x10xf32>
    %c92 = arith.constant 92 : index
    %c0_79 = arith.constant 0 : index
    %81 = vector.load %arg11[%c92, %c0_79] : memref<169x10xf32, #tpu.memory_space<vmem>>, vector<5x10xf32>
    %c105 = arith.constant 105 : index
    %c0_80 = arith.constant 0 : index
    %82 = vector.load %arg11[%c105, %c0_80] : memref<169x10xf32, #tpu.memory_space<vmem>>, vector<5x10xf32>
    %c118 = arith.constant 118 : index
    %c0_81 = arith.constant 0 : index
    %83 = vector.load %arg11[%c118, %c0_81] : memref<169x10xf32, #tpu.memory_space<vmem>>, vector<5x10xf32>
    %84 = tpu.concatenate %64, %65, %66, %67, %68, %69, %70, %71, %72, %73, %74, %75, %76, %77, %78, %79 in 0 : vector<5x10xf32>, vector<5x10xf32>, vector<5x10xf32>, vector<5x10xf32>, vector<5x10xf32>, vector<5x10xf32>, vector<5x10xf32>, vector<5x10xf32>, vector<5x10xf32>, vector<5x10xf32>, vector<5x10xf32>, vector<5x10xf32>, vector<5x10xf32>, vector<5x10xf32>, vector<5x10xf32>, vector<5x10xf32> -> vector<80x10xf32>
    %85 = tpu.concatenate %80, %81, %82, %83 in 0 : vector<5x10xf32>, vector<5x10xf32>, vector<5x10xf32>, vector<5x10xf32> -> vector<20x10xf32>
    %86 = tpu.concatenate %84, %85 in 0 : vector<80x10xf32>, vector<20x10xf32> -> vector<100x10xf32>
    %c1_82 = arith.constant 1 : index
    %c0_83 = arith.constant 0 : index
    %c0_84 = arith.constant 0 : index
    %87 = vector.load %arg4[%c1_82, %c0_83, %c0_84] : memref<9x10x20xf32, #tpu.memory_space<vmem>>, vector<1x10x20xf32>
    %88 = vector.shape_cast %87 : vector<1x10x20xf32> to vector<10x20xf32>
    %cst_85 = arith.constant dense<0.000000e+00> : vector<100x20xf32>
    %89 = tpu.matmul %86, %88, %cst_85 {dimension_numbers = #tpu.dot_dimension_numbers<[1], [0], [0], [1], [0, 0, 1, 1], [], []>} : vector<100x10xf32>, vector<10x20xf32>, vector<100x20xf32> -> vector<100x20xf32>
    %90 = arith.addf %63, %89 : vector<100x20xf32>
    %c1_86 = arith.constant 1 : index
    %c0_87 = arith.constant 0 : index
    %91 = vector.load %arg11[%c1_86, %c0_87] : memref<169x10xf32, #tpu.memory_space<vmem>>, vector<5x10xf32>
    %c14_88 = arith.constant 14 : index
    %c0_89 = arith.constant 0 : index
    %92 = vector.load %arg11[%c14_88, %c0_89] : memref<169x10xf32, #tpu.memory_space<vmem>>, vector<5x10xf32>
    %c27_90 = arith.constant 27 : index
    %c0_91 = arith.constant 0 : index
    %93 = vector.load %arg11[%c27_90, %c0_91] : memref<169x10xf32, #tpu.memory_space<vmem>>, vector<5x10xf32>
    %c40_92 = arith.constant 40 : index
    %c0_93 = arith.constant 0 : index
    %94 = vector.load %arg11[%c40_92, %c0_93] : memref<169x10xf32, #tpu.memory_space<vmem>>, vector<5x10xf32>
    %c53_94 = arith.constant 53 : index
    %c0_95 = arith.constant 0 : index
    %95 = vector.load %arg11[%c53_94, %c0_95] : memref<169x10xf32, #tpu.memory_space<vmem>>, vector<5x10xf32>
    %c66_96 = arith.constant 66 : index
    %c0_97 = arith.constant 0 : index
    %96 = vector.load %arg11[%c66_96, %c0_97] : memref<169x10xf32, #tpu.memory_space<vmem>>, vector<5x10xf32>
    %c79_98 = arith.constant 79 : index
    %c0_99 = arith.constant 0 : index
    %97 = vector.load %arg11[%c79_98, %c0_99] : memref<169x10xf32, #tpu.memory_space<vmem>>, vector<5x10xf32>
    %c92_100 = arith.constant 92 : index
    %c0_101 = arith.constant 0 : index
    %98 = vector.load %arg11[%c92_100, %c0_101] : memref<169x10xf32, #tpu.memory_space<vmem>>, vector<5x10xf32>
    %c105_102 = arith.constant 105 : index
    %c0_103 = arith.constant 0 : index
    %99 = vector.load %arg11[%c105_102, %c0_103] : memref<169x10xf32, #tpu.memory_space<vmem>>, vector<5x10xf32>
    %c118_104 = arith.constant 118 : index
    %c0_105 = arith.constant 0 : index
    %100 = vector.load %arg11[%c118_104, %c0_105] : memref<169x10xf32, #tpu.memory_space<vmem>>, vector<5x10xf32>
    %c8 = arith.constant 8 : index
    %c0_106 = arith.constant 0 : index
    %101 = vector.load %arg11[%c8, %c0_106] : memref<169x10xf32, #tpu.memory_space<vmem>>, vector<5x10xf32>
    %c21 = arith.constant 21 : index
    %c0_107 = arith.constant 0 : index
    %102 = vector.load %arg11[%c21, %c0_107] : memref<169x10xf32, #tpu.memory_space<vmem>>, vector<5x10xf32>
    %c34 = arith.constant 34 : index
    %c0_108 = arith.constant 0 : index
    %103 = vector.load %arg11[%c34, %c0_108] : memref<169x10xf32, #tpu.memory_space<vmem>>, vector<5x10xf32>
    %c47 = arith.constant 47 : index
    %c0_109 = arith.constant 0 : index
    %104 = vector.load %arg11[%c47, %c0_109] : memref<169x10xf32, #tpu.memory_space<vmem>>, vector<5x10xf32>
    %c60 = arith.constant 60 : index
    %c0_110 = arith.constant 0 : index
    %105 = vector.load %arg11[%c60, %c0_110] : memref<169x10xf32, #tpu.memory_space<vmem>>, vector<5x10xf32>
    %c73 = arith.constant 73 : index
    %c0_111 = arith.constant 0 : index
    %106 = vector.load %arg11[%c73, %c0_111] : memref<169x10xf32, #tpu.memory_space<vmem>>, vector<5x10xf32>
    %c86 = arith.constant 86 : index
    %c0_112 = arith.constant 0 : index
    %107 = vector.load %arg11[%c86, %c0_112] : memref<169x10xf32, #tpu.memory_space<vmem>>, vector<5x10xf32>
    %c99 = arith.constant 99 : index
    %c0_113 = arith.constant 0 : index
    %108 = vector.load %arg11[%c99, %c0_113] : memref<169x10xf32, #tpu.memory_space<vmem>>, vector<5x10xf32>
    %c112 = arith.constant 112 : index
    %c0_114 = arith.constant 0 : index
    %109 = vector.load %arg11[%c112, %c0_114] : memref<169x10xf32, #tpu.memory_space<vmem>>, vector<5x10xf32>
    %c125 = arith.constant 125 : index
    %c0_115 = arith.constant 0 : index
    %110 = vector.load %arg11[%c125, %c0_115] : memref<169x10xf32, #tpu.memory_space<vmem>>, vector<5x10xf32>
    %111 = tpu.concatenate %91, %92, %93, %94, %95, %96, %97, %98, %99, %100, %101, %102, %103, %104, %105, %106 in 0 : vector<5x10xf32>, vector<5x10xf32>, vector<5x10xf32>, vector<5x10xf32>, vector<5x10xf32>, vector<5x10xf32>, vector<5x10xf32>, vector<5x10xf32>, vector<5x10xf32>, vector<5x10xf32>, vector<5x10xf32>, vector<5x10xf32>, vector<5x10xf32>, vector<5x10xf32>, vector<5x10xf32>, vector<5x10xf32> -> vector<80x10xf32>
    %112 = tpu.concatenate %107, %108, %109, %110 in 0 : vector<5x10xf32>, vector<5x10xf32>, vector<5x10xf32>, vector<5x10xf32> -> vector<20x10xf32>
    %113 = tpu.concatenate %111, %112 in 0 : vector<80x10xf32>, vector<20x10xf32> -> vector<100x10xf32>
    %c2 = arith.constant 2 : index
    %c0_116 = arith.constant 0 : index
    %c0_117 = arith.constant 0 : index
    %114 = vector.load %arg4[%c2, %c0_116, %c0_117] : memref<9x10x20xf32, #tpu.memory_space<vmem>>, vector<1x10x20xf32>
    %115 = vector.shape_cast %114 : vector<1x10x20xf32> to vector<10x20xf32>
    %cst_118 = arith.constant dense<0.000000e+00> : vector<100x20xf32>
    %116 = tpu.matmul %113, %115, %cst_118 {dimension_numbers = #tpu.dot_dimension_numbers<[1], [0], [0], [1], [0, 0, 1, 1], [], []>} : vector<100x10xf32>, vector<10x20xf32>, vector<100x20xf32> -> vector<100x20xf32>
    %117 = arith.addf %90, %116 : vector<100x20xf32>
    %c13_119 = arith.constant 13 : index
    %c0_120 = arith.constant 0 : index
    %118 = vector.load %arg11[%c13_119, %c0_120] : memref<169x10xf32, #tpu.memory_space<vmem>>, vector<5x10xf32>
    %c26_121 = arith.constant 26 : index
    %c0_122 = arith.constant 0 : index
    %119 = vector.load %arg11[%c26_121, %c0_122] : memref<169x10xf32, #tpu.memory_space<vmem>>, vector<5x10xf32>
    %c39_123 = arith.constant 39 : index
    %c0_124 = arith.constant 0 : index
    %120 = vector.load %arg11[%c39_123, %c0_124] : memref<169x10xf32, #tpu.memory_space<vmem>>, vector<5x10xf32>
    %c52_125 = arith.constant 52 : index
    %c0_126 = arith.constant 0 : index
    %121 = vector.load %arg11[%c52_125, %c0_126] : memref<169x10xf32, #tpu.memory_space<vmem>>, vector<5x10xf32>
    %c65_127 = arith.constant 65 : index
    %c0_128 = arith.constant 0 : index
    %122 = vector.load %arg11[%c65_127, %c0_128] : memref<169x10xf32, #tpu.memory_space<vmem>>, vector<5x10xf32>
    %c78_129 = arith.constant 78 : index
    %c0_130 = arith.constant 0 : index
    %123 = vector.load %arg11[%c78_129, %c0_130] : memref<169x10xf32, #tpu.memory_space<vmem>>, vector<5x10xf32>
    %c91_131 = arith.constant 91 : index
    %c0_132 = arith.constant 0 : index
    %124 = vector.load %arg11[%c91_131, %c0_132] : memref<169x10xf32, #tpu.memory_space<vmem>>, vector<5x10xf32>
    %c104_133 = arith.constant 104 : index
    %c0_134 = arith.constant 0 : index
    %125 = vector.load %arg11[%c104_133, %c0_134] : memref<169x10xf32, #tpu.memory_space<vmem>>, vector<5x10xf32>
    %c117_135 = arith.constant 117 : index
    %c0_136 = arith.constant 0 : index
    %126 = vector.load %arg11[%c117_135, %c0_136] : memref<169x10xf32, #tpu.memory_space<vmem>>, vector<5x10xf32>
    %c130 = arith.constant 130 : index
    %c0_137 = arith.constant 0 : index
    %127 = vector.load %arg11[%c130, %c0_137] : memref<169x10xf32, #tpu.memory_space<vmem>>, vector<5x10xf32>
    %c20_138 = arith.constant 20 : index
    %c0_139 = arith.constant 0 : index
    %128 = vector.load %arg11[%c20_138, %c0_139] : memref<169x10xf32, #tpu.memory_space<vmem>>, vector<5x10xf32>
    %c33_140 = arith.constant 33 : index
    %c0_141 = arith.constant 0 : index
    %129 = vector.load %arg11[%c33_140, %c0_141] : memref<169x10xf32, #tpu.memory_space<vmem>>, vector<5x10xf32>
    %c46_142 = arith.constant 46 : index
    %c0_143 = arith.constant 0 : index
    %130 = vector.load %arg11[%c46_142, %c0_143] : memref<169x10xf32, #tpu.memory_space<vmem>>, vector<5x10xf32>
    %c59_144 = arith.constant 59 : index
    %c0_145 = arith.constant 0 : index
    %131 = vector.load %arg11[%c59_144, %c0_145] : memref<169x10xf32, #tpu.memory_space<vmem>>, vector<5x10xf32>
    %c72_146 = arith.constant 72 : index
    %c0_147 = arith.constant 0 : index
    %132 = vector.load %arg11[%c72_146, %c0_147] : memref<169x10xf32, #tpu.memory_space<vmem>>, vector<5x10xf32>
    %c85_148 = arith.constant 85 : index
    %c0_149 = arith.constant 0 : index
    %133 = vector.load %arg11[%c85_148, %c0_149] : memref<169x10xf32, #tpu.memory_space<vmem>>, vector<5x10xf32>
    %c98_150 = arith.constant 98 : index
    %c0_151 = arith.constant 0 : index
    %134 = vector.load %arg11[%c98_150, %c0_151] : memref<169x10xf32, #tpu.memory_space<vmem>>, vector<5x10xf32>
    %c111_152 = arith.constant 111 : index
    %c0_153 = arith.constant 0 : index
    %135 = vector.load %arg11[%c111_152, %c0_153] : memref<169x10xf32, #tpu.memory_space<vmem>>, vector<5x10xf32>
    %c124_154 = arith.constant 124 : index
    %c0_155 = arith.constant 0 : index
    %136 = vector.load %arg11[%c124_154, %c0_155] : memref<169x10xf32, #tpu.memory_space<vmem>>, vector<5x10xf32>
    %c137 = arith.constant 137 : index
    %c0_156 = arith.constant 0 : index
    %137 = vector.load %arg11[%c137, %c0_156] : memref<169x10xf32, #tpu.memory_space<vmem>>, vector<5x10xf32>
    %138 = tpu.concatenate %118, %119, %120, %121, %122, %123, %124, %125, %126, %127, %128, %129, %130, %131, %132, %133 in 0 : vector<5x10xf32>, vector<5x10xf32>, vector<5x10xf32>, vector<5x10xf32>, vector<5x10xf32>, vector<5x10xf32>, vector<5x10xf32>, vector<5x10xf32>, vector<5x10xf32>, vector<5x10xf32>, vector<5x10xf32>, vector<5x10xf32>, vector<5x10xf32>, vector<5x10xf32>, vector<5x10xf32>, vector<5x10xf32> -> vector<80x10xf32>
    %139 = tpu.concatenate %134, %135, %136, %137 in 0 : vector<5x10xf32>, vector<5x10xf32>, vector<5x10xf32>, vector<5x10xf32> -> vector<20x10xf32>
    %140 = tpu.concatenate %138, %139 in 0 : vector<80x10xf32>, vector<20x10xf32> -> vector<100x10xf32>
    %c3 = arith.constant 3 : index
    %c0_157 = arith.constant 0 : index
    %c0_158 = arith.constant 0 : index
    %141 = vector.load %arg4[%c3, %c0_157, %c0_158] : memref<9x10x20xf32, #tpu.memory_space<vmem>>, vector<1x10x20xf32>
    %142 = vector.shape_cast %141 : vector<1x10x20xf32> to vector<10x20xf32>
    %cst_159 = arith.constant dense<0.000000e+00> : vector<100x20xf32>
    %143 = tpu.matmul %140, %142, %cst_159 {dimension_numbers = #tpu.dot_dimension_numbers<[1], [0], [0], [1], [0, 0, 1, 1], [], []>} : vector<100x10xf32>, vector<10x20xf32>, vector<100x20xf32> -> vector<100x20xf32>
    %144 = arith.addf %117, %143 : vector<100x20xf32>
    %c20_160 = arith.constant 20 : index
    %c0_161 = arith.constant 0 : index
    %145 = vector.load %arg11[%c20_160, %c0_161] : memref<169x10xf32, #tpu.memory_space<vmem>>, vector<5x10xf32>
    %c33_162 = arith.constant 33 : index
    %c0_163 = arith.constant 0 : index
    %146 = vector.load %arg11[%c33_162, %c0_163] : memref<169x10xf32, #tpu.memory_space<vmem>>, vector<5x10xf32>
    %c46_164 = arith.constant 46 : index
    %c0_165 = arith.constant 0 : index
    %147 = vector.load %arg11[%c46_164, %c0_165] : memref<169x10xf32, #tpu.memory_space<vmem>>, vector<5x10xf32>
    %c59_166 = arith.constant 59 : index
    %c0_167 = arith.constant 0 : index
    %148 = vector.load %arg11[%c59_166, %c0_167] : memref<169x10xf32, #tpu.memory_space<vmem>>, vector<5x10xf32>
    %c72_168 = arith.constant 72 : index
    %c0_169 = arith.constant 0 : index
    %149 = vector.load %arg11[%c72_168, %c0_169] : memref<169x10xf32, #tpu.memory_space<vmem>>, vector<5x10xf32>
    %c85_170 = arith.constant 85 : index
    %c0_171 = arith.constant 0 : index
    %150 = vector.load %arg11[%c85_170, %c0_171] : memref<169x10xf32, #tpu.memory_space<vmem>>, vector<5x10xf32>
    %c98_172 = arith.constant 98 : index
    %c0_173 = arith.constant 0 : index
    %151 = vector.load %arg11[%c98_172, %c0_173] : memref<169x10xf32, #tpu.memory_space<vmem>>, vector<5x10xf32>
    %c111_174 = arith.constant 111 : index
    %c0_175 = arith.constant 0 : index
    %152 = vector.load %arg11[%c111_174, %c0_175] : memref<169x10xf32, #tpu.memory_space<vmem>>, vector<5x10xf32>
    %c124_176 = arith.constant 124 : index
    %c0_177 = arith.constant 0 : index
    %153 = vector.load %arg11[%c124_176, %c0_177] : memref<169x10xf32, #tpu.memory_space<vmem>>, vector<5x10xf32>
    %c137_178 = arith.constant 137 : index
    %c0_179 = arith.constant 0 : index
    %154 = vector.load %arg11[%c137_178, %c0_179] : memref<169x10xf32, #tpu.memory_space<vmem>>, vector<5x10xf32>
    %c14_180 = arith.constant 14 : index
    %c0_181 = arith.constant 0 : index
    %155 = vector.load %arg11[%c14_180, %c0_181] : memref<169x10xf32, #tpu.memory_space<vmem>>, vector<5x10xf32>
    %c27_182 = arith.constant 27 : index
    %c0_183 = arith.constant 0 : index
    %156 = vector.load %arg11[%c27_182, %c0_183] : memref<169x10xf32, #tpu.memory_space<vmem>>, vector<5x10xf32>
    %c40_184 = arith.constant 40 : index
    %c0_185 = arith.constant 0 : index
    %157 = vector.load %arg11[%c40_184, %c0_185] : memref<169x10xf32, #tpu.memory_space<vmem>>, vector<5x10xf32>
    %c53_186 = arith.constant 53 : index
    %c0_187 = arith.constant 0 : index
    %158 = vector.load %arg11[%c53_186, %c0_187] : memref<169x10xf32, #tpu.memory_space<vmem>>, vector<5x10xf32>
    %c66_188 = arith.constant 66 : index
    %c0_189 = arith.constant 0 : index
    %159 = vector.load %arg11[%c66_188, %c0_189] : memref<169x10xf32, #tpu.memory_space<vmem>>, vector<5x10xf32>
    %c79_190 = arith.constant 79 : index
    %c0_191 = arith.constant 0 : index
    %160 = vector.load %arg11[%c79_190, %c0_191] : memref<169x10xf32, #tpu.memory_space<vmem>>, vector<5x10xf32>
    %c92_192 = arith.constant 92 : index
    %c0_193 = arith.constant 0 : index
    %161 = vector.load %arg11[%c92_192, %c0_193] : memref<169x10xf32, #tpu.memory_space<vmem>>, vector<5x10xf32>
    %c105_194 = arith.constant 105 : index
    %c0_195 = arith.constant 0 : index
    %162 = vector.load %arg11[%c105_194, %c0_195] : memref<169x10xf32, #tpu.memory_space<vmem>>, vector<5x10xf32>
    %c118_196 = arith.constant 118 : index
    %c0_197 = arith.constant 0 : index
    %163 = vector.load %arg11[%c118_196, %c0_197] : memref<169x10xf32, #tpu.memory_space<vmem>>, vector<5x10xf32>
    %c131 = arith.constant 131 : index
    %c0_198 = arith.constant 0 : index
    %164 = vector.load %arg11[%c131, %c0_198] : memref<169x10xf32, #tpu.memory_space<vmem>>, vector<5x10xf32>
    %165 = tpu.concatenate %145, %146, %147, %148, %149, %150, %151, %152, %153, %154, %155, %156, %157, %158, %159, %160 in 0 : vector<5x10xf32>, vector<5x10xf32>, vector<5x10xf32>, vector<5x10xf32>, vector<5x10xf32>, vector<5x10xf32>, vector<5x10xf32>, vector<5x10xf32>, vector<5x10xf32>, vector<5x10xf32>, vector<5x10xf32>, vector<5x10xf32>, vector<5x10xf32>, vector<5x10xf32>, vector<5x10xf32>, vector<5x10xf32> -> vector<80x10xf32>
    %166 = tpu.concatenate %161, %162, %163, %164 in 0 : vector<5x10xf32>, vector<5x10xf32>, vector<5x10xf32>, vector<5x10xf32> -> vector<20x10xf32>
    %167 = tpu.concatenate %165, %166 in 0 : vector<80x10xf32>, vector<20x10xf32> -> vector<100x10xf32>
    %c4 = arith.constant 4 : index
    %c0_199 = arith.constant 0 : index
    %c0_200 = arith.constant 0 : index
    %168 = vector.load %arg4[%c4, %c0_199, %c0_200] : memref<9x10x20xf32, #tpu.memory_space<vmem>>, vector<1x10x20xf32>
    %169 = vector.shape_cast %168 : vector<1x10x20xf32> to vector<10x20xf32>
    %cst_201 = arith.constant dense<0.000000e+00> : vector<100x20xf32>
    %170 = tpu.matmul %167, %169, %cst_201 {dimension_numbers = #tpu.dot_dimension_numbers<[1], [0], [0], [1], [0, 0, 1, 1], [], []>} : vector<100x10xf32>, vector<10x20xf32>, vector<100x20xf32> -> vector<100x20xf32>
    %171 = arith.addf %144, %170 : vector<100x20xf32>
    %c14_202 = arith.constant 14 : index
    %c0_203 = arith.constant 0 : index
    %172 = vector.load %arg11[%c14_202, %c0_203] : memref<169x10xf32, #tpu.memory_space<vmem>>, vector<5x10xf32>
    %c27_204 = arith.constant 27 : index
    %c0_205 = arith.constant 0 : index
    %173 = vector.load %arg11[%c27_204, %c0_205] : memref<169x10xf32, #tpu.memory_space<vmem>>, vector<5x10xf32>
    %c40_206 = arith.constant 40 : index
    %c0_207 = arith.constant 0 : index
    %174 = vector.load %arg11[%c40_206, %c0_207] : memref<169x10xf32, #tpu.memory_space<vmem>>, vector<5x10xf32>
    %c53_208 = arith.constant 53 : index
    %c0_209 = arith.constant 0 : index
    %175 = vector.load %arg11[%c53_208, %c0_209] : memref<169x10xf32, #tpu.memory_space<vmem>>, vector<5x10xf32>
    %c66_210 = arith.constant 66 : index
    %c0_211 = arith.constant 0 : index
    %176 = vector.load %arg11[%c66_210, %c0_211] : memref<169x10xf32, #tpu.memory_space<vmem>>, vector<5x10xf32>
    %c79_212 = arith.constant 79 : index
    %c0_213 = arith.constant 0 : index
    %177 = vector.load %arg11[%c79_212, %c0_213] : memref<169x10xf32, #tpu.memory_space<vmem>>, vector<5x10xf32>
    %c92_214 = arith.constant 92 : index
    %c0_215 = arith.constant 0 : index
    %178 = vector.load %arg11[%c92_214, %c0_215] : memref<169x10xf32, #tpu.memory_space<vmem>>, vector<5x10xf32>
    %c105_216 = arith.constant 105 : index
    %c0_217 = arith.constant 0 : index
    %179 = vector.load %arg11[%c105_216, %c0_217] : memref<169x10xf32, #tpu.memory_space<vmem>>, vector<5x10xf32>
    %c118_218 = arith.constant 118 : index
    %c0_219 = arith.constant 0 : index
    %180 = vector.load %arg11[%c118_218, %c0_219] : memref<169x10xf32, #tpu.memory_space<vmem>>, vector<5x10xf32>
    %c131_220 = arith.constant 131 : index
    %c0_221 = arith.constant 0 : index
    %181 = vector.load %arg11[%c131_220, %c0_221] : memref<169x10xf32, #tpu.memory_space<vmem>>, vector<5x10xf32>
    %c21_222 = arith.constant 21 : index
    %c0_223 = arith.constant 0 : index
    %182 = vector.load %arg11[%c21_222, %c0_223] : memref<169x10xf32, #tpu.memory_space<vmem>>, vector<5x10xf32>
    %c34_224 = arith.constant 34 : index
    %c0_225 = arith.constant 0 : index
    %183 = vector.load %arg11[%c34_224, %c0_225] : memref<169x10xf32, #tpu.memory_space<vmem>>, vector<5x10xf32>
    %c47_226 = arith.constant 47 : index
    %c0_227 = arith.constant 0 : index
    %184 = vector.load %arg11[%c47_226, %c0_227] : memref<169x10xf32, #tpu.memory_space<vmem>>, vector<5x10xf32>
    %c60_228 = arith.constant 60 : index
    %c0_229 = arith.constant 0 : index
    %185 = vector.load %arg11[%c60_228, %c0_229] : memref<169x10xf32, #tpu.memory_space<vmem>>, vector<5x10xf32>
    %c73_230 = arith.constant 73 : index
    %c0_231 = arith.constant 0 : index
    %186 = vector.load %arg11[%c73_230, %c0_231] : memref<169x10xf32, #tpu.memory_space<vmem>>, vector<5x10xf32>
    %c86_232 = arith.constant 86 : index
    %c0_233 = arith.constant 0 : index
    %187 = vector.load %arg11[%c86_232, %c0_233] : memref<169x10xf32, #tpu.memory_space<vmem>>, vector<5x10xf32>
    %c99_234 = arith.constant 99 : index
    %c0_235 = arith.constant 0 : index
    %188 = vector.load %arg11[%c99_234, %c0_235] : memref<169x10xf32, #tpu.memory_space<vmem>>, vector<5x10xf32>
    %c112_236 = arith.constant 112 : index
    %c0_237 = arith.constant 0 : index
    %189 = vector.load %arg11[%c112_236, %c0_237] : memref<169x10xf32, #tpu.memory_space<vmem>>, vector<5x10xf32>
    %c125_238 = arith.constant 125 : index
    %c0_239 = arith.constant 0 : index
    %190 = vector.load %arg11[%c125_238, %c0_239] : memref<169x10xf32, #tpu.memory_space<vmem>>, vector<5x10xf32>
    %c138 = arith.constant 138 : index
    %c0_240 = arith.constant 0 : index
    %191 = vector.load %arg11[%c138, %c0_240] : memref<169x10xf32, #tpu.memory_space<vmem>>, vector<5x10xf32>
    %192 = tpu.concatenate %172, %173, %174, %175, %176, %177, %178, %179, %180, %181, %182, %183, %184, %185, %186, %187 in 0 : vector<5x10xf32>, vector<5x10xf32>, vector<5x10xf32>, vector<5x10xf32>, vector<5x10xf32>, vector<5x10xf32>, vector<5x10xf32>, vector<5x10xf32>, vector<5x10xf32>, vector<5x10xf32>, vector<5x10xf32>, vector<5x10xf32>, vector<5x10xf32>, vector<5x10xf32>, vector<5x10xf32>, vector<5x10xf32> -> vector<80x10xf32>
    %193 = tpu.concatenate %188, %189, %190, %191 in 0 : vector<5x10xf32>, vector<5x10xf32>, vector<5x10xf32>, vector<5x10xf32> -> vector<20x10xf32>
    %194 = tpu.concatenate %192, %193 in 0 : vector<80x10xf32>, vector<20x10xf32> -> vector<100x10xf32>
    %c5 = arith.constant 5 : index
    %c0_241 = arith.constant 0 : index
    %c0_242 = arith.constant 0 : index
    %195 = vector.load %arg4[%c5, %c0_241, %c0_242] : memref<9x10x20xf32, #tpu.memory_space<vmem>>, vector<1x10x20xf32>
    %196 = vector.shape_cast %195 : vector<1x10x20xf32> to vector<10x20xf32>
    %cst_243 = arith.constant dense<0.000000e+00> : vector<100x20xf32>
    %197 = tpu.matmul %194, %196, %cst_243 {dimension_numbers = #tpu.dot_dimension_numbers<[1], [0], [0], [1], [0, 0, 1, 1], [], []>} : vector<100x10xf32>, vector<10x20xf32>, vector<100x20xf32> -> vector<100x20xf32>
    %198 = arith.addf %171, %197 : vector<100x20xf32>
    %c26_244 = arith.constant 26 : index
    %c0_245 = arith.constant 0 : index
    %199 = vector.load %arg11[%c26_244, %c0_245] : memref<169x10xf32, #tpu.memory_space<vmem>>, vector<5x10xf32>
    %c39_246 = arith.constant 39 : index
    %c0_247 = arith.constant 0 : index
    %200 = vector.load %arg11[%c39_246, %c0_247] : memref<169x10xf32, #tpu.memory_space<vmem>>, vector<5x10xf32>
    %c52_248 = arith.constant 52 : index
    %c0_249 = arith.constant 0 : index
    %201 = vector.load %arg11[%c52_248, %c0_249] : memref<169x10xf32, #tpu.memory_space<vmem>>, vector<5x10xf32>
    %c65_250 = arith.constant 65 : index
    %c0_251 = arith.constant 0 : index
    %202 = vector.load %arg11[%c65_250, %c0_251] : memref<169x10xf32, #tpu.memory_space<vmem>>, vector<5x10xf32>
    %c78_252 = arith.constant 78 : index
    %c0_253 = arith.constant 0 : index
    %203 = vector.load %arg11[%c78_252, %c0_253] : memref<169x10xf32, #tpu.memory_space<vmem>>, vector<5x10xf32>
    %c91_254 = arith.constant 91 : index
    %c0_255 = arith.constant 0 : index
    %204 = vector.load %arg11[%c91_254, %c0_255] : memref<169x10xf32, #tpu.memory_space<vmem>>, vector<5x10xf32>
    %c104_256 = arith.constant 104 : index
    %c0_257 = arith.constant 0 : index
    %205 = vector.load %arg11[%c104_256, %c0_257] : memref<169x10xf32, #tpu.memory_space<vmem>>, vector<5x10xf32>
    %c117_258 = arith.constant 117 : index
    %c0_259 = arith.constant 0 : index
    %206 = vector.load %arg11[%c117_258, %c0_259] : memref<169x10xf32, #tpu.memory_space<vmem>>, vector<5x10xf32>
    %c130_260 = arith.constant 130 : index
    %c0_261 = arith.constant 0 : index
    %207 = vector.load %arg11[%c130_260, %c0_261] : memref<169x10xf32, #tpu.memory_space<vmem>>, vector<5x10xf32>
    %c143 = arith.constant 143 : index
    %c0_262 = arith.constant 0 : index
    %208 = vector.load %arg11[%c143, %c0_262] : memref<169x10xf32, #tpu.memory_space<vmem>>, vector<5x10xf32>
    %c33_263 = arith.constant 33 : index
    %c0_264 = arith.constant 0 : index
    %209 = vector.load %arg11[%c33_263, %c0_264] : memref<169x10xf32, #tpu.memory_space<vmem>>, vector<5x10xf32>
    %c46_265 = arith.constant 46 : index
    %c0_266 = arith.constant 0 : index
    %210 = vector.load %arg11[%c46_265, %c0_266] : memref<169x10xf32, #tpu.memory_space<vmem>>, vector<5x10xf32>
    %c59_267 = arith.constant 59 : index
    %c0_268 = arith.constant 0 : index
    %211 = vector.load %arg11[%c59_267, %c0_268] : memref<169x10xf32, #tpu.memory_space<vmem>>, vector<5x10xf32>
    %c72_269 = arith.constant 72 : index
    %c0_270 = arith.constant 0 : index
    %212 = vector.load %arg11[%c72_269, %c0_270] : memref<169x10xf32, #tpu.memory_space<vmem>>, vector<5x10xf32>
    %c85_271 = arith.constant 85 : index
    %c0_272 = arith.constant 0 : index
    %213 = vector.load %arg11[%c85_271, %c0_272] : memref<169x10xf32, #tpu.memory_space<vmem>>, vector<5x10xf32>
    %c98_273 = arith.constant 98 : index
    %c0_274 = arith.constant 0 : index
    %214 = vector.load %arg11[%c98_273, %c0_274] : memref<169x10xf32, #tpu.memory_space<vmem>>, vector<5x10xf32>
    %c111_275 = arith.constant 111 : index
    %c0_276 = arith.constant 0 : index
    %215 = vector.load %arg11[%c111_275, %c0_276] : memref<169x10xf32, #tpu.memory_space<vmem>>, vector<5x10xf32>
    %c124_277 = arith.constant 124 : index
    %c0_278 = arith.constant 0 : index
    %216 = vector.load %arg11[%c124_277, %c0_278] : memref<169x10xf32, #tpu.memory_space<vmem>>, vector<5x10xf32>
    %c137_279 = arith.constant 137 : index
    %c0_280 = arith.constant 0 : index
    %217 = vector.load %arg11[%c137_279, %c0_280] : memref<169x10xf32, #tpu.memory_space<vmem>>, vector<5x10xf32>
    %c150 = arith.constant 150 : index
    %c0_281 = arith.constant 0 : index
    %218 = vector.load %arg11[%c150, %c0_281] : memref<169x10xf32, #tpu.memory_space<vmem>>, vector<5x10xf32>
    %219 = tpu.concatenate %199, %200, %201, %202, %203, %204, %205, %206, %207, %208, %209, %210, %211, %212, %213, %214 in 0 : vector<5x10xf32>, vector<5x10xf32>, vector<5x10xf32>, vector<5x10xf32>, vector<5x10xf32>, vector<5x10xf32>, vector<5x10xf32>, vector<5x10xf32>, vector<5x10xf32>, vector<5x10xf32>, vector<5x10xf32>, vector<5x10xf32>, vector<5x10xf32>, vector<5x10xf32>, vector<5x10xf32>, vector<5x10xf32> -> vector<80x10xf32>
    %220 = tpu.concatenate %215, %216, %217, %218 in 0 : vector<5x10xf32>, vector<5x10xf32>, vector<5x10xf32>, vector<5x10xf32> -> vector<20x10xf32>
    %221 = tpu.concatenate %219, %220 in 0 : vector<80x10xf32>, vector<20x10xf32> -> vector<100x10xf32>
    %c6 = arith.constant 6 : index
    %c0_282 = arith.constant 0 : index
    %c0_283 = arith.constant 0 : index
    %222 = vector.load %arg4[%c6, %c0_282, %c0_283] : memref<9x10x20xf32, #tpu.memory_space<vmem>>, vector<1x10x20xf32>
    %223 = vector.shape_cast %222 : vector<1x10x20xf32> to vector<10x20xf32>
    %cst_284 = arith.constant dense<0.000000e+00> : vector<100x20xf32>
    %224 = tpu.matmul %221, %223, %cst_284 {dimension_numbers = #tpu.dot_dimension_numbers<[1], [0], [0], [1], [0, 0, 1, 1], [], []>} : vector<100x10xf32>, vector<10x20xf32>, vector<100x20xf32> -> vector<100x20xf32>
    %225 = arith.addf %198, %224 : vector<100x20xf32>
    %c33_285 = arith.constant 33 : index
    %c0_286 = arith.constant 0 : index
    %226 = vector.load %arg11[%c33_285, %c0_286] : memref<169x10xf32, #tpu.memory_space<vmem>>, vector<5x10xf32>
    %c46_287 = arith.constant 46 : index
    %c0_288 = arith.constant 0 : index
    %227 = vector.load %arg11[%c46_287, %c0_288] : memref<169x10xf32, #tpu.memory_space<vmem>>, vector<5x10xf32>
    %c59_289 = arith.constant 59 : index
    %c0_290 = arith.constant 0 : index
    %228 = vector.load %arg11[%c59_289, %c0_290] : memref<169x10xf32, #tpu.memory_space<vmem>>, vector<5x10xf32>
    %c72_291 = arith.constant 72 : index
    %c0_292 = arith.constant 0 : index
    %229 = vector.load %arg11[%c72_291, %c0_292] : memref<169x10xf32, #tpu.memory_space<vmem>>, vector<5x10xf32>
    %c85_293 = arith.constant 85 : index
    %c0_294 = arith.constant 0 : index
    %230 = vector.load %arg11[%c85_293, %c0_294] : memref<169x10xf32, #tpu.memory_space<vmem>>, vector<5x10xf32>
    %c98_295 = arith.constant 98 : index
    %c0_296 = arith.constant 0 : index
    %231 = vector.load %arg11[%c98_295, %c0_296] : memref<169x10xf32, #tpu.memory_space<vmem>>, vector<5x10xf32>
    %c111_297 = arith.constant 111 : index
    %c0_298 = arith.constant 0 : index
    %232 = vector.load %arg11[%c111_297, %c0_298] : memref<169x10xf32, #tpu.memory_space<vmem>>, vector<5x10xf32>
    %c124_299 = arith.constant 124 : index
    %c0_300 = arith.constant 0 : index
    %233 = vector.load %arg11[%c124_299, %c0_300] : memref<169x10xf32, #tpu.memory_space<vmem>>, vector<5x10xf32>
    %c137_301 = arith.constant 137 : index
    %c0_302 = arith.constant 0 : index
    %234 = vector.load %arg11[%c137_301, %c0_302] : memref<169x10xf32, #tpu.memory_space<vmem>>, vector<5x10xf32>
    %c150_303 = arith.constant 150 : index
    %c0_304 = arith.constant 0 : index
    %235 = vector.load %arg11[%c150_303, %c0_304] : memref<169x10xf32, #tpu.memory_space<vmem>>, vector<5x10xf32>
    %c27_305 = arith.constant 27 : index
    %c0_306 = arith.constant 0 : index
    %236 = vector.load %arg11[%c27_305, %c0_306] : memref<169x10xf32, #tpu.memory_space<vmem>>, vector<5x10xf32>
    %c40_307 = arith.constant 40 : index
    %c0_308 = arith.constant 0 : index
    %237 = vector.load %arg11[%c40_307, %c0_308] : memref<169x10xf32, #tpu.memory_space<vmem>>, vector<5x10xf32>
    %c53_309 = arith.constant 53 : index
    %c0_310 = arith.constant 0 : index
    %238 = vector.load %arg11[%c53_309, %c0_310] : memref<169x10xf32, #tpu.memory_space<vmem>>, vector<5x10xf32>
    %c66_311 = arith.constant 66 : index
    %c0_312 = arith.constant 0 : index
    %239 = vector.load %arg11[%c66_311, %c0_312] : memref<169x10xf32, #tpu.memory_space<vmem>>, vector<5x10xf32>
    %c79_313 = arith.constant 79 : index
    %c0_314 = arith.constant 0 : index
    %240 = vector.load %arg11[%c79_313, %c0_314] : memref<169x10xf32, #tpu.memory_space<vmem>>, vector<5x10xf32>
    %c92_315 = arith.constant 92 : index
    %c0_316 = arith.constant 0 : index
    %241 = vector.load %arg11[%c92_315, %c0_316] : memref<169x10xf32, #tpu.memory_space<vmem>>, vector<5x10xf32>
    %c105_317 = arith.constant 105 : index
    %c0_318 = arith.constant 0 : index
    %242 = vector.load %arg11[%c105_317, %c0_318] : memref<169x10xf32, #tpu.memory_space<vmem>>, vector<5x10xf32>
    %c118_319 = arith.constant 118 : index
    %c0_320 = arith.constant 0 : index
    %243 = vector.load %arg11[%c118_319, %c0_320] : memref<169x10xf32, #tpu.memory_space<vmem>>, vector<5x10xf32>
    %c131_321 = arith.constant 131 : index
    %c0_322 = arith.constant 0 : index
    %244 = vector.load %arg11[%c131_321, %c0_322] : memref<169x10xf32, #tpu.memory_space<vmem>>, vector<5x10xf32>
    %c144 = arith.constant 144 : index
    %c0_323 = arith.constant 0 : index
    %245 = vector.load %arg11[%c144, %c0_323] : memref<169x10xf32, #tpu.memory_space<vmem>>, vector<5x10xf32>
    %246 = tpu.concatenate %226, %227, %228, %229, %230, %231, %232, %233, %234, %235, %236, %237, %238, %239, %240, %241 in 0 : vector<5x10xf32>, vector<5x10xf32>, vector<5x10xf32>, vector<5x10xf32>, vector<5x10xf32>, vector<5x10xf32>, vector<5x10xf32>, vector<5x10xf32>, vector<5x10xf32>, vector<5x10xf32>, vector<5x10xf32>, vector<5x10xf32>, vector<5x10xf32>, vector<5x10xf32>, vector<5x10xf32>, vector<5x10xf32> -> vector<80x10xf32>
    %247 = tpu.concatenate %242, %243, %244, %245 in 0 : vector<5x10xf32>, vector<5x10xf32>, vector<5x10xf32>, vector<5x10xf32> -> vector<20x10xf32>
    %248 = tpu.concatenate %246, %247 in 0 : vector<80x10xf32>, vector<20x10xf32> -> vector<100x10xf32>
    %c7_324 = arith.constant 7 : index
    %c0_325 = arith.constant 0 : index
    %c0_326 = arith.constant 0 : index
    %249 = vector.load %arg4[%c7_324, %c0_325, %c0_326] : memref<9x10x20xf32, #tpu.memory_space<vmem>>, vector<1x10x20xf32>
    %250 = vector.shape_cast %249 : vector<1x10x20xf32> to vector<10x20xf32>
    %cst_327 = arith.constant dense<0.000000e+00> : vector<100x20xf32>
    %251 = tpu.matmul %248, %250, %cst_327 {dimension_numbers = #tpu.dot_dimension_numbers<[1], [0], [0], [1], [0, 0, 1, 1], [], []>} : vector<100x10xf32>, vector<10x20xf32>, vector<100x20xf32> -> vector<100x20xf32>
    %252 = arith.addf %225, %251 : vector<100x20xf32>
    %c27_328 = arith.constant 27 : index
    %c0_329 = arith.constant 0 : index
    %253 = vector.load %arg11[%c27_328, %c0_329] : memref<169x10xf32, #tpu.memory_space<vmem>>, vector<5x10xf32>
    %c40_330 = arith.constant 40 : index
    %c0_331 = arith.constant 0 : index
    %254 = vector.load %arg11[%c40_330, %c0_331] : memref<169x10xf32, #tpu.memory_space<vmem>>, vector<5x10xf32>
    %c53_332 = arith.constant 53 : index
    %c0_333 = arith.constant 0 : index
    %255 = vector.load %arg11[%c53_332, %c0_333] : memref<169x10xf32, #tpu.memory_space<vmem>>, vector<5x10xf32>
    %c66_334 = arith.constant 66 : index
    %c0_335 = arith.constant 0 : index
    %256 = vector.load %arg11[%c66_334, %c0_335] : memref<169x10xf32, #tpu.memory_space<vmem>>, vector<5x10xf32>
    %c79_336 = arith.constant 79 : index
    %c0_337 = arith.constant 0 : index
    %257 = vector.load %arg11[%c79_336, %c0_337] : memref<169x10xf32, #tpu.memory_space<vmem>>, vector<5x10xf32>
    %c92_338 = arith.constant 92 : index
    %c0_339 = arith.constant 0 : index
    %258 = vector.load %arg11[%c92_338, %c0_339] : memref<169x10xf32, #tpu.memory_space<vmem>>, vector<5x10xf32>
    %c105_340 = arith.constant 105 : index
    %c0_341 = arith.constant 0 : index
    %259 = vector.load %arg11[%c105_340, %c0_341] : memref<169x10xf32, #tpu.memory_space<vmem>>, vector<5x10xf32>
    %c118_342 = arith.constant 118 : index
    %c0_343 = arith.constant 0 : index
    %260 = vector.load %arg11[%c118_342, %c0_343] : memref<169x10xf32, #tpu.memory_space<vmem>>, vector<5x10xf32>
    %c131_344 = arith.constant 131 : index
    %c0_345 = arith.constant 0 : index
    %261 = vector.load %arg11[%c131_344, %c0_345] : memref<169x10xf32, #tpu.memory_space<vmem>>, vector<5x10xf32>
    %c144_346 = arith.constant 144 : index
    %c0_347 = arith.constant 0 : index
    %262 = vector.load %arg11[%c144_346, %c0_347] : memref<169x10xf32, #tpu.memory_space<vmem>>, vector<5x10xf32>
    %c34_348 = arith.constant 34 : index
    %c0_349 = arith.constant 0 : index
    %263 = vector.load %arg11[%c34_348, %c0_349] : memref<169x10xf32, #tpu.memory_space<vmem>>, vector<5x10xf32>
    %c47_350 = arith.constant 47 : index
    %c0_351 = arith.constant 0 : index
    %264 = vector.load %arg11[%c47_350, %c0_351] : memref<169x10xf32, #tpu.memory_space<vmem>>, vector<5x10xf32>
    %c60_352 = arith.constant 60 : index
    %c0_353 = arith.constant 0 : index
    %265 = vector.load %arg11[%c60_352, %c0_353] : memref<169x10xf32, #tpu.memory_space<vmem>>, vector<5x10xf32>
    %c73_354 = arith.constant 73 : index
    %c0_355 = arith.constant 0 : index
    %266 = vector.load %arg11[%c73_354, %c0_355] : memref<169x10xf32, #tpu.memory_space<vmem>>, vector<5x10xf32>
    %c86_356 = arith.constant 86 : index
    %c0_357 = arith.constant 0 : index
    %267 = vector.load %arg11[%c86_356, %c0_357] : memref<169x10xf32, #tpu.memory_space<vmem>>, vector<5x10xf32>
    %c99_358 = arith.constant 99 : index
    %c0_359 = arith.constant 0 : index
    %268 = vector.load %arg11[%c99_358, %c0_359] : memref<169x10xf32, #tpu.memory_space<vmem>>, vector<5x10xf32>
    %c112_360 = arith.constant 112 : index
    %c0_361 = arith.constant 0 : index
    %269 = vector.load %arg11[%c112_360, %c0_361] : memref<169x10xf32, #tpu.memory_space<vmem>>, vector<5x10xf32>
    %c125_362 = arith.constant 125 : index
    %c0_363 = arith.constant 0 : index
    %270 = vector.load %arg11[%c125_362, %c0_363] : memref<169x10xf32, #tpu.memory_space<vmem>>, vector<5x10xf32>
    %c138_364 = arith.constant 138 : index
    %c0_365 = arith.constant 0 : index
    %271 = vector.load %arg11[%c138_364, %c0_365] : memref<169x10xf32, #tpu.memory_space<vmem>>, vector<5x10xf32>
    %c151 = arith.constant 151 : index
    %c0_366 = arith.constant 0 : index
    %272 = vector.load %arg11[%c151, %c0_366] : memref<169x10xf32, #tpu.memory_space<vmem>>, vector<5x10xf32>
    %273 = tpu.concatenate %253, %254, %255, %256, %257, %258, %259, %260, %261, %262, %263, %264, %265, %266, %267, %268 in 0 : vector<5x10xf32>, vector<5x10xf32>, vector<5x10xf32>, vector<5x10xf32>, vector<5x10xf32>, vector<5x10xf32>, vector<5x10xf32>, vector<5x10xf32>, vector<5x10xf32>, vector<5x10xf32>, vector<5x10xf32>, vector<5x10xf32>, vector<5x10xf32>, vector<5x10xf32>, vector<5x10xf32>, vector<5x10xf32> -> vector<80x10xf32>
    %274 = tpu.concatenate %269, %270, %271, %272 in 0 : vector<5x10xf32>, vector<5x10xf32>, vector<5x10xf32>, vector<5x10xf32> -> vector<20x10xf32>
    %275 = tpu.concatenate %273, %274 in 0 : vector<80x10xf32>, vector<20x10xf32> -> vector<100x10xf32>
    %c8_367 = arith.constant 8 : index
    %c0_368 = arith.constant 0 : index
    %c0_369 = arith.constant 0 : index
    %276 = vector.load %arg4[%c8_367, %c0_368, %c0_369] : memref<9x10x20xf32, #tpu.memory_space<vmem>>, vector<1x10x20xf32>
    %277 = vector.shape_cast %276 : vector<1x10x20xf32> to vector<10x20xf32>
    %cst_370 = arith.constant dense<0.000000e+00> : vector<100x20xf32>
    %278 = tpu.matmul %275, %277, %cst_370 {dimension_numbers = #tpu.dot_dimension_numbers<[1], [0], [0], [1], [0, 0, 1, 1], [], []>} : vector<100x10xf32>, vector<10x20xf32>, vector<100x20xf32> -> vector<100x20xf32>
    %279 = arith.addf %252, %278 : vector<100x20xf32>
    %c0_371 = arith.constant 0 : index
    %c0_372 = arith.constant 0 : index
    %280 = vector.load %arg5[%c0_371, %c0_372] : memref<1x20xf32, #tpu.memory_space<vmem>>, vector<1x20xf32>
    %281 = vector.broadcast %280 : vector<1x20xf32> to vector<100x20xf32>
    %282 = arith.addf %279, %281 : vector<100x20xf32>
    %cst_373 = arith.constant 0.000000e+00 : f32
    %283 = vector.broadcast %cst_373 : f32 to vector<100x20xf32>
    %284 = arith.maximumf %282, %283 : vector<100x20xf32>
    %285 = vector.extract_strided_slice %284 {offsets = [0, 0], sizes = [50, 20], strides = [1, 1]} : vector<100x20xf32> to vector<50x20xf32>
    %286 = vector.extract_strided_slice %284 {offsets = [50, 0], sizes = [50, 20], strides = [1, 1]} : vector<100x20xf32> to vector<50x20xf32>
    %287 = arith.maximumf %285, %286 : vector<50x20xf32>
    %288 = vector.extract_strided_slice %287 {offsets = [0, 0], sizes = [5, 20], strides = [1, 1]} : vector<50x20xf32> to vector<5x20xf32>
    %289 = vector.extract_strided_slice %287 {offsets = [5, 0], sizes = [5, 20], strides = [1, 1]} : vector<50x20xf32> to vector<5x20xf32>
    %290 = arith.maximumf %288, %289 : vector<5x20xf32>
    %291 = vector.extract_strided_slice %287 {offsets = [10, 0], sizes = [5, 20], strides = [1, 1]} : vector<50x20xf32> to vector<5x20xf32>
    %292 = vector.extract_strided_slice %287 {offsets = [15, 0], sizes = [5, 20], strides = [1, 1]} : vector<50x20xf32> to vector<5x20xf32>
    %293 = arith.maximumf %291, %292 : vector<5x20xf32>
    %294 = vector.extract_strided_slice %287 {offsets = [20, 0], sizes = [5, 20], strides = [1, 1]} : vector<50x20xf32> to vector<5x20xf32>
    %295 = vector.extract_strided_slice %287 {offsets = [25, 0], sizes = [5, 20], strides = [1, 1]} : vector<50x20xf32> to vector<5x20xf32>
    %296 = arith.maximumf %294, %295 : vector<5x20xf32>
    %297 = vector.extract_strided_slice %287 {offsets = [30, 0], sizes = [5, 20], strides = [1, 1]} : vector<50x20xf32> to vector<5x20xf32>
    %298 = vector.extract_strided_slice %287 {offsets = [35, 0], sizes = [5, 20], strides = [1, 1]} : vector<50x20xf32> to vector<5x20xf32>
    %299 = arith.maximumf %297, %298 : vector<5x20xf32>
    %300 = vector.extract_strided_slice %287 {offsets = [40, 0], sizes = [5, 20], strides = [1, 1]} : vector<50x20xf32> to vector<5x20xf32>
    %301 = vector.extract_strided_slice %287 {offsets = [45, 0], sizes = [5, 20], strides = [1, 1]} : vector<50x20xf32> to vector<5x20xf32>
    %302 = arith.maximumf %300, %301 : vector<5x20xf32>
    %303 = tpu.concatenate %290, %293, %296, %299, %302 in 0 : vector<5x20xf32>, vector<5x20xf32>, vector<5x20xf32>, vector<5x20xf32>, vector<5x20xf32> -> vector<25x20xf32>
    %c0_374 = arith.constant 0 : index
    %c0_375 = arith.constant 0 : index
    %304 = vector.load %arg7[%c0_374, %c0_375] : memref<1x50xf32, #tpu.memory_space<vmem>>, vector<1x50xf32>
    %305 = vector.extract_strided_slice %303 {offsets = [0, 0], sizes = [1, 20], strides = [1, 1]} : vector<25x20xf32> to vector<1x20xf32>
    %c0_376 = arith.constant 0 : index
    %c0_377 = arith.constant 0 : index
    %306 = vector.load %arg6[%c0_376, %c0_377] : memref<500x50xf32, #tpu.memory_space<vmem>>, vector<20x50xf32>
    %cst_378 = arith.constant dense<0.000000e+00> : vector<1x50xf32>
    %307 = tpu.matmul %305, %306, %cst_378 {dimension_numbers = #tpu.dot_dimension_numbers<[1], [0], [0], [1], [0, 0, 1, 1], [], []>} : vector<1x20xf32>, vector<20x50xf32>, vector<1x50xf32> -> vector<1x50xf32>
    %308 = arith.addf %304, %307 : vector<1x50xf32>
    %309 = vector.extract_strided_slice %303 {offsets = [1, 0], sizes = [1, 20], strides = [1, 1]} : vector<25x20xf32> to vector<1x20xf32>
    %c20_379 = arith.constant 20 : index
    %c0_380 = arith.constant 0 : index
    %310 = vector.load %arg6[%c20_379, %c0_380] : memref<500x50xf32, #tpu.memory_space<vmem>>, vector<20x50xf32>
    %cst_381 = arith.constant dense<0.000000e+00> : vector<1x50xf32>
    %311 = tpu.matmul %309, %310, %cst_381 {dimension_numbers = #tpu.dot_dimension_numbers<[1], [0], [0], [1], [0, 0, 1, 1], [], []>} : vector<1x20xf32>, vector<20x50xf32>, vector<1x50xf32> -> vector<1x50xf32>
    %312 = arith.addf %308, %311 : vector<1x50xf32>
    %313 = vector.extract_strided_slice %303 {offsets = [2, 0], sizes = [1, 20], strides = [1, 1]} : vector<25x20xf32> to vector<1x20xf32>
    %c40_382 = arith.constant 40 : index
    %c0_383 = arith.constant 0 : index
    %314 = vector.load %arg6[%c40_382, %c0_383] : memref<500x50xf32, #tpu.memory_space<vmem>>, vector<20x50xf32>
    %cst_384 = arith.constant dense<0.000000e+00> : vector<1x50xf32>
    %315 = tpu.matmul %313, %314, %cst_384 {dimension_numbers = #tpu.dot_dimension_numbers<[1], [0], [0], [1], [0, 0, 1, 1], [], []>} : vector<1x20xf32>, vector<20x50xf32>, vector<1x50xf32> -> vector<1x50xf32>
    %316 = arith.addf %312, %315 : vector<1x50xf32>
    %317 = vector.extract_strided_slice %303 {offsets = [3, 0], sizes = [1, 20], strides = [1, 1]} : vector<25x20xf32> to vector<1x20xf32>
    %c60_385 = arith.constant 60 : index
    %c0_386 = arith.constant 0 : index
    %318 = vector.load %arg6[%c60_385, %c0_386] : memref<500x50xf32, #tpu.memory_space<vmem>>, vector<20x50xf32>
    %cst_387 = arith.constant dense<0.000000e+00> : vector<1x50xf32>
    %319 = tpu.matmul %317, %318, %cst_387 {dimension_numbers = #tpu.dot_dimension_numbers<[1], [0], [0], [1], [0, 0, 1, 1], [], []>} : vector<1x20xf32>, vector<20x50xf32>, vector<1x50xf32> -> vector<1x50xf32>
    %320 = arith.addf %316, %319 : vector<1x50xf32>
    %321 = vector.extract_strided_slice %303 {offsets = [4, 0], sizes = [1, 20], strides = [1, 1]} : vector<25x20xf32> to vector<1x20xf32>
    %c80 = arith.constant 80 : index
    %c0_388 = arith.constant 0 : index
    %322 = vector.load %arg6[%c80, %c0_388] : memref<500x50xf32, #tpu.memory_space<vmem>>, vector<20x50xf32>
    %cst_389 = arith.constant dense<0.000000e+00> : vector<1x50xf32>
    %323 = tpu.matmul %321, %322, %cst_389 {dimension_numbers = #tpu.dot_dimension_numbers<[1], [0], [0], [1], [0, 0, 1, 1], [], []>} : vector<1x20xf32>, vector<20x50xf32>, vector<1x50xf32> -> vector<1x50xf32>
    %324 = arith.addf %320, %323 : vector<1x50xf32>
    %325 = vector.extract_strided_slice %303 {offsets = [5, 0], sizes = [1, 20], strides = [1, 1]} : vector<25x20xf32> to vector<1x20xf32>
    %c100 = arith.constant 100 : index
    %c0_390 = arith.constant 0 : index
    %326 = vector.load %arg6[%c100, %c0_390] : memref<500x50xf32, #tpu.memory_space<vmem>>, vector<20x50xf32>
    %cst_391 = arith.constant dense<0.000000e+00> : vector<1x50xf32>
    %327 = tpu.matmul %325, %326, %cst_391 {dimension_numbers = #tpu.dot_dimension_numbers<[1], [0], [0], [1], [0, 0, 1, 1], [], []>} : vector<1x20xf32>, vector<20x50xf32>, vector<1x50xf32> -> vector<1x50xf32>
    %328 = arith.addf %324, %327 : vector<1x50xf32>
    %329 = vector.extract_strided_slice %303 {offsets = [6, 0], sizes = [1, 20], strides = [1, 1]} : vector<25x20xf32> to vector<1x20xf32>
    %c120 = arith.constant 120 : index
    %c0_392 = arith.constant 0 : index
    %330 = vector.load %arg6[%c120, %c0_392] : memref<500x50xf32, #tpu.memory_space<vmem>>, vector<20x50xf32>
    %cst_393 = arith.constant dense<0.000000e+00> : vector<1x50xf32>
    %331 = tpu.matmul %329, %330, %cst_393 {dimension_numbers = #tpu.dot_dimension_numbers<[1], [0], [0], [1], [0, 0, 1, 1], [], []>} : vector<1x20xf32>, vector<20x50xf32>, vector<1x50xf32> -> vector<1x50xf32>
    %332 = arith.addf %328, %331 : vector<1x50xf32>
    %333 = vector.extract_strided_slice %303 {offsets = [7, 0], sizes = [1, 20], strides = [1, 1]} : vector<25x20xf32> to vector<1x20xf32>
    %c140 = arith.constant 140 : index
    %c0_394 = arith.constant 0 : index
    %334 = vector.load %arg6[%c140, %c0_394] : memref<500x50xf32, #tpu.memory_space<vmem>>, vector<20x50xf32>
    %cst_395 = arith.constant dense<0.000000e+00> : vector<1x50xf32>
    %335 = tpu.matmul %333, %334, %cst_395 {dimension_numbers = #tpu.dot_dimension_numbers<[1], [0], [0], [1], [0, 0, 1, 1], [], []>} : vector<1x20xf32>, vector<20x50xf32>, vector<1x50xf32> -> vector<1x50xf32>
    %336 = arith.addf %332, %335 : vector<1x50xf32>
    %337 = vector.extract_strided_slice %303 {offsets = [8, 0], sizes = [1, 20], strides = [1, 1]} : vector<25x20xf32> to vector<1x20xf32>
    %c160 = arith.constant 160 : index
    %c0_396 = arith.constant 0 : index
    %338 = vector.load %arg6[%c160, %c0_396] : memref<500x50xf32, #tpu.memory_space<vmem>>, vector<20x50xf32>
    %cst_397 = arith.constant dense<0.000000e+00> : vector<1x50xf32>
    %339 = tpu.matmul %337, %338, %cst_397 {dimension_numbers = #tpu.dot_dimension_numbers<[1], [0], [0], [1], [0, 0, 1, 1], [], []>} : vector<1x20xf32>, vector<20x50xf32>, vector<1x50xf32> -> vector<1x50xf32>
    %340 = arith.addf %336, %339 : vector<1x50xf32>
    %341 = vector.extract_strided_slice %303 {offsets = [9, 0], sizes = [1, 20], strides = [1, 1]} : vector<25x20xf32> to vector<1x20xf32>
    %c180 = arith.constant 180 : index
    %c0_398 = arith.constant 0 : index
    %342 = vector.load %arg6[%c180, %c0_398] : memref<500x50xf32, #tpu.memory_space<vmem>>, vector<20x50xf32>
    %cst_399 = arith.constant dense<0.000000e+00> : vector<1x50xf32>
    %343 = tpu.matmul %341, %342, %cst_399 {dimension_numbers = #tpu.dot_dimension_numbers<[1], [0], [0], [1], [0, 0, 1, 1], [], []>} : vector<1x20xf32>, vector<20x50xf32>, vector<1x50xf32> -> vector<1x50xf32>
    %344 = arith.addf %340, %343 : vector<1x50xf32>
    %345 = vector.extract_strided_slice %303 {offsets = [10, 0], sizes = [1, 20], strides = [1, 1]} : vector<25x20xf32> to vector<1x20xf32>
    %c200 = arith.constant 200 : index
    %c0_400 = arith.constant 0 : index
    %346 = vector.load %arg6[%c200, %c0_400] : memref<500x50xf32, #tpu.memory_space<vmem>>, vector<20x50xf32>
    %cst_401 = arith.constant dense<0.000000e+00> : vector<1x50xf32>
    %347 = tpu.matmul %345, %346, %cst_401 {dimension_numbers = #tpu.dot_dimension_numbers<[1], [0], [0], [1], [0, 0, 1, 1], [], []>} : vector<1x20xf32>, vector<20x50xf32>, vector<1x50xf32> -> vector<1x50xf32>
    %348 = arith.addf %344, %347 : vector<1x50xf32>
    %349 = vector.extract_strided_slice %303 {offsets = [11, 0], sizes = [1, 20], strides = [1, 1]} : vector<25x20xf32> to vector<1x20xf32>
    %c220 = arith.constant 220 : index
    %c0_402 = arith.constant 0 : index
    %350 = vector.load %arg6[%c220, %c0_402] : memref<500x50xf32, #tpu.memory_space<vmem>>, vector<20x50xf32>
    %cst_403 = arith.constant dense<0.000000e+00> : vector<1x50xf32>
    %351 = tpu.matmul %349, %350, %cst_403 {dimension_numbers = #tpu.dot_dimension_numbers<[1], [0], [0], [1], [0, 0, 1, 1], [], []>} : vector<1x20xf32>, vector<20x50xf32>, vector<1x50xf32> -> vector<1x50xf32>
    %352 = arith.addf %348, %351 : vector<1x50xf32>
    %353 = vector.extract_strided_slice %303 {offsets = [12, 0], sizes = [1, 20], strides = [1, 1]} : vector<25x20xf32> to vector<1x20xf32>
    %c240 = arith.constant 240 : index
    %c0_404 = arith.constant 0 : index
    %354 = vector.load %arg6[%c240, %c0_404] : memref<500x50xf32, #tpu.memory_space<vmem>>, vector<20x50xf32>
    %cst_405 = arith.constant dense<0.000000e+00> : vector<1x50xf32>
    %355 = tpu.matmul %353, %354, %cst_405 {dimension_numbers = #tpu.dot_dimension_numbers<[1], [0], [0], [1], [0, 0, 1, 1], [], []>} : vector<1x20xf32>, vector<20x50xf32>, vector<1x50xf32> -> vector<1x50xf32>
    %356 = arith.addf %352, %355 : vector<1x50xf32>
    %357 = vector.extract_strided_slice %303 {offsets = [13, 0], sizes = [1, 20], strides = [1, 1]} : vector<25x20xf32> to vector<1x20xf32>
    %c260 = arith.constant 260 : index
    %c0_406 = arith.constant 0 : index
    %358 = vector.load %arg6[%c260, %c0_406] : memref<500x50xf32, #tpu.memory_space<vmem>>, vector<20x50xf32>
    %cst_407 = arith.constant dense<0.000000e+00> : vector<1x50xf32>
    %359 = tpu.matmul %357, %358, %cst_407 {dimension_numbers = #tpu.dot_dimension_numbers<[1], [0], [0], [1], [0, 0, 1, 1], [], []>} : vector<1x20xf32>, vector<20x50xf32>, vector<1x50xf32> -> vector<1x50xf32>
    %360 = arith.addf %356, %359 : vector<1x50xf32>
    %361 = vector.extract_strided_slice %303 {offsets = [14, 0], sizes = [1, 20], strides = [1, 1]} : vector<25x20xf32> to vector<1x20xf32>
    %c280 = arith.constant 280 : index
    %c0_408 = arith.constant 0 : index
    %362 = vector.load %arg6[%c280, %c0_408] : memref<500x50xf32, #tpu.memory_space<vmem>>, vector<20x50xf32>
    %cst_409 = arith.constant dense<0.000000e+00> : vector<1x50xf32>
    %363 = tpu.matmul %361, %362, %cst_409 {dimension_numbers = #tpu.dot_dimension_numbers<[1], [0], [0], [1], [0, 0, 1, 1], [], []>} : vector<1x20xf32>, vector<20x50xf32>, vector<1x50xf32> -> vector<1x50xf32>
    %364 = arith.addf %360, %363 : vector<1x50xf32>
    %365 = vector.extract_strided_slice %303 {offsets = [15, 0], sizes = [1, 20], strides = [1, 1]} : vector<25x20xf32> to vector<1x20xf32>
    %c300 = arith.constant 300 : index
    %c0_410 = arith.constant 0 : index
    %366 = vector.load %arg6[%c300, %c0_410] : memref<500x50xf32, #tpu.memory_space<vmem>>, vector<20x50xf32>
    %cst_411 = arith.constant dense<0.000000e+00> : vector<1x50xf32>
    %367 = tpu.matmul %365, %366, %cst_411 {dimension_numbers = #tpu.dot_dimension_numbers<[1], [0], [0], [1], [0, 0, 1, 1], [], []>} : vector<1x20xf32>, vector<20x50xf32>, vector<1x50xf32> -> vector<1x50xf32>
    %368 = arith.addf %364, %367 : vector<1x50xf32>
    %369 = vector.extract_strided_slice %303 {offsets = [16, 0], sizes = [1, 20], strides = [1, 1]} : vector<25x20xf32> to vector<1x20xf32>
    %c320 = arith.constant 320 : index
    %c0_412 = arith.constant 0 : index
    %370 = vector.load %arg6[%c320, %c0_412] : memref<500x50xf32, #tpu.memory_space<vmem>>, vector<20x50xf32>
    %cst_413 = arith.constant dense<0.000000e+00> : vector<1x50xf32>
    %371 = tpu.matmul %369, %370, %cst_413 {dimension_numbers = #tpu.dot_dimension_numbers<[1], [0], [0], [1], [0, 0, 1, 1], [], []>} : vector<1x20xf32>, vector<20x50xf32>, vector<1x50xf32> -> vector<1x50xf32>
    %372 = arith.addf %368, %371 : vector<1x50xf32>
    %373 = vector.extract_strided_slice %303 {offsets = [17, 0], sizes = [1, 20], strides = [1, 1]} : vector<25x20xf32> to vector<1x20xf32>
    %c340 = arith.constant 340 : index
    %c0_414 = arith.constant 0 : index
    %374 = vector.load %arg6[%c340, %c0_414] : memref<500x50xf32, #tpu.memory_space<vmem>>, vector<20x50xf32>
    %cst_415 = arith.constant dense<0.000000e+00> : vector<1x50xf32>
    %375 = tpu.matmul %373, %374, %cst_415 {dimension_numbers = #tpu.dot_dimension_numbers<[1], [0], [0], [1], [0, 0, 1, 1], [], []>} : vector<1x20xf32>, vector<20x50xf32>, vector<1x50xf32> -> vector<1x50xf32>
    %376 = arith.addf %372, %375 : vector<1x50xf32>
    %377 = vector.extract_strided_slice %303 {offsets = [18, 0], sizes = [1, 20], strides = [1, 1]} : vector<25x20xf32> to vector<1x20xf32>
    %c360 = arith.constant 360 : index
    %c0_416 = arith.constant 0 : index
    %378 = vector.load %arg6[%c360, %c0_416] : memref<500x50xf32, #tpu.memory_space<vmem>>, vector<20x50xf32>
    %cst_417 = arith.constant dense<0.000000e+00> : vector<1x50xf32>
    %379 = tpu.matmul %377, %378, %cst_417 {dimension_numbers = #tpu.dot_dimension_numbers<[1], [0], [0], [1], [0, 0, 1, 1], [], []>} : vector<1x20xf32>, vector<20x50xf32>, vector<1x50xf32> -> vector<1x50xf32>
    %380 = arith.addf %376, %379 : vector<1x50xf32>
    %381 = vector.extract_strided_slice %303 {offsets = [19, 0], sizes = [1, 20], strides = [1, 1]} : vector<25x20xf32> to vector<1x20xf32>
    %c380 = arith.constant 380 : index
    %c0_418 = arith.constant 0 : index
    %382 = vector.load %arg6[%c380, %c0_418] : memref<500x50xf32, #tpu.memory_space<vmem>>, vector<20x50xf32>
    %cst_419 = arith.constant dense<0.000000e+00> : vector<1x50xf32>
    %383 = tpu.matmul %381, %382, %cst_419 {dimension_numbers = #tpu.dot_dimension_numbers<[1], [0], [0], [1], [0, 0, 1, 1], [], []>} : vector<1x20xf32>, vector<20x50xf32>, vector<1x50xf32> -> vector<1x50xf32>
    %384 = arith.addf %380, %383 : vector<1x50xf32>
    %385 = vector.extract_strided_slice %303 {offsets = [20, 0], sizes = [1, 20], strides = [1, 1]} : vector<25x20xf32> to vector<1x20xf32>
    %c400 = arith.constant 400 : index
    %c0_420 = arith.constant 0 : index
    %386 = vector.load %arg6[%c400, %c0_420] : memref<500x50xf32, #tpu.memory_space<vmem>>, vector<20x50xf32>
    %cst_421 = arith.constant dense<0.000000e+00> : vector<1x50xf32>
    %387 = tpu.matmul %385, %386, %cst_421 {dimension_numbers = #tpu.dot_dimension_numbers<[1], [0], [0], [1], [0, 0, 1, 1], [], []>} : vector<1x20xf32>, vector<20x50xf32>, vector<1x50xf32> -> vector<1x50xf32>
    %388 = arith.addf %384, %387 : vector<1x50xf32>
    %389 = vector.extract_strided_slice %303 {offsets = [21, 0], sizes = [1, 20], strides = [1, 1]} : vector<25x20xf32> to vector<1x20xf32>
    %c420 = arith.constant 420 : index
    %c0_422 = arith.constant 0 : index
    %390 = vector.load %arg6[%c420, %c0_422] : memref<500x50xf32, #tpu.memory_space<vmem>>, vector<20x50xf32>
    %cst_423 = arith.constant dense<0.000000e+00> : vector<1x50xf32>
    %391 = tpu.matmul %389, %390, %cst_423 {dimension_numbers = #tpu.dot_dimension_numbers<[1], [0], [0], [1], [0, 0, 1, 1], [], []>} : vector<1x20xf32>, vector<20x50xf32>, vector<1x50xf32> -> vector<1x50xf32>
    %392 = arith.addf %388, %391 : vector<1x50xf32>
    %393 = vector.extract_strided_slice %303 {offsets = [22, 0], sizes = [1, 20], strides = [1, 1]} : vector<25x20xf32> to vector<1x20xf32>
    %c440 = arith.constant 440 : index
    %c0_424 = arith.constant 0 : index
    %394 = vector.load %arg6[%c440, %c0_424] : memref<500x50xf32, #tpu.memory_space<vmem>>, vector<20x50xf32>
    %cst_425 = arith.constant dense<0.000000e+00> : vector<1x50xf32>
    %395 = tpu.matmul %393, %394, %cst_425 {dimension_numbers = #tpu.dot_dimension_numbers<[1], [0], [0], [1], [0, 0, 1, 1], [], []>} : vector<1x20xf32>, vector<20x50xf32>, vector<1x50xf32> -> vector<1x50xf32>
    %396 = arith.addf %392, %395 : vector<1x50xf32>
    %397 = vector.extract_strided_slice %303 {offsets = [23, 0], sizes = [1, 20], strides = [1, 1]} : vector<25x20xf32> to vector<1x20xf32>
    %c460 = arith.constant 460 : index
    %c0_426 = arith.constant 0 : index
    %398 = vector.load %arg6[%c460, %c0_426] : memref<500x50xf32, #tpu.memory_space<vmem>>, vector<20x50xf32>
    %cst_427 = arith.constant dense<0.000000e+00> : vector<1x50xf32>
    %399 = tpu.matmul %397, %398, %cst_427 {dimension_numbers = #tpu.dot_dimension_numbers<[1], [0], [0], [1], [0, 0, 1, 1], [], []>} : vector<1x20xf32>, vector<20x50xf32>, vector<1x50xf32> -> vector<1x50xf32>
    %400 = arith.addf %396, %399 : vector<1x50xf32>
    %401 = vector.extract_strided_slice %303 {offsets = [24, 0], sizes = [1, 20], strides = [1, 1]} : vector<25x20xf32> to vector<1x20xf32>
    %c480 = arith.constant 480 : index
    %c0_428 = arith.constant 0 : index
    %402 = vector.load %arg6[%c480, %c0_428] : memref<500x50xf32, #tpu.memory_space<vmem>>, vector<20x50xf32>
    %cst_429 = arith.constant dense<0.000000e+00> : vector<1x50xf32>
    %403 = tpu.matmul %401, %402, %cst_429 {dimension_numbers = #tpu.dot_dimension_numbers<[1], [0], [0], [1], [0, 0, 1, 1], [], []>} : vector<1x20xf32>, vector<20x50xf32>, vector<1x50xf32> -> vector<1x50xf32>
    %404 = arith.addf %400, %403 : vector<1x50xf32>
    %cst_430 = arith.constant 0.000000e+00 : f32
    %405 = vector.broadcast %cst_430 : f32 to vector<1x50xf32>
    %406 = arith.maximumf %404, %405 : vector<1x50xf32>
    %c0_431 = arith.constant 0 : index
    %c0_432 = arith.constant 0 : index
    %407 = vector.load %arg8[%c0_431, %c0_432] : memref<50x10xf32, #tpu.memory_space<vmem>>, vector<50x10xf32>
    %cst_433 = arith.constant dense<0.000000e+00> : vector<1x10xf32>
    %408 = tpu.matmul %406, %407, %cst_433 {dimension_numbers = #tpu.dot_dimension_numbers<[1], [0], [0], [1], [0, 0, 1, 1], [], []>} : vector<1x50xf32>, vector<50x10xf32>, vector<1x10xf32> -> vector<1x10xf32>
    %c0_434 = arith.constant 0 : index
    %c0_435 = arith.constant 0 : index
    %409 = vector.load %arg9[%c0_434, %c0_435] : memref<1x10xf32, #tpu.memory_space<vmem>>, vector<1x10xf32>
    %410 = arith.addf %408, %409 : vector<1x10xf32>
    %cst_436 = arith.constant dense<0xFF800000> : vector<1xf32>
    %411 = vector.multi_reduction <maximumf>, %410, %cst_436 [1] : vector<1x10xf32> to vector<1xf32>
    %412 = vector.shape_cast %411 : vector<1xf32> to vector<1x1xf32>
    %413 = vector.broadcast %412 : vector<1x1xf32> to vector<1x10xf32>
    %414 = arith.subf %410, %413 : vector<1x10xf32>
    %415 = math.exp %414 : vector<1x10xf32>
    %cst_437 = arith.constant dense<0.000000e+00> : vector<1xf32>
    %416 = vector.multi_reduction <add>, %415, %cst_437 [1] : vector<1x10xf32> to vector<1xf32>
    %417 = vector.shape_cast %416 : vector<1xf32> to vector<1x1xf32>
    %418 = math.log %417 : vector<1x1xf32>
    %419 = vector.broadcast %412 : vector<1x1xf32> to vector<1x10xf32>
    %420 = arith.subf %410, %419 : vector<1x10xf32>
    %421 = vector.broadcast %418 : vector<1x1xf32> to vector<1x10xf32>
    %422 = arith.subf %420, %421 : vector<1x10xf32>
    %c0_438 = arith.constant 0 : index
    %c0_439 = arith.constant 0 : index
    %c0_440 = arith.constant 0 : index
    %423 = vector.load %arg10[%c0_438, %c0_439, %c0_440] : memref<1x1x10xf32, #tpu.memory_space<vmem>>, vector<1x1x10xf32>
    %424 = vector.shape_cast %423 : vector<1x1x10xf32> to vector<1x10xf32>
    %425 = vector.shape_cast %422 : vector<1x10xf32> to vector<1x1x10xf32>
    tpu.vector_store %arg10[%c0_438, %c0_439, %c0_440], %425 {strides = array<i32>} : memref<1x1x10xf32, #tpu.memory_space<vmem>>, vector<1x1x10xf32>,
    return
  }
  func.func @transform_0(%arg0: i32) -> (i32, i32, i32) {
    %c0_i32 = arith.constant 0 : i32
    %c0_i32_0 = arith.constant 0 : i32
    %c0_i32_1 = arith.constant 0 : i32
    return %arg0, %c0_i32, %c0_i32_0 : i32, i32, i32
  }
  func.func @transform_1(%arg0: i32) -> (i32, i32) {
    %c0_i32 = arith.constant 0 : i32
    %c0_i32_0 = arith.constant 0 : i32
    %c0_i32_1 = arith.constant 0 : i32
    return %c0_i32, %c0_i32_0 : i32, i32
  }
  func.func @transform_2(%arg0: i32) -> (i32, i32) {
    %c0_i32 = arith.constant 0 : i32
    %c0_i32_0 = arith.constant 0 : i32
    %c0_i32_1 = arith.constant 0 : i32
    return %c0_i32, %c0_i32_0 : i32, i32
  }
  func.func @transform_3(%arg0: i32) -> (i32, i32, i32) {
    %c0_i32 = arith.constant 0 : i32
    %c0_i32_0 = arith.constant 0 : i32
    %c0_i32_1 = arith.constant 0 : i32
    %c0_i32_2 = arith.constant 0 : i32
    return %c0_i32, %c0_i32_0, %c0_i32_1 : i32, i32, i32
  }
  func.func @transform_4(%arg0: i32) -> (i32, i32) {
    %c0_i32 = arith.constant 0 : i32
    %c0_i32_0 = arith.constant 0 : i32
    %c0_i32_1 = arith.constant 0 : i32
    return %c0_i32, %c0_i32_0 : i32, i32
  }
  func.func @transform_5(%arg0: i32) -> (i32, i32) {
    %c0_i32 = arith.constant 0 : i32
    %c0_i32_0 = arith.constant 0 : i32
    %c0_i32_1 = arith.constant 0 : i32
    return %c0_i32, %c0_i32_0 : i32, i32
  }
  func.func @transform_6(%arg0: i32) -> (i32, i32) {
    %c0_i32 = arith.constant 0 : i32
    %c0_i32_0 = arith.constant 0 : i32
    %c0_i32_1 = arith.constant 0 : i32
    return %c0_i32, %c0_i32_0 : i32, i32
  }
  func.func @transform_7(%arg0: i32) -> (i32, i32) {
    %c0_i32 = arith.constant 0 : i32
    %c0_i32_0 = arith.constant 0 : i32
    %c0_i32_1 = arith.constant 0 : i32
    return %c0_i32, %c0_i32_0 : i32, i32
  }
  func.func @transform_8(%arg0: i32) -> (i32, i32) {
    %c0_i32 = arith.constant 0 : i32
    %c0_i32_0 = arith.constant 0 : i32
    %c0_i32_1 = arith.constant 0 : i32
    return %c0_i32, %c0_i32_0 : i32, i32
  }
  func.func @transform_9(%arg0: i32) -> (i32, i32, i32) {
    %c0_i32 = arith.constant 0 : i32
    %c0_i32_0 = arith.constant 0 : i32
    %c0_i32_1 = arith.constant 0 : i32
    return %arg0, %c0_i32, %c0_i32_0 : i32, i32, i32
  }
}

</mosaic_0001>

<bundles_post_ra>
// kernel: net_forward.1
= control target key start
LH: loop header
LB: loop body
LE: loop exit
PB: predicated region body
PF: predicated region fallthrough
CT: control target
= control target key end

     0   :  { %14 = vsyncpa [#allocation4], 0  ;;  %s6286_s0 = inlined_call_operand.vmem [shape: f32[2,676,9], index: 0, kind: input, shape index: {}]   ;;  %s6287_s1 = inlined_call_operand.vmem [shape: f32[9,10], index: 1, kind: input, shape index: {}]   ;;  %s6288_s2 = inlined_call_operand.vmem [shape: f32[1,10], index: 2, kind: input, shape index: {}]   ;;  %s6289_s3 = inlined_call_operand.vmem [shape: f32[9,10,20], index: 3, kind: input, shape index: {}]   ;;  %s6290_s4 = inlined_call_operand.vmem [shape: f32[1,20], index: 4, kind: input, shape index: {}]   ;;  %s6291_s5 = inlined_call_operand.vmem [shape: f32[500,50], index: 5, kind: input, shape index: {}]   ;;  %s6292_s6 = inlined_call_operand.vmem [shape: f32[1,50], index: 6, kind: input, shape index: {}]   ;;  %s6293_s7 = inlined_call_operand.vmem [shape: f32[50,10], index: 7, kind: input, shape index: {}]   ;;  %s6294_s8 = inlined_call_operand.vmem [shape: f32[1,10], index: 8, kind: input, shape index: {}]   ;;  %s6295_s9 = inlined_call_operand.hbm [shape: f32[2,1,10], index: 9, kind: output, shape index: {}]  }
   0x1   :  { %16 = vsyncpa [#allocation4 + $0x1], 0  ;;  %s4257_s30 = smov 0   ;;  %s4259_s10 = smov 0  }
   0x2   :  { %s4261_s11 = smov 0   ;;  %s4263_s12 = smov 0  }
   0x3 LB: > { %s4278_s13 = sadd.s32 4294967295, %s4205_s12   ;;  %s3798_s14 = sadd.s32 4294967294, %s4205_s12   ;;  %s4205_s12 = sphi %s4263_s12, %s6459_s12   ;;  %s4201_s11 = sphi %s4261_s11, %s6458_s11   ;;  %s4197_s10 = sphi %s4259_s10, %s6457_s10   ;;  %s4193_s30 = sphi %s4257_s30, %s6456_s30  }
   0x4   : > { %s4282_s15 = sadd.s32 1, %s4205_s12   ;;  %s223_s16 = sadd.s32 1, %s4201_s11 }
   0x5   : > { %s220_s17 = ssub.s32 %s4205_s12, %s4282_s15  ;;  %p233_p0 = scmp.ne.s32.totalorder %s4201_s11, %s4197_s10 }
   0x6   : > { %p221_p1 = scmp.eq.s32.totalorder %s220_s17, 0  ;;  %p234_p2 = scmp.eq.s32.totalorder %s4278_s13, 1 }
   0x7   : > { %p239_p3 = scmp.ne.s32.totalorder %s4197_s10, %s4193_s30  ;;  %p240_p4 = scmp.eq.s32.totalorder %s3798_s14, 1 }
   0x8   : > { %s4293_s18 = scalar_select %p221_p1, %s4201_s11, %s223_s16  }
   0x9   : > { %p4295_p5 = por %p234_p2, %p233_p0  ;;  %p4299_p6 = por %p240_p4, %p239_p3 }
   0xa   : > { %p3801_p7 = scmp.ge.s32.totalorder %s4205_s12, 1  ;;  %p290_p8 = scmp.lt.s32.totalorder %s4205_s12, 3 }
   0xc   : > { %p291_p9 = pnand %p3801_p7, %p290_p8 }
   0xe   : > { %294 = sbr.rel (%p291_p9) target bundleno = 1297 (0x511), region = 56 }
  0x13   : > { %v416_v0 = vld [vmem:[%s6287_s1 + $0x8] sm:$0x1]  ;;  %vm488_vm0 = vcmask 1040384   ;;  %v415_v1 = vld [vmem:[%s6287_s1] sm:$0xff]  ;;  %p325_p10 = scmp.lt.s32.totalorder %s4278_s13, 1  ;;  %vm421_vm1 = vcmask 72704   ;;  %s3739_s27 = scalar_lea.hbm %s6295_s9, %s4278_s13 }
  0x14   : > { %4091 = vmatpush.msk.msra.mxu1 %vm488_vm0, %v416_v0  ;;  %4092 = vmatpush.msk.msra.mxu3 %vm488_vm0, %v416_v0  ;;  %vm854_vm2 = vcmask 1045504   ;;  %vm618_vm3 = vcmask 1046528   ;;  %vm1090_vm4 = vcmask 1044480   ;;  %vm1392_vm5 = vcmask 1041408   ;;  %s3743_s16 = sshll.u32 %s3739_s27, 4  ;;  %s4163_s24 = scalar_lea.hbm %s6295_s9, 2  ;;  %s3744_s16 = int_to_ptr.hbm [resolvable:$true] %s3743_s16 }
  0x15   : > { %s326_s25 = scalar_select %p325_p10, %s4278_s13, 1  ;;  %3849 = vmatpush.msk.msra.mxu2 %vm488_vm0, %v416_v0  ;;  %3803 = vmatpush.msk.msra.mxu0 %vm488_vm0, %v416_v0  ;;  %vm1305_vm6 = vcmask 80896   ;;  %vm1395_vm7 = vcmask 1043456   ;;  %vm1399_vm8 = vcmask 1042432   ;;  %vm1327_vm9 = vcmask 73728  }
  0x16   : > { %4093 = vmatpush.msra.mxu1 %v415_v1  ;;  %4094 = vmatpush.msra.mxu3 %v415_v1  ;;  %vm2934_vm10 = vcmask 162816   ;;  %vm3690_vm11 = vcmask 408576   ;;  %s4157_s21 = sshra.s32 %s3744_s16, 4  ;;  %s4158_s21 = int_to_ptr.hbm [resolvable:$true] %s4157_s21 }
  0x17   : > { %s4095_s26 = smul.u32 680, %s326_s25  ;;  %957 = vmatpush.msra.mxu2 %v415_v1  ;;  %507 = vmatpush.msra.mxu0 %v415_v1  ;;  %s4159_s22 = scalar_lea.hbm %s4158_s21, 1 }
  0x18   : > { %3872 = vmatpush.msk.msrb.mxu3 %vm488_vm0, %v416_v0  ;;  %3826 = vmatpush.msk.msrb.mxu1 %vm488_vm0, %v416_v0  ;;  %p4160_p11 = scmp.ne.s32.totalorder %s4158_s21, %s4159_s22  ;;  %p4164_p0 = scmp.lt.s32.totalorder %s4158_s21, %s6295_s9 }
  0x19   : > { %s4322_s29 = scalar_lea.vmem %s6286_s0, %s4095_s26  ;;  %p4165_p1 = scmp.lt.s32.totalorder %s4163_s24, %s4159_s22 }
  0x1a   : > { %1193 = vmatpush.msrb.mxu3 %v415_v1  ;;  %v349_v2 = vld [vmem:[%s4322_s29 + $0x98] sm:$0xff]  ;;  %v350_v3 = vld [vmem:[%s4322_s29 + $0xa0] sm:$0xff]  ;;  %v4327_v4 = vld [vmem:[%s4322_s29 + $0x150] sm:$0xff]  ;;  %721 = vmatpush.msrb.mxu1 %v415_v1  ;;  %p4161_p12 = pnand %p4160_p11, %p4295_p5 }
  0x1b   : > { %3823 = vmatmul.msk.f32.vlgmr.msra.gmra.mxu1 %vm421_vm1, %v349_v2  ;;  %3824 = vmatmul.msk.f32.vlgmr.msra.gmra.mxu3 %vm421_vm1, %v350_v3  ;;  %v373_v5 = vld [vmem:[%s4322_s29 + $0x158] sm:$0xff]  ;;  %v855_v6 = vrot.slane %v4327_v4, 2  ;;  %v351_v7 = vld [vmem:[%s4322_s29 + $0xa8] sm:$0xff]  ;;  %v352_v8 = vld [vmem:[%s4322_s29 + $0xb0] sm:$0xff]  ;;  %p4166_p2 = por %p4165_p1, %p4164_p0 }
  0x1c   : > { %v856_v9 = vrot.slane %v373_v5, 2  ;;  %v619_v10 = vrot.slane %v351_v7, 1  ;;  %v620_v11 = vrot.slane %v352_v8, 1  ;;  %v374_v12 = vld [vmem:[%s4322_s29 + $0x160] sm:$0xff]  ;;  %v353_v17 = vld [vmem:[%s4322_s29 + $0xb8] sm:$0xff]  ;;  %v331_v20 = vld [vmem:[%s4322_s29 + $0x8] sm:$0xff]  ;;  %p4162_p13 = pneg %p4161_p12 }
  0x1d   : > { %v330_v13 = vld [vmem:[%s4322_s29] sm:$0xff]  ;;  %v858_v16 = vrot.slane %v374_v12, 2  ;;  %v4343_v18 = vld [vmem:[%s4322_s29 + $0x1f8] sm:$0xff]  ;;  %v622_v22 = vrot.slane %v353_v17, 1  ;;  %v375_v25 = vld [vmem:[%s4322_s29 + $0x168] sm:$0xff] }
  0x1e   : > { %v857_v14 = vsel %vm854_vm2, %v855_v6, %v856_v9  ;;  %3804 = vmatmul.msk.f32.vlgmr.msra.gmra.mxu0 %vm421_vm1, %v330_v13  ;;  %v621_v15 = vsel %vm618_vm3, %v619_v10, %v620_v11  ;;  %v394_v19 = vld [vmem:[%s4322_s29 + $0x200] sm:$0xff]  ;;  %v1091_v23 = vrot.slane %v4343_v18, 3  ;;  %v860_v28 = vrot.slane %v375_v25, 2  ;;  %v395_v30 = vld [vmem:[%s4322_s29 + $0x208] sm:$0xff]  ;;  %v332_v31 = vld [vmem:[%s4322_s29 + $0x10] sm:$0xff]  ;;  %p4167_p3 = pnand %p4166_p2, %p4162_p13 }
  0x1f   : > { %3850 = vmatmul.msk.f32.vlgmr.msra.gmra.mxu2 %vm421_vm1, %v857_v14  ;;  %v859_v21 = vsel %vm854_vm2, %v856_v9, %v858_v16  ;;  %v1092_v24 = vrot.slane %v394_v19, 3  ;;  %v623_v26 = vsel %vm618_vm3, %v620_v11, %v622_v22  ;;  %v354_v29 = vld [vmem:[%s4322_s29 + $0xc0] sm:$0xff]  ;;  %v1094_v34 = vrot.slane %v395_v30, 3  ;;  %v376_v35 = vld [vmem:[%s4322_s29 + $0x170] sm:$0xff]  ;;  %v355_v39 = vld [vmem:[%s4322_s29 + $0xc8] sm:$0xff] }
  0x20   : > { %v861_v32 = vsel %vm854_vm2, %v858_v16, %v860_v28  ;;  %v624_v33 = vrot.slane %v354_v29, 1  ;;  %v862_v38 = vrot.slane %v376_v35, 2  ;;  %v396_v40 = vld [vmem:[%s4322_s29 + $0x210] sm:$0xff]  ;;  %v333_v41 = vld [vmem:[%s4322_s29 + $0x18] sm:$0xff]  ;;  %v626_v43 = vrot.slane %v355_v39, 1  ;;  %v334_v51 = vld [vmem:[%s4322_s29 + $0x20] sm:$0xff] }
  0x21   : > { %v1093_v27 = vsel %vm1090_vm4, %v1091_v23, %v1092_v24  ;;  %v1095_v37 = vsel %vm1090_vm4, %v1092_v24, %v1094_v34  ;;  %v1096_v44 = vrot.slane %v396_v40, 3  ;;  %v377_v45 = vld [vmem:[%s4322_s29 + $0x178] sm:$0xff]  ;;  %v356_v49 = vld [vmem:[%s4322_s29 + $0xd0] sm:$0xff]  ;;  %v378_v55 = vld [vmem:[%s4322_s29 + $0x180] sm:$0xff] }
  0x22   : > { %v625_v36 = vsel %vm618_vm3, %v622_v22, %v624_v33  ;;  %v863_v42 = vsel %vm854_vm2, %v860_v28, %v862_v38  ;;  %v627_v46 = vsel %vm618_vm3, %v624_v33, %v626_v43  ;;  %v864_v48 = vrot.slane %v377_v45, 2  ;;  %v397_v50 = vld [vmem:[%s4322_s29 + $0x218] sm:$0xff]  ;;  %v398_v60 = vld [vmem:[%s4322_s29 + $0x220] sm:$0xff]  ;;  %v335_v61 = vld [vmem:[%s4322_s29 + $0x28] sm:$0xff] }
  0x23   : > { %3825 = vmatmul.msk.f32.gmra.mxu3 %vm421_vm1, %v351_v7  ;;  %3827 = vmatmul.msk.f32.vlgmr.msrb.gmra.mxu1 %vm421_vm1, %v621_v15  ;;  %v1097_v47 = vsel %vm1090_vm4, %v1094_v34, %v1096_v44  ;;  %v628_v53 = vrot.slane %v356_v49, 1  ;;  %v1098_v54 = vrot.slane %v397_v50, 3  ;;  %v866_v58 = vrot.slane %v378_v55, 2  ;;  %v357_v59 = vld [vmem:[%s4322_s29 + $0xd8] sm:$0xff]  ;;  %v379_v1 = vld [vmem:[%s4322_s29 + $0x188] sm:$0xff]  ;;  %v358_v6 = vld [vmem:[%s4322_s29 + $0xe0] sm:$0xff] }
  0x24   : > { %v865_v52 = vsel %vm854_vm2, %v862_v38, %v864_v48  ;;  %v630_v63 = vrot.slane %v357_v59, 1  ;;  %v1100_v0 = vrot.slane %v398_v60, 3  ;;  %v868_v5 = vrot.slane %v379_v1, 2  ;;  %v399_v7 = vld [vmem:[%s4322_s29 + $0x228] sm:$0xff]  ;;  %v336_v8 = vld [vmem:[%s4322_s29 + $0x30] sm:$0xff]  ;;  %v337_v19 = vld [vmem:[%s4322_s29 + $0x38] sm:$0xff] }
  0x25   : > { %v629_v56 = vsel %vm618_vm3, %v626_v43, %v628_v53  ;;  %v1099_v57 = vsel %vm1090_vm4, %v1096_v44, %v1098_v54  ;;  %v867_v62 = vsel %vm854_vm2, %v864_v48, %v866_v58  ;;  %v632_v10 = vrot.slane %v358_v6, 1  ;;  %v380_v12 = vld [vmem:[%s4322_s29 + $0x190] sm:$0xff]  ;;  %v359_v16 = vld [vmem:[%s4322_s29 + $0xe8] sm:$0xff]  ;;  %v381_v23 = vld [vmem:[%s4322_s29 + $0x198] sm:$0xff] }
  0x26   : > { %3805 = vmatmul.msk.f32.gmra.mxu0 %vm421_vm1, %v331_v20  ;;  %v631_v2 = vsel %vm618_vm3, %v628_v53, %v630_v63  ;;  %v1101_v3 = vsel %vm1090_vm4, %v1098_v54, %v1100_v0  ;;  %v869_v9 = vsel %vm854_vm2, %v866_v58, %v868_v5  ;;  %v1102_v11 = vrot.slane %v399_v7, 3  ;;  %v400_v17 = vld [vmem:[%s4322_s29 + $0x230] sm:$0xff]  ;;  %v401_v28 = vld [vmem:[%s4322_s29 + $0x238] sm:$0xff]  ;;  %v338_v29 = vld [vmem:[%s4322_s29 + $0x40] sm:$0xff] }
  0x27   : > { %3851 = vmatmul.msk.f32.gmra.mxu2 %vm421_vm1, %v859_v21  ;;  %v633_v13 = vsel %vm618_vm3, %v630_v63, %v632_v10  ;;  %v870_v15 = vrot.slane %v380_v12, 2  ;;  %v634_v21 = vrot.slane %v359_v16, 1  ;;  %v1104_v22 = vrot.slane %v400_v17, 3  ;;  %v382_v33 = vld [vmem:[%s4322_s29 + $0x1a0] sm:$0xff]  ;;  %v3896_v34 = vld [vmem:[%s6289_s3 + $0x18] sm:$0x3] }
  0x28   : > { %v1103_v14 = vsel %vm1090_vm4, %v1100_v0, %v1102_v11  ;;  %3897 = vmatpush.msk.msrb.mxu0 %vm1392_vm5, %v3896_v34  ;;  %v361_v38 = vld [vmem:[%s4322_s29 + $0xf8] sm:$0xff]  ;;  %v402_v39 = vld [vmem:[%s4322_s29 + $0x240] sm:$0xff]  ;;  %v339_v40 = vld [vmem:[%s4322_s29 + $0x48] sm:$0xff] }
  0x29   : > { %v871_v20 = vsel %vm854_vm2, %v868_v5, %v870_v15  ;;  %v635_v24 = vsel %vm618_vm3, %v632_v10, %v634_v21  ;;  %v1105_v25 = vsel %vm1090_vm4, %v1102_v11, %v1104_v22  ;;  %v1108_v43 = vrot.slane %v402_v39, 3  ;;  %v383_v44 = vld [vmem:[%s4322_s29 + $0x1a8] sm:$0xff]  ;;  %v362_v48 = vld [vmem:[%s4322_s29 + $0x100] sm:$0xff]  ;;  %v340_v50 = vld [vmem:[%s4322_s29 + $0x50] sm:$0xff] }
  0x2a   : > { %v403_v49 = vld [vmem:[%s4322_s29 + $0x248] sm:$0xff]  ;;  %v384_v54 = vld [vmem:[%s4322_s29 + $0x1b0] sm:$0xff]  ;;  %v341_v60 = vld [vmem:[%s4322_s29 + $0x58] sm:$0xff] }
  0x2b   : > { %3828 = vmatmul.msk.f32.gmra.mxu1 %vm421_vm1, %v623_v26  ;;  %3873 = vmatmul.msk.f32.vlgmr.msrb.gmra.mxu3 %vm421_vm1, %v1093_v27  ;;  %v872_v26 = vrot.slane %v381_v23, 2  ;;  %v360_v27 = vld [vmem:[%s4322_s29 + $0xf0] sm:$0xff]  ;;  %v1110_v53 = vrot.slane %v403_v49, 3  ;;  %v363_v58 = vld [vmem:[%s4322_s29 + $0x108] sm:$0xff]  ;;  %v385_v0 = vld [vmem:[%s4322_s29 + $0x1b8] sm:$0xff] }
  0x2c   : > { %v404_v59 = vld [vmem:[%s4322_s29 + $0x250] sm:$0xff]  ;;  %v405_v6 = vld [vmem:[%s4322_s29 + $0x258] sm:$0xff]  ;;  %v342_v7 = vld [vmem:[%s4322_s29 + $0x60] sm:$0xff] }
  0x2d   : > { %v873_v30 = vsel %vm854_vm2, %v870_v15, %v872_v26  ;;  %v1112_v63 = vrot.slane %v404_v59, 3  ;;  %v364_v5 = vld [vmem:[%s4322_s29 + $0x110] sm:$0xff]  ;;  %v1114_v10 = vrot.slane %v405_v6, 3  ;;  %v386_v11 = vld [vmem:[%s4322_s29 + $0x1c0] sm:$0xff]  ;;  %v365_v15 = vld [vmem:[%s4322_s29 + $0x118] sm:$0xff] }
  0x2e   : > { %3806 = vmatmul.msk.f32.gmra.mxu0 %vm421_vm1, %v332_v31  ;;  %v636_v31 = vrot.slane %v360_v27, 1  ;;  %v406_v16 = vld [vmem:[%s4322_s29 + $0x260] sm:$0xff]  ;;  %v343_v17 = vld [vmem:[%s4322_s29 + $0x68] sm:$0xff] }
  0x2f   : > { %3852 = vmatmul.msk.f32.gmra.mxu2 %vm421_vm1, %v861_v32  ;;  %v1106_v32 = vrot.slane %v401_v28, 3  ;;  %v407_v27 = vld [vmem:[%s4322_s29 + $0x268] sm:$0xff]  ;;  %v344_v28 = vld [vmem:[%s4322_s29 + $0x70] sm:$0xff] }
  0x30   : > { %v637_v35 = vsel %vm618_vm3, %v634_v21, %v636_v31  ;;  %v1116_v21 = vrot.slane %v406_v16, 3 }
  0x33   : > { %3829 = vmatmul.msk.f32.gmra.mxu1 %vm421_vm1, %v625_v36  ;;  %3874 = vmatmul.msk.f32.gmra.mxu3 %vm421_vm1, %v1095_v37  ;;  %v1107_v36 = vsel %vm1090_vm4, %v1104_v22, %v1106_v32  ;;  %v874_v37 = vrot.slane %v382_v33, 2  ;;  %v387_v22 = vld [vmem:[%s4322_s29 + $0x1c8] sm:$0xff] }
  0x36   : > { %3807 = vmatmul.msk.f32.gmra.mxu0 %vm421_vm1, %v333_v41  ;;  %v875_v41 = vsel %vm854_vm2, %v872_v26, %v874_v37  ;;  %v366_v26 = vld [vmem:[%s4322_s29 + $0x120] sm:$0xff] }
  0x37   : > { %3853 = vmatmul.msk.f32.gmra.mxu2 %vm421_vm1, %v863_v42  ;;  %v638_v42 = vrot.slane %v361_v38, 1  ;;  %v345_v38 = vld [vmem:[%s4322_s29 + $0x78] sm:$0xff] }
  0x39   : > { %v639_v45 = vsel %vm618_vm3, %v636_v31, %v638_v42  ;;  %v1118_v31 = vrot.slane %v407_v27, 3 }
  0x3b   : > { %3830 = vmatmul.msk.f32.gmra.mxu1 %vm421_vm1, %v627_v46  ;;  %3875 = vmatmul.msk.f32.gmra.mxu3 %vm421_vm1, %v1097_v47  ;;  %v1109_v46 = vsel %vm1090_vm4, %v1106_v32, %v1108_v43  ;;  %v876_v47 = vrot.slane %v383_v44, 2  ;;  %v388_v32 = vld [vmem:[%s4322_s29 + $0x1d0] sm:$0xff]  ;;  %v1119_v34 = vsel %vm1090_vm4, %v1116_v21, %v1118_v31 }
  0x3e   : > { %3808 = vmatmul.msk.f32.gmra.mxu0 %vm421_vm1, %v334_v51  ;;  %v877_v51 = vsel %vm854_vm2, %v874_v37, %v876_v47  ;;  %v408_v37 = vld [vmem:[%s4322_s29 + $0x270] sm:$0xff] }
  0x3f   : > { %3854 = vmatmul.msk.f32.gmra.mxu2 %vm421_vm1, %v865_v52  ;;  %v640_v52 = vrot.slane %v362_v48, 1  ;;  %v409_v48 = vld [vmem:[%s4322_s29 + $0x278] sm:$0xff] }
  0x41   : > { %v641_v55 = vsel %vm618_vm3, %v638_v42, %v640_v52  ;;  %v389_v42 = vld [vmem:[%s4322_s29 + $0x1d8] sm:$0xff] }
  0x43   : > { %3831 = vmatmul.msk.f32.gmra.mxu1 %vm421_vm1, %v629_v56  ;;  %3876 = vmatmul.msk.f32.gmra.mxu3 %vm421_vm1, %v1099_v57  ;;  %v1111_v56 = vsel %vm1090_vm4, %v1108_v43, %v1110_v53  ;;  %v878_v57 = vrot.slane %v384_v54, 2  ;;  %v390_v54 = vld [vmem:[%s4322_s29 + $0x1e0] sm:$0xff] }
  0x44   : > { %v890_v59 = vrot.slane %v390_v54, 2 }
  0x46   : > { %3809 = vmatmul.msk.f32.gmra.mxu0 %vm421_vm1, %v335_v61  ;;  %v879_v61 = vsel %vm854_vm2, %v876_v47, %v878_v57  ;;  %v368_v47 = vld [vmem:[%s4322_s29 + $0x130] sm:$0xff] }
  0x47   : > { %3855 = vmatmul.msk.f32.gmra.mxu2 %vm421_vm1, %v867_v62  ;;  %v642_v62 = vrot.slane %v363_v58, 1 }
  0x49   : > { %v643_v1 = vsel %vm618_vm3, %v640_v52, %v642_v62  ;;  %v652_v52 = vrot.slane %v368_v47, 1 }
  0x4b   : > { %3832 = vmatmul.msk.f32.gmra.mxu1 %vm421_vm1, %v631_v2  ;;  %3877 = vmatmul.msk.f32.gmra.mxu3 %vm421_vm1, %v1101_v3  ;;  %v1113_v2 = vsel %vm1090_vm4, %v1110_v53, %v1112_v63  ;;  %v880_v3 = vrot.slane %v385_v0, 2  ;;  %v1122_v53 = vrot.slane %v409_v48, 3  ;;  %v371_v48 = vld [vmem:[%s4322_s29 + $0x148] sm:$0xff] }
  0x4e   : > { %3810 = vmatmul.msk.f32.gmra.mxu0 %vm421_vm1, %v336_v8  ;;  %v881_v8 = vsel %vm854_vm2, %v878_v57, %v880_v3 }
  0x4f   : > { %3856 = vmatmul.msk.f32.gmra.mxu2 %vm421_vm1, %v869_v9  ;;  %v644_v9 = vrot.slane %v364_v5, 1 }
  0x51   : > { %v645_v12 = vsel %vm618_vm3, %v642_v62, %v644_v9  ;;  %v410_v62 = vld [vmem:[%s4322_s29 + $0x280] sm:$0xff] }
  0x53   : > { %3833 = vmatmul.msk.f32.gmra.mxu1 %vm421_vm1, %v633_v13  ;;  %3878 = vmatmul.msk.f32.gmra.mxu3 %vm421_vm1, %v1103_v14  ;;  %v1115_v13 = vsel %vm1090_vm4, %v1112_v63, %v1114_v10  ;;  %v882_v14 = vrot.slane %v386_v11, 2 }
  0x56   : > { %3811 = vmatmul.msk.f32.gmra.mxu0 %vm421_vm1, %v337_v19  ;;  %v883_v19 = vsel %vm854_vm2, %v880_v3, %v882_v14  ;;  %v347_v3 = vld [vmem:[%s4322_s29 + $0x88] sm:$0xff] }
  0x57   : > { %3857 = vmatmul.msk.f32.gmra.mxu2 %vm421_vm1, %v871_v20  ;;  %v646_v20 = vrot.slane %v365_v15, 1 }
  0x59   : > { %v647_v23 = vsel %vm618_vm3, %v644_v9, %v646_v20 }
  0x5b   : > { %3834 = vmatmul.msk.f32.gmra.mxu1 %vm421_vm1, %v635_v24  ;;  %3879 = vmatmul.msk.f32.gmra.mxu3 %vm421_vm1, %v1105_v25  ;;  %v1117_v24 = vsel %vm1090_vm4, %v1114_v10, %v1116_v21  ;;  %v884_v25 = vrot.slane %v387_v22, 2 }
  0x5e   : > { %3812 = vmatmul.msk.f32.gmra.mxu0 %vm421_vm1, %v338_v29  ;;  %v885_v29 = vsel %vm854_vm2, %v882_v14, %v884_v25 }
  0x5f   : > { %3858 = vmatmul.msk.f32.gmra.mxu2 %vm421_vm1, %v873_v30  ;;  %v648_v30 = vrot.slane %v366_v26, 1  ;;  %v348_v26 = vld [vmem:[%s4322_s29 + $0x90] sm:$0xff] }
  0x61   : > { %v649_v33 = vsel %vm618_vm3, %v646_v20, %v648_v30 }
  0x63   : > { %3835 = vmatmul.msk.f32.gmra.mxu1 %vm421_vm1, %v637_v35  ;;  %3880 = vmatmul.msk.f32.gmra.mxu3 %vm421_vm1, %v1107_v36  ;;  %v886_v35 = vrot.slane %v388_v32, 2  ;;  %v367_v36 = vld [vmem:[%s4322_s29 + $0x128] sm:$0xff]  ;;  %v3942_v32 = vld [vmem:[%s6289_s3 + $0x38] sm:$0x3] }
  0x64   : > { %3943 = vmatpush.msk.msra.mxu3 %vm1392_vm5, %v3942_v32 }
  0x65   : > { %v887_v39 = vsel %vm854_vm2, %v884_v25, %v886_v35 }
  0x66   : > { %3813 = vmatmul.msk.f32.gmra.mxu0 %vm421_vm1, %v339_v40  ;;  %v650_v40 = vrot.slane %v367_v36, 1 }
  0x67   : > { %3859 = vmatmul.msk.f32.gmra.mxu2 %vm421_vm1, %v875_v41  ;;  %v1120_v41 = vrot.slane %v408_v37, 3  ;;  %v3925_v37 = vld [vmem:[%s6289_s3 + $0x20] sm:$0xff] }
  0x68   : > { %v651_v44 = vsel %vm618_vm3, %v648_v30, %v650_v40  ;;  %v653_v57 = vsel %vm618_vm3, %v650_v40, %v652_v52  ;;  %v4564_v30 = vld [vmem:[%s4322_s29 + $0x1f0] sm:$0xff] }
  0x69   : > { %v1123_v58 = vsel %vm1090_vm4, %v1120_v41, %v1122_v53 }
  0x6b   : > { %3836 = vmatmul.msk.f32.gmra.mxu1 %vm421_vm1, %v639_v45  ;;  %3881 = vmatmul.msk.f32.gmra.mxu3 %vm421_vm1, %v1109_v46  ;;  %v1121_v45 = vsel %vm1090_vm4, %v1118_v31, %v1120_v41  ;;  %v888_v46 = vrot.slane %v389_v42, 2  ;;  %v3926_v31 = vld [vmem:[%s6289_s3 + $0x28] sm:$0x3] }
  0x6c   : > { %3927 = vmatpush.msk.msrb.mxu2 %vm1392_vm5, %v3926_v31 }
  0x6d   : > { %v891_v5 = vsel %vm854_vm2, %v888_v46, %v890_v59 }
  0x6e   : > { %3814 = vmatmul.msk.f32.gmra.mxu0 %vm421_vm1, %v340_v50  ;;  %v346_v50 = vld [vmem:[%s4322_s29 + $0x80] sm:$0xff]  ;;  %1820 = vmatpush.msrb.mxu2 %v3925_v37 }
  0x6f   : > { %3860 = vmatmul.msk.f32.gmra.mxu2 %vm421_vm1, %v877_v51  ;;  %v889_v51 = vsel %vm854_vm2, %v886_v35, %v888_v46  ;;  %v894_v46 = vrot.slane %v4564_v30, 2 }
  0x73   : > { %3837 = vmatmul.msk.f32.gmra.mxu1 %vm421_vm1, %v641_v55  ;;  %3882 = vmatmul.msk.f32.gmra.mxu3 %vm421_vm1, %v1111_v56 }
  0x76   : > { %3815 = vmatmul.msk.f32.gmra.mxu0 %vm421_vm1, %v341_v60  ;;  %v4530_v60 = vld [vmem:[%s6288_s2] ss:$0 sm:$0xff] }
  0x77   : > { %3861 = vmatmul.msk.f32.gmra.mxu2 %vm421_vm1, %v879_v61  ;;  %v369_v61 = vld [vmem:[%s4322_s29 + $0x138] sm:$0xff] }
  0x78   : > { %v654_v6 = vrot.slane %v369_v61, 1 }
  0x7a   : > { %v655_v14 = vsel %vm618_vm3, %v652_v52, %v654_v6 }
  0x7b   : > { %3838 = vmatmul.msk.f32.gmra.mxu1 %vm421_vm1, %v643_v1  ;;  %3883 = vmatmul.msk.f32.gmra.mxu3 %vm421_vm1, %v1113_v2 }
  0x7e   : > { %3816 = vmatmul.msk.f32.gmra.mxu0 %vm421_vm1, %v342_v7  ;;  %v1124_v7 = vrot.slane %v410_v62, 3 }
  0x7f   : > { %3862 = vmatmul.msk.f32.gmra.mxu2 %vm421_vm1, %v881_v8  ;;  %v4541_v8 = vld [vmem:[%s4322_s29 + $0x1e8] sm:$0xff] }
  0x80   : > { %v1125_v15 = vsel %vm1090_vm4, %v1122_v53, %v1124_v7  ;;  %v892_v16 = vrot.slane %v4541_v8, 2  ;;  %v896_v8 = vrot.slane %v4343_v18, 2 }
  0x82   : > { %v893_v27 = vsel %vm854_vm2, %v890_v59, %v892_v16  ;;  %v658_v59 = vrot.slane %v371_v48, 1 }
  0x83   : > { %3839 = vmatmul.msk.f32.gmra.mxu1 %vm421_vm1, %v645_v12  ;;  %3884 = vmatmul.msk.f32.gmra.mxu3 %vm421_vm1, %v1115_v13 }
  0x86   : > { %3817 = vmatmul.msk.f32.gmra.mxu0 %vm421_vm1, %v343_v17  ;;  %v4550_v17 = vld [vmem:[%s4322_s29 + $0x140] sm:$0xff] }
  0x87   : > { %3863 = vmatmul.msk.f32.gmra.mxu2 %vm421_vm1, %v883_v19  ;;  %v4553_v19 = vld [vmem:[%s4322_s29 + $0x288] sm:$0xff] }
  0x8b   : > { %3840 = vmatmul.msk.f32.gmra.mxu1 %vm421_vm1, %v647_v23  ;;  %3885 = vmatmul.msk.f32.gmra.mxu3 %vm421_vm1, %v1117_v24 }
  0x8e   : > { %3818 = vmatmul.msk.f32.gmra.mxu0 %vm421_vm1, %v344_v28  ;;  %v656_v28 = vrot.slane %v4550_v17, 1 }
  0x8f   : > { %3864 = vmatmul.msk.f32.gmra.mxu2 %vm421_vm1, %v885_v29  ;;  %v1126_v29 = vrot.slane %v4553_v19, 3  ;;  %v897_v19 = vsel %vm854_vm2, %v894_v46, %v896_v8 }
  0x93   : > { %3841 = vmatmul.msk.f32.gmra.mxu1 %vm421_vm1, %v649_v33  ;;  %3886 = vmatmul.msk.f32.gmra.mxu3 %vm421_vm1, %v1119_v34  ;;  %v1421_v33 = vld [vmem:[%s6289_s3 + $0x8] sm:$0x3]  ;;  %v3895_v34 = vld [vmem:[%s6289_s3 + $0x10] sm:$0xff] }
  0x94   : > { %3911 = vmatpush.msk.msra.mxu1 %vm1392_vm5, %v1421_v33  ;;  %1552 = vmatpush.msrb.mxu0 %v3895_v34 }
  0x96   : > { %3819 = vmatmul.msk.f32.gmra.mxu0 %vm421_vm1, %v345_v38 }
  0x97   : > { %3865 = vmatmul.msk.f32.gmra.mxu2 %vm421_vm1, %v887_v39 }
  0x98   : > { %v4512_v43 = vpop.f32.mrf.mxu1 }
  0x9b   : > { %3842 = vmatmul.msk.f32.gmra.mxu1 %vm421_vm1, %v651_v44  ;;  %3887 = vmatmul.msk.f32.gmra.mxu3 %vm421_vm1, %v1121_v45  ;;  %v509_v49 = vpop.f32.mrf.mxu0  ;;  %v657_v44 = vsel %vm618_vm3, %v654_v6, %v656_v28  ;;  %v1127_v45 = vsel %vm1090_vm4, %v1124_v7, %v1126_v29  ;;  %v659_v6 = vsel %vm618_vm3, %v656_v28, %v658_v59 }
  0x9c   : > { %v510_v1 = vadd.f32 %v4530_v60, %v509_v49  ;;  %v412_v49 = vld [vmem:[%s4322_s29 + $0x290] sm:$0xff] }
  0x9d   : > { %v1128_v61 = vrot.slane %v412_v49, 3 }
  0x9e   : > { %v569_v55 = vpop.f32.mrf.mxu3  ;;  %3820 = vmatmul.msk.f32.gmra.mxu0 %vm421_vm1, %v346_v50  ;;  %v575_v12 = vmax.f32 %v510_v1, 0.0  ;;  %v1420_v50 = vld [vmem:[%s6289_s3] sm:$0xff] }
  0x9f   : > { %3866 = vmatmul.msk.f32.gmra.mxu2 %vm421_vm1, %v889_v51  ;;  %1649 = vmatpush.msra.mxu1 %v1420_v50  ;;  %v1129_v7 = vsel %vm1090_vm4, %v1126_v29, %v1128_v61 }
  0xa0   : > { %v723_v56 = vpop.f32.mrf.mxu1 }
  0xa1   : > { %v724_v0 = vadd.f32 %v4530_v60, %v723_v56 }
  0xa2   : > { %v959_v63 = vpop.f32.mrf.mxu2 }
  0xa3   : > { %3843 = vmatmul.msk.f32.gmra.mxu1 %vm421_vm1, %v653_v57  ;;  %3888 = vmatmul.msk.f32.gmra.mxu3 %vm421_vm1, %v1123_v58  ;;  %v512_v2 = vpop.f32.mrf.mxu0  ;;  %v789_v10 = vmax.f32 %v724_v0, 0.0  ;;  %v960_v11 = vadd.f32 %v4530_v60, %v959_v63  ;;  %v895_v58 = vsel %vm854_vm2, %v892_v16, %v894_v46 }
  0xa4   : > { %v513_v21 = vadd.f32 %v4530_v60, %v512_v2 }
  0xa5   : > { %v1025_v22 = vmax.f32 %v960_v11, 0.0  ;;  %v811_v24 = vmax.f32 %v575_v12, %v789_v10  ;;  %v413_v10 = vld [vmem:[%s4322_s29 + $0x298] sm:$0xff]  ;;  %v3941_v11 = vld [vmem:[%s6289_s3 + $0x30] sm:$0xff] }
  0xa6   : > { %v572_v9 = vpop.f32.mrf.mxu3  ;;  %3821 = vmatmul.msk.f32.gmra.mxu0 %vm421_vm1, %v347_v3  ;;  %v576_v36 = vmax.f32 %v513_v21, 0.0  ;;  %1989 = vmatpush.msra.mxu3 %v3941_v11  ;;  %v1130_v21 = vrot.slane %v413_v10, 3 }
  0xa7   : > { %3867 = vmatmul.msk.f32.gmra.mxu2 %vm421_vm1, %v891_v5  ;;  %v1047_v40 = vmax.f32 %v811_v24, %v1025_v22 }
  0xa8   : > { %v726_v13 = vpop.f32.mrf.mxu1  ;;  %v1131_v30 = vsel %vm1090_vm4, %v1128_v61, %v1130_v21 }
  0xa9   : > { %v727_v23 = vadd.f32 %v4530_v60, %v726_v13 }
  0xaa   : > { %v962_v20 = vpop.f32.mrf.mxu2 }
  0xab   : > { %3844 = vmatmul.msk.f32.gmra.mxu1 %vm421_vm1, %v655_v14  ;;  %3889 = vmatmul.msk.f32.gmra.mxu3 %vm421_vm1, %v1125_v15  ;;  %v515_v25 = vpop.f32.mrf.mxu0  ;;  %v790_v38 = vmax.f32 %v727_v23, 0.0  ;;  %v963_v39 = vadd.f32 %v4530_v60, %v962_v20  ;;  %v660_v20 = vrot.slane %v4327_v4, 1  ;;  %v414_v4 = vld [vmem:[%s4322_s29 + $0x2a0] sm:$0xf]  ;;  %s323_s29 = sand.u32 1, %s4197_s10  }
  0xac   : > { %v516_v52 = vadd.f32 %v4530_v60, %v515_v25  ;;  %s324_s28 = scalar_lea.vmem [#allocation3], %s323_s29  ;;  %s3731_s17 = scalar_lea.sflag [#allocation4], %s323_s29 }
  0xad   : > { %v1026_v53 = vmax.f32 %v963_v39, 0.0  ;;  %v812_v56 = vmax.f32 %v576_v36, %v790_v38  ;;  %v661_v29 = vsel %vm618_vm3, %v658_v59, %v660_v20  ;;  %v1132_v39 = vrot.slane %v414_v4, 3  ;;  %s3741_s14 = sshll.u32 %s324_s28, 4  ;;  %s3742_s14 = int_to_ptr.vmem [resolvable:$true] %s3741_s14 }
  0xae   : > { %v1195_v35 = vpop.f32.mrf.mxu3  ;;  %3822 = vmatmul.msk.f32.gmra.mxu0 %vm421_vm1, %v348_v26  ;;  %v577_v63 = vmax.f32 %v516_v52, 0.0 }
  0xaf   : > { %v1196_v41 = vadd.f32 %v4530_v60, %v1195_v35  ;;  %3868 = vmatmul.msk.f32.gmra.mxu2 %vm421_vm1, %v893_v27  ;;  %v1048_v2 = vmax.f32 %v812_v56, %v1026_v53  ;;  %v1133_v48 = vsel %vm1090_vm4, %v1130_v21, %v1132_v39 }
  0xb0   : > { %v729_v42 = vpop.f32.mrf.mxu1 }
  0xb1   : > { %v1261_v47 = vmax.f32 %v1196_v41, 0.0  ;;  %v730_v55 = vadd.f32 %v4530_v60, %v729_v42 }
  0xb2   : > { %v965_v51 = vpop.f32.mrf.mxu2 }
  0xb3   : > { %v1283_v54 = vmax.f32 %v1047_v40, %v1261_v47  ;;  %3845 = vmatmul.msk.f32.gmra.mxu1 %vm421_vm1, %v657_v44  ;;  %3890 = vmatmul.msk.f32.gmra.mxu3 %vm421_vm1, %v1127_v45  ;;  %v518_v57 = vpop.f32.mrf.mxu0  ;;  %v791_v0 = vmax.f32 %v730_v55, 0.0  ;;  %v966_v1 = vadd.f32 %v4530_v60, %v965_v51 }
  0xb4   : > { %v519_v13 = vadd.f32 %v4530_v60, %v518_v57 }
  0xb5   : > { %1306 = vst.msk [vmem:[#allocation2] sm:$0xff] %vm1305_vm6, %v1283_v54  ;;  %v1027_v14 = vmax.f32 %v966_v1, 0.0  ;;  %v813_v17 = vmax.f32 %v577_v63, %v791_v0 }
  0xb6   : > { %v1198_v62 = vpop.f32.mrf.mxu3  ;;  %v578_v23 = vmax.f32 %v519_v13, 0.0 }
  0xb7   : > { %v1199_v3 = vadd.f32 %v4530_v60, %v1198_v62  ;;  %3869 = vmatmul.msk.f32.gmra.mxu2 %vm421_vm1, %v895_v58  ;;  %v1049_v26 = vmax.f32 %v813_v17, %v1027_v14 }
  0xb8   : > { %v732_v5 = vpop.f32.mrf.mxu1 }
  0xb9   : > { %v1262_v9 = vmax.f32 %v1199_v3, 0.0  ;;  %v733_v16 = vadd.f32 %v4530_v60, %v732_v5 }
  0xba   : > { %v968_v12 = vpop.f32.mrf.mxu2 }
  0xbb   : > { %v1284_v15 = vmax.f32 %v1048_v2, %v1262_v9  ;;  %3846 = vmatmul.msk.f32.gmra.mxu1 %vm421_vm1, %v659_v6  ;;  %3891 = vmatmul.msk.f32.gmra.mxu3 %vm421_vm1, %v1129_v7  ;;  %v521_v18 = vpop.f32.mrf.mxu0  ;;  %v792_v24 = vmax.f32 %v733_v16, 0.0  ;;  %v969_v25 = vadd.f32 %v4530_v60, %v968_v12 }
  0xbc   : > { %v522_v33 = vadd.f32 %v4530_v60, %v521_v18  ;;  %v4645_v0 = vld [vmem:[#allocation2 + $0x1] sm:$0x1f] }
  0xbd   : > { %1307 = vst.msk [vmem:[#allocation2 + $0x8] sm:$0xff] %vm1305_vm6, %v1284_v15  ;;  %v1028_v34 = vmax.f32 %v969_v25, 0.0  ;;  %v814_v37 = vmax.f32 %v578_v23, %v792_v24  ;;  %v1329_v9 = vld [vmem:[#allocation2] sm:$0x1f] }
  0xbe   : > { %v1201_v22 = vpop.f32.mrf.mxu3  ;;  %v579_v41 = vmax.f32 %v522_v33, 0.0 }
  0xbf   : > { %v1202_v27 = vadd.f32 %v4530_v60, %v1201_v22  ;;  %3870 = vmatmul.msk.f32.gmra.mxu2 %vm421_vm1, %v897_v19  ;;  %v1050_v45 = vmax.f32 %v814_v37, %v1028_v34 }
  0xc0   : > { %v735_v28 = vpop.f32.mrf.mxu1 }
  0xc1   : > { %v1263_v31 = vmax.f32 %v1202_v27, 0.0  ;;  %v736_v36 = vadd.f32 %v4530_v60, %v735_v28 }
  0xc2   : > { %v971_v32 = vpop.f32.mrf.mxu2 }
  0xc3   : > { %v1285_v35 = vmax.f32 %v1049_v26, %v1263_v31  ;;  %3847 = vmatmul.msk.f32.gmra.mxu1 %vm421_vm1, %v661_v29  ;;  %3892 = vmatmul.msk.f32.gmra.mxu3 %vm421_vm1, %v1131_v30  ;;  %v524_v38 = vpop.f32.mrf.mxu0  ;;  %v793_v42 = vmax.f32 %v736_v36, 0.0  ;;  %v972_v44 = vadd.f32 %v4530_v60, %v971_v32 }
  0xc4   : > { %v525_v52 = vadd.f32 %v4530_v60, %v524_v38  ;;  %v4667_v23 = vld [vmem:[#allocation2 + $0x7] sm:$0x1f] }
  0xc5   : > { %1308 = vst.msk [vmem:[#allocation2 + $0x10] sm:$0xff] %vm1305_vm6, %v1285_v35  ;;  %v1029_v53 = vmax.f32 %v972_v44, 0.0  ;;  %v815_v55 = vmax.f32 %v579_v41, %v793_v42 }
  0xc6   : > { %v1204_v40 = vpop.f32.mrf.mxu3  ;;  %v580_v1 = vmax.f32 %v525_v52, 0.0 }
  0xc7   : > { %v1205_v46 = vadd.f32 %v4530_v60, %v1204_v40  ;;  %3871 = vmatmul.msk.f32.gmra.mxu2 %vm421_vm1, %v896_v8  ;;  %v1051_v3 = vmax.f32 %v815_v55, %v1029_v53 }
  0xc8   : > { %v738_v47 = vpop.f32.mrf.mxu1 }
  0xc9   : > { %v1264_v49 = vmax.f32 %v1205_v46, 0.0  ;;  %v739_v50 = vadd.f32 %v4530_v60, %v738_v47 }
  0xca   : > { %v974_v51 = vpop.f32.mrf.mxu2 }
  0xcb   : > { %v1286_v54 = vmax.f32 %v1050_v45, %v1264_v49  ;;  %3848 = vmatmul.msk.f32.gmra.mxu1 %vm421_vm1, %v660_v20  ;;  %3893 = vmatmul.msk.f32.gmra.mxu3 %vm421_vm1, %v1133_v48  ;;  %v527_v56 = vpop.f32.mrf.mxu0  ;;  %v794_v61 = vmax.f32 %v739_v50, 0.0  ;;  %v975_v62 = vadd.f32 %v4530_v60, %v974_v51 }
  0xcc   : > { %v4638_v57 = vld [vmem:[#allocation2 + $0xe] sm:$0x1f]  ;;  %v528_v14 = vadd.f32 %v4530_v60, %v527_v56 }
  0xcd   : > { %v4640_v58 = vld [vmem:[#allocation2 + $0xd] sm:$0x1f]  ;;  %1309 = vst.msk [vmem:[#allocation2 + $0x18] sm:$0xff] %vm1305_vm6, %v1286_v54  ;;  %v1700_v59 = vrot.slane %v4638_v57, 3  ;;  %v1030_v10 = vmax.f32 %v975_v62, 0.0  ;;  %v816_v11 = vmax.f32 %v580_v1, %v794_v61  ;;  %v6301_v33 = vrot.slane %v4638_v57, 1 }
  0xce   : > { %v1207_v63 = vpop.f32.mrf.mxu3  ;;  %v1350_v2 = vrot.slane %v4640_v58, 3  ;;  %v581_v24 = vmax.f32 %v528_v14, 0.0 }
  0xcf   : > { %v1208_v5 = vadd.f32 %v4530_v60, %v1207_v63  ;;  %v1735_v6 = vsel %vm1090_vm4, %v4645_v0, %v1700_v59  ;;  %v1052_v21 = vmax.f32 %v816_v11, %v1030_v10 }
  0xd0   : > { %v741_v7 = vpop.f32.mrf.mxu1  ;;  %3928 = vmatmul.msk.f32.vlgmr.msrb.gmra.mxu2 %vm1305_vm6, %v1735_v6  ;;  %v1391_v13 = vsel %vm1090_vm4, %v1329_v9, %v1350_v2 }
  0xd1   : > { %v1265_v8 = vmax.f32 %v1208_v5, 0.0  ;;  %v742_v16 = vadd.f32 %v4530_v60, %v741_v7 }
  0xd2   : > { %v977_v12 = vpop.f32.mrf.mxu2 }
  0xd3   : > { %v1287_v15 = vmax.f32 %v1051_v3, %v1265_v8  ;;  %3894 = vmatmul.msk.f32.gmra.mxu3 %vm421_vm1, %v1132_v39  ;;  %3912 = vmatmul.msk.f32.vlgmr.msra.gmra.mxu1 %vm1305_vm6, %v1391_v13  ;;  %v530_v17 = vpop.f32.mrf.mxu0  ;;  %v795_v27 = vmax.f32 %v742_v16, 0.0  ;;  %v978_v28 = vadd.f32 %v4530_v60, %v977_v12 }
  0xd4   : > { %v4661_v18 = vld [vmem:[#allocation2 + $0x14] sm:$0x1f]  ;;  %v4663_v19 = vld [vmem:[#allocation2 + $0x1a] sm:$0x1f]  ;;  %v531_v32 = vadd.f32 %v4530_v60, %v530_v17 }
  0xd5   : > { %1310 = vst.msk [vmem:[#allocation2 + $0x20] sm:$0xff] %vm1305_vm6, %v1287_v15  ;;  %v1432_v20 = vrot.slane %v4661_v18, 3  ;;  %v1876_v25 = vrot.slane %v4663_v19, 3  ;;  %v4670_v26 = vld [vmem:[#allocation2 + $0x1b] sm:$0x1f]  ;;  %v1031_v39 = vmax.f32 %v978_v28, 0.0  ;;  %v817_v41 = vmax.f32 %v581_v24, %v795_v27 }
  0xd6   : > { %v1210_v22 = vpop.f32.mrf.mxu3  ;;  %v1456_v34 = vrot.slane %v4670_v26, 4  ;;  %v2210_v38 = vrot.slane %v4670_v26, 3  ;;  %v582_v47 = vmax.f32 %v531_v32, 0.0  ;;  %v6302_v52 = vrot.slane %v4661_v18, 1 }
  0xd7   : > { %v1211_v29 = vadd.f32 %v4530_v60, %v1210_v22  ;;  %v1467_v30 = vsel %vm1090_vm4, %v4667_v23, %v1432_v20  ;;  %v1906_v37 = vsel %vm1090_vm4, %v4640_v58, %v1876_v25  ;;  %v1053_v54 = vmax.f32 %v817_v41, %v1031_v39 }
  0xd8   : > { %v744_v31 = vpop.f32.mrf.mxu1  ;;  %3898 = vmatmul.msk.f32.vlgmr.msrb.gmra.mxu0 %vm1305_vm6, %v1467_v30  ;;  %v4692_v44 = vsel %vm1395_vm7, %v6301_v33, %v1456_v34  ;;  %v4700_v46 = vsel %vm1090_vm4, %v4638_v57, %v2210_v38  ;;  %v1353_v61 = vrot.slane %v4663_v19, 6  ;;  %v6296_v62 = vrot.slane %v4670_v26, 6 }
  0xd9   : > { %v1266_v4 = vmax.f32 %v1211_v29, 0.0  ;;  %v745_v35 = vadd.f32 %v4530_v60, %v744_v31  ;;  %v6298_v16 = vrot.slane %v4670_v26, 1 }
  0xda   : > { %v980_v36 = vpop.f32.mrf.mxu2  ;;  %v1393_v13 = vsel %vm1392_vm5, %v1350_v2, %v1353_v61  ;;  %v1736_v15 = vsel %vm1392_vm5, %v1700_v59, %v6296_v62 }
  0xdb   : > { %v1288_v40 = vmax.f32 %v1052_v21, %v1266_v4  ;;  %3944 = vmatmul.msk.f32.vlgmr.msra.gmra.mxu3 %vm1305_vm6, %v1906_v37  ;;  %v533_v42 = vpop.f32.mrf.mxu0  ;;  %v796_v49 = vmax.f32 %v745_v35, 0.0  ;;  %v981_v50 = vadd.f32 %v4530_v60, %v980_v36 }
  0xdc   : > { %v4694_v45 = vld [vmem:[#allocation2 + $0x21] sm:$0x1f]  ;;  %v534_v5 = vadd.f32 %v4530_v60, %v533_v42 }
  0xdd   : > { %1311 = vst.msk [vmem:[#allocation2 + $0x28] sm:$0xff] %vm1305_vm6, %v1288_v40  ;;  %v1380_v48 = vrot.slane %v4694_v45, 4  ;;  %v2044_v53 = vrot.slane %v4694_v45, 3  ;;  %v1032_v6 = vmax.f32 %v981_v50, 0.0  ;;  %v818_v8 = vmax.f32 %v582_v47, %v796_v49 }
  0xde   : > { %v1213_v51 = vpop.f32.mrf.mxu3  ;;  %v583_v2 = vmax.f32 %v534_v5, 0.0  ;;  %v6297_v35 = vrot.slane %v4694_v45, 6 }
  0xdf   : > { %v1214_v55 = vadd.f32 %v4530_v60, %v1213_v51  ;;  %v4715_v63 = vsel %vm1395_vm7, %v6302_v52, %v1380_v48  ;;  %v4721_v1 = vsel %vm1090_vm4, %v4661_v18, %v2044_v53  ;;  %v1054_v27 = vmax.f32 %v818_v8, %v1032_v6 }
  0xe0   : > { %v747_v56 = vpop.f32.mrf.mxu1  ;;  %v6300_v6 = vrot.slane %v4694_v45, 1 }
  0xe1   : > { %v1267_v3 = vmax.f32 %v1214_v55, 0.0  ;;  %v748_v7 = vadd.f32 %v4530_v60, %v747_v56  ;;  %v4774_v56 = vld [vmem:[#allocation2 + $0x22] sm:$0x1f] }
  0xe2   : > { %v983_v9 = vpop.f32.mrf.mxu2 }
  0xe3   : > { %v1289_v10 = vmax.f32 %v1053_v54, %v1267_v3  ;;  %v536_v11 = vpop.f32.mrf.mxu0  ;;  %v797_v22 = vmax.f32 %v748_v7, 0.0  ;;  %v984_v24 = vadd.f32 %v4530_v60, %v983_v9 }
  0xe4   : > { %v4725_v12 = vld [vmem:[#allocation2 + $0x27] sm:$0x1f]  ;;  %v537_v36 = vadd.f32 %v4530_v60, %v536_v11 }
  0xe5   : > { %v4730_v14 = vld [vmem:[#allocation2 + $0x28] sm:$0x1f]  ;;  %1312 = vst.msk [vmem:[#allocation2 + $0x30] sm:$0xff] %vm1305_vm6, %v1289_v10  ;;  %v1356_v17 = vrot.slane %v4725_v12, 1  ;;  %v2378_v21 = vrot.slane %v4725_v12, 3  ;;  %v1033_v49 = vmax.f32 %v984_v24, 0.0  ;;  %v819_v50 = vmax.f32 %v583_v2, %v797_v22 }
  0xe6   : > { %v4742_v58 = vrot.slane %v4730_v14, 1  ;;  %v1216_v28 = vpop.f32.mrf.mxu3  ;;  %v1459_v29 = vrot.slane %v4730_v14, 7  ;;  %v2212_v39 = vrot.slane %v4730_v14, 6  ;;  %v2064_v42 = vrot.slane %v4730_v14, 4 }
  0xe7   : > { %v1217_v59 = vadd.f32 %v4530_v60, %v1216_v28  ;;  %v1394_v30 = vsel %vm618_vm3, %v1393_v13, %v1356_v17  ;;  %v4756_v4 = vsel %vm1090_vm4, %v4663_v19, %v2378_v21  ;;  %v6305_v47 = vrot.slane %v4730_v14, 3 }
  0xe8   : > { %6339 = vst [vmem:[#allocation6_spill] sm:$0xff] %v4742_v58  ;;  %v1737_v31 = vsel %vm618_vm3, %v1736_v15, %v4742_v58  ;;  %v750_v32 = vpop.f32.mrf.mxu1  ;;  %3913 = vmatmul.msk.f32.gmra.mxu1 %vm1305_vm6, %v1394_v30  ;;  %v4763_v37 = vsel %vm488_vm0, %v1456_v34, %v1459_v29  ;;  %v4772_v54 = vsel %vm1392_vm5, %v2210_v38, %v2212_v39  ;;  %v584_v5 = vmax.f32 %v537_v36, 0.0 }
  0xe9   : > { %3929 = vmatmul.msk.f32.gmra.mxu2 %vm1305_vm6, %v1737_v31  ;;  %v1268_v40 = vmax.f32 %v1217_v59, 0.0  ;;  %v751_v41 = vadd.f32 %v4530_v60, %v750_v32  ;;  %v4781_v61 = vsel %vm1395_vm7, %v6298_v16, %v2064_v42  ;;  %v1468_v38 = vsel %vm1392_vm5, %v1432_v20, %v6297_v35 }
  0xea   : > { %v986_v51 = vpop.f32.mrf.mxu2  ;;  %6340 = vst [vmem:[#allocation7_spill] sm:$0xff] %v4781_v61  ;;  %v4795_v7 = vsel %vm1090_vm4, %v4670_v26, %v6305_v47  ;;  %v1055_v20 = vmax.f32 %v819_v50, %v1033_v49  ;;  %v6299_v24 = vrot.slane %v4774_v56, 1  ;;  %v1878_v31 = vrot.slane %v4725_v12, 6 }
  0xeb   : > { %v1290_v55 = vmax.f32 %v1054_v27, %v1268_v40  ;;  %v539_v34 = vpop.f32.mrf.mxu0  ;;  %6341 = vst [vmem:[#allocation8_spill] sm:$0xff] %v4795_v7  ;;  %v798_v8 = vmax.f32 %v751_v41, 0.0  ;;  %v987_v9 = vadd.f32 %v4530_v60, %v986_v51 }
  0xec   : > { %v4783_v3 = vld [vmem:[#allocation2 + $0x2e] sm:$0x1f]  ;;  %v540_v29 = vadd.f32 %v4530_v60, %v539_v34 }
  0xed   : > { %1313 = vst.msk [vmem:[#allocation2 + $0x38] sm:$0xff] %vm1305_vm6, %v1290_v55  ;;  %v4800_v10 = vrot.slane %v4783_v3, 1  ;;  %v1383_v11 = vrot.slane %v4783_v3, 7  ;;  %v4803_v15 = vld [vmem:[#allocation2 + $0x2f] sm:$0x1f]  ;;  %v1898_v2 = vrot.slane %v4783_v3, 4  ;;  %v820_v41 = vmax.f32 %v584_v5, %v798_v8 }
  0xee   : > { %v1219_v13 = vpop.f32.mrf.mxu3  ;;  %v2514_v22 = vrot.slane %v4783_v3, 3  ;;  %v1034_v39 = vmax.f32 %v987_v9, 0.0  ;;  %v2230_v49 = vrot.slane %v4803_v15, 4 }
  0xef   : > { %6342 = vst [vmem:[#allocation9_spill] sm:$0xff] %v4800_v10  ;;  %v1220_v27 = vadd.f32 %v4530_v60, %v1219_v13  ;;  %v1469_v28 = vsel %vm618_vm3, %v1468_v38, %v4800_v10  ;;  %v1405_v59 = vsel %vm488_vm0, %v1380_v48, %v1383_v11  ;;  %v4822_v32 = vsel %vm1395_vm7, %v6300_v6, %v1898_v2 }
  0xf0   : > { %v753_v30 = vpop.f32.mrf.mxu1  ;;  %3899 = vmatmul.msk.f32.gmra.mxu0 %vm1305_vm6, %v1469_v28  ;;  %v4828_v36 = vsel %vm1090_vm4, %v4694_v45, %v2514_v22  ;;  %v2046_v48 = vrot.slane %v4783_v3, 6  ;;  %v585_v38 = vmax.f32 %v540_v29, 0.0  ;;  %v4841_v9 = vsel %vm1395_vm7, %v6299_v24, %v2230_v49 }
  0xf1   : > { %v1269_v40 = vmax.f32 %v1220_v27, 0.0  ;;  %v754_v50 = vadd.f32 %v4530_v60, %v753_v30  ;;  %6343 = vst [vmem:[#allocation10_spill] sm:$0xff] %v4841_v9 }
  0xf2   : > { %v989_v51 = vpop.f32.mrf.mxu2  ;;  %v2073_v55 = vsel %vm1392_vm5, %v2044_v53, %v2046_v48  ;;  %v1907_v53 = vsel %vm1392_vm5, %v1876_v25, %v1878_v31 }
  0xf3   : > { %v1291_v34 = vmax.f32 %v1055_v20, %v1269_v40  ;;  %v542_v11 = vpop.f32.mrf.mxu0  ;;  %v990_v5 = vadd.f32 %v4530_v60, %v989_v51  ;;  %v1056_v20 = vmax.f32 %v820_v41, %v1034_v39  ;;  %v799_v48 = vmax.f32 %v754_v50, 0.0 }
  0xf4   : > { %v4844_v8 = vld [vmem:[#allocation2 + $0x3b] sm:$0x1f]  ;;  %v4846_v13 = vld [vmem:[#allocation2 + $0x34] sm:$0x1f]  ;;  %v543_v62 = vadd.f32 %v4530_v60, %v542_v11 }
  0xf5   : > { %v4848_v27 = vld [vmem:[#allocation2 + $0x35] sm:$0x1f]  ;;  %1314 = vst.msk [vmem:[#allocation2 + $0x40] sm:$0xff] %vm1305_vm6, %v1291_v34  ;;  %v6303_v28 = vrot.slane %v4844_v8, 4  ;;  %v6308_v29 = vrot.slane %v4846_v13, 4  ;;  %v1880_v51 = vrot.slane %v4846_v13, 1 }
  0xf6   : > { %v6304_v30 = vrot.slane %v4848_v27, 4  ;;  %v1222_v40 = vpop.f32.mrf.mxu3  ;;  %v6307_v35 = vrot.slane %v4844_v8, 2  ;;  %v1035_v41 = vmax.f32 %v990_v5, 0.0  ;;  %v1900_v5 = vrot.slane %v4844_v8, 7 }
  0xf7   : > { %v1223_v19 = vadd.f32 %v4530_v60, %v1222_v40  ;;  %v4865_v25 = vsel %vm1395_vm7, %v4800_v10, %v6303_v28  ;;  %v1396_v31 = vsel %vm1395_vm7, %v1356_v17, %v6308_v29  ;;  %v1908_v34 = vsel %vm618_vm3, %v1907_v53, %v1880_v51 }
  0xf8   : > { %6344 = vst [vmem:[#allocation11_spill] sm:$0xff] %v4865_v25  ;;  %v4876_v39 = vsel %vm1395_vm7, %v4742_v58, %v6304_v30  ;;  %v756_v50 = vpop.f32.mrf.mxu1  ;;  %3900 = vmatmul.msk.f32.gmra.mxu0 %vm1305_vm6, %v4865_v25  ;;  %3914 = vmatmul.msk.f32.gmra.mxu1 %vm1305_vm6, %v1396_v31  ;;  %v4885_v11 = vsel %vm854_vm2, %v1405_v59, %v6307_v35  ;;  %v1462_v17 = vrot.slane %v4848_v27, 2  ;;  %v2214_v31 = vrot.slane %v4848_v27, 1 }
  0xf9   : > { %6345 = vst [vmem:[#allocation12_spill] sm:$0xff] %v4876_v39  ;;  %v1270_v40 = vmax.f32 %v1223_v19, 0.0  ;;  %v757_v16 = vadd.f32 %v4530_v60, %v756_v50  ;;  %3930 = vmatmul.msk.f32.gmra.mxu2 %vm1305_vm6, %v4876_v39  ;;  %3945 = vmatmul.msk.f32.gmra.mxu3 %vm1305_vm6, %v1908_v34  ;;  %v821_v53 = vmax.f32 %v585_v38, %v799_v48  ;;  %v2380_v6 = vrot.slane %v4846_v13, 6 }
  0xfa   : > { %v992_v24 = vpop.f32.mrf.mxu2  ;;  %v4896_v59 = vsel %vm854_vm2, %v4763_v37, %v1462_v17  ;;  %v6306_v19 = vrot.slane %v4844_v8, 1  ;;  %v586_v52 = vmax.f32 %v543_v62, 0.0  ;;  %v4903_v34 = vsel %vm488_vm0, %v1898_v2, %v1900_v5 }
  0xfb   : > { %v1292_v50 = vmax.f32 %v1056_v20, %v1270_v40  ;;  %v800_v33 = vmax.f32 %v757_v16, 0.0  ;;  %v545_v28 = vpop.f32.mrf.mxu0  ;;  %v993_v38 = vadd.f32 %v4530_v60, %v992_v24  ;;  %v4912_v37 = vsel %vm618_vm3, %v4772_v54, %v2214_v31  ;;  %v3958_v24 = vld [vmem:[%s6289_s3 + $0x48] sm:$0x3] }
  0xfc   : > { %v4906_v48 = vld [vmem:[#allocation2 + $0x41] sm:$0x1f]  ;;  %v2396_v62 = vsel %vm1392_vm5, %v2378_v21, %v2380_v6  ;;  %v4920_v16 = vsel %vm618_vm3, %v2073_v55, %v6306_v19  ;;  %v2516_v54 = vrot.slane %v4844_v8, 6  ;;  %3959 = vmatpush.msk.msra.mxu0 %vm1392_vm5, %v3958_v24  ;;  %v1057_v21 = vmax.f32 %v821_v53, %v1035_v41  ;;  %v4935_v5 = vld [vmem:[#allocation2 + $0x3c] sm:$0x1f] }
  0xfd   : > { %v4908_v30 = vld [vmem:[#allocation2 + $0x42] sm:$0x1f]  ;;  %1315 = vst.msk [vmem:[#allocation2 + $0x48] sm:$0xff] %vm1305_vm6, %v1292_v50  ;;  %v6309_v2 = vrot.slane %v4906_v48, 4  ;;  %v546_v40 = vadd.f32 %v4530_v60, %v545_v28  ;;  %v1036_v50 = vmax.f32 %v993_v38, 0.0  ;;  %v822_v19 = vmax.f32 %v586_v52, %v800_v33 }
  0xfe   : > { %v1225_v20 = vpop.f32.mrf.mxu3  ;;  %v1465_v12 = vrot.slane %v4908_v30, 5  ;;  %v6311_v24 = vrot.slane %v4906_v48, 1  ;;  %v6310_v53 = vrot.slane %v4908_v30, 4  ;;  %v2531_v28 = vsel %vm1392_vm5, %v2514_v22, %v2516_v54 }
  0xff   : > { %v1226_v6 = vadd.f32 %v4530_v60, %v1225_v20  ;;  %v1909_v55 = vsel %vm1395_vm7, %v1880_v51, %v6309_v2  ;;  %v1362_v38 = vrot.slane %v4906_v48, 7  ;;  %v2232_v52 = vrot.slane %v4935_v5, 7 }
 0x100   : > { %v759_v47 = vpop.f32.mrf.mxu1  ;;  %v4938_v35 = vsel %vm1399_vm8, %v1462_v17, %v1465_v12  ;;  %v4951_v33 = vsel %vm618_vm3, %v2396_v62, %v6311_v24  ;;  %v4959_v3 = vsel %vm1395_vm7, %v2214_v31, %v6310_v53  ;;  %v1708_v31 = vrot.slane %v4908_v30, 7 }
 0x101   : > { %v1271_v29 = vmax.f32 %v1226_v6, 0.0  ;;  %v760_v41 = vadd.f32 %v4530_v60, %v759_v47  ;;  %3946 = vmatmul.msk.f32.gmra.mxu3 %vm1305_vm6, %v1909_v55  ;;  %v2066_v47 = vrot.slane %v4848_v27, 7  ;;  %6346 = vst [vmem:[#allocation13_spill] sm:$0xff] %v4959_v3  ;;  %v587_v6 = vmax.f32 %v546_v40, 0.0 }
 0x102   : > { %v995_v51 = vpop.f32.mrf.mxu2  ;;  %v2250_v62 = vsel %vm488_vm0, %v2230_v49, %v2232_v52  ;;  %v6347_v2 = vrot.slane %v4846_v13, 4  ;;  %v2651_v52 = vrot.slane %v4848_v27, 6 }
 0x103   : > { %v1293_v17 = vmax.f32 %v1057_v21, %v1271_v29  ;;  %v996_v20 = vadd.f32 %v4530_v60, %v995_v51  ;;  %v548_v12 = vpop.f32.mrf.mxu0  ;;  %v801_v54 = vmax.f32 %v760_v41, 0.0  ;;  %v2083_v29 = vsel %vm488_vm0, %v2064_v42, %v2066_v47 }
 0x104   : > { %v4962_v55 = vld [vmem:[#allocation2 + $0x48] sm:$0x1f]  ;;  %v1058_v21 = vmax.f32 %v822_v19, %v1036_v50  ;;  %v1397_v53 = vsel %vm488_vm0, %v6347_v2, %v1362_v38  ;;  %v549_v47 = vadd.f32 %v4530_v60, %v548_v12 }
 0x105   : > { %1316 = vst.msk [vmem:[#allocation2 + $0x50] sm:$0xff] %vm1305_vm6, %v1293_v17  ;;  %v1389_v51 = vrot.slane %v4962_v55, 5  ;;  %v4977_v24 = vld [vmem:[#allocation2 + $0x49] sm:$0x1f]  ;;  %v6313_v49 = vrot.slane %v4962_v55, 2  ;;  %v6312_v42 = vrot.slane %v4962_v55, 1  ;;  %v823_v2 = vmax.f32 %v587_v6, %v801_v54 }
 0x106   : > { %v1228_v40 = vpop.f32.mrf.mxu3  ;;  %v1037_v19 = vmax.f32 %v996_v20, 0.0  ;;  %v6348_v17 = vrot.slane %v4844_v8, 2  ;;  %v6315_v12 = vrot.slane %v4962_v55, 4  ;;  %v6350_v54 = vrot.slane %v4908_v30, 2 }
 0x107   : > { %v1229_v50 = vadd.f32 %v4530_v60, %v1228_v40  ;;  %v4993_v38 = vsel %vm854_vm2, %v4903_v34, %v6313_v49  ;;  %v4998_v20 = vsel %vm618_vm3, %v2531_v28, %v6312_v42  ;;  %v6352_v34 = vrot.slane %v4844_v8, 1 }
 0x108   : > { %v4987_v22 = vsel %vm1399_vm8, %v6348_v17, %v1389_v51  ;;  %v762_v13 = vpop.f32.mrf.mxu1  ;;  %6349 = vst [vmem:[#allocation14_spill] sm:$0xff] %v4998_v20  ;;  %v5006_v6 = vsel %vm854_vm2, %v2083_v29, %v6350_v54  ;;  %v2653_v42 = vrot.slane %v4908_v30, 1  ;;  %v2669_v49 = vrot.slane %v4935_v5, 4 }
 0x109   : > { %v1272_v40 = vmax.f32 %v1229_v50, 0.0  ;;  %v763_v41 = vadd.f32 %v4530_v60, %v762_v13  ;;  %6351 = vst [vmem:[#allocation15_spill] sm:$0xff] %v5006_v6  ;;  %v5013_v28 = vsel %vm1395_vm7, %v6352_v34, %v6315_v12  ;;  %v6354_v50 = vrot.slane %v4730_v14, 3 }
 0x10a   : > { %v998_v17 = vpop.f32.mrf.mxu2  ;;  %6353 = vst [vmem:[#allocation16_spill] sm:$0xff] %v5013_v28  ;;  %v6355_v54 = vrot.slane %v4848_v27, 4  ;;  %v6356_v39 = vrot.slane %v4977_v24, 2 }
 0x10b   : > { %v2678_v13 = vsel %vm1392_vm5, %v6354_v50, %v2651_v52  ;;  %v1294_v51 = vmax.f32 %v1058_v21, %v1272_v40  ;;  %v999_v29 = vadd.f32 %v4530_v60, %v998_v17  ;;  %v551_v6 = vpop.f32.mrf.mxu0  ;;  %v802_v12 = vmax.f32 %v763_v41, 0.0 }
 0x10c   : > { %v1739_v7 = vsel %vm488_vm0, %v6355_v54, %v1708_v31  ;;  %v5027_v34 = vsel %vm854_vm2, %v2250_v62, %v6356_v39  ;;  %v1335_v61 = vld [vmem:[#allocation2 + $0x4e] sm:$0x1f]  ;;  %v588_v52 = vmax.f32 %v549_v47, 0.0  ;;  %v5032_v50 = vsel %vm618_vm3, %v2678_v13, %v2653_v42 }
 0x10d   : > { %6357 = vst [vmem:[#allocation17_spill] sm:$0xff] %v5027_v34  ;;  %v5029_v14 = vld [vmem:[#allocation2 + $0x4f] sm:$0x1f]  ;;  %v6359_v21 = vrot.slane %v4803_v15, 1  ;;  %v1365_v31 = vrot.slane %v1335_v61, 2  ;;  %v1440_v39 = vrot.slane %v4962_v55, 7  ;;  %v1059_v41 = vmax.f32 %v823_v2, %v1037_v19 }
 0x10e   : > { %6358 = vst [vmem:[#allocation18_spill] sm:$0xff] %v5032_v50  ;;  %v6316_v40 = vrot.slane %v5029_v14, 2  ;;  %v2671_v62 = vrot.slane %v4977_v24, 7  ;;  %v1231_v17 = vpop.f32.mrf.mxu3  ;;  %v552_v47 = vadd.f32 %v4530_v60, %v551_v6  ;;  %v2384_v13 = vrot.slane %v1335_v61, 4 }
 0x10f   : > { %v5037_v27 = vsel %vm1395_vm7, %v6359_v21, %v2669_v49  ;;  %1317 = vst.msk [vmem:[#allocation2 + $0x58] sm:$0xff] %vm1305_vm6, %v1294_v51  ;;  %v2218_v54 = vrot.slane %v5029_v14, 7  ;;  %v1038_v50 = vmax.f32 %v999_v29, 0.0  ;;  %v1232_v21 = vadd.f32 %v4530_v60, %v1231_v17 }
 0x110   : > { %6360 = vst [vmem:[#allocation19_spill] sm:$0xff] %v5037_v27  ;;  %v1398_v27 = vsel %vm854_vm2, %v1397_v53, %v1365_v31  ;;  %v5050_v51 = vsel %vm854_vm2, %v1739_v7, %v6316_v40  ;;  %v765_v34 = vpop.f32.mrf.mxu1  ;;  %v824_v19 = vmax.f32 %v588_v52, %v802_v12  ;;  %v6362_v2 = vrot.slane %v4906_v48, 1 }
 0x111   : > { %6361 = vst [vmem:[#allocation20_spill] sm:$0xff] %v5050_v51  ;;  %3915 = vmatmul.msk.f32.gmra.mxu1 %vm1305_vm6, %v1398_v27  ;;  %3931 = vmatmul.msk.f32.gmra.mxu2 %vm1305_vm6, %v5050_v51  ;;  %v6364_v29 = vrot.slane %v4908_v30, 4  ;;  %v2070_v7 = vrot.slane %v5029_v14, 5  ;;  %v1273_v17 = vmax.f32 %v1232_v21, 0.0  ;;  %v1884_v40 = vrot.slane %v1335_v61, 7 }
 0x112   : > { %v5058_v6 = vsel %vm1395_vm7, %v6362_v2, %v2384_v13  ;;  %v6320_v27 = vrot.slane %v5029_v14, 4  ;;  %v2688_v25 = vsel %vm488_vm0, %v2669_v49, %v2671_v62  ;;  %v766_v12 = vadd.f32 %v4530_v60, %v765_v34  ;;  %v1001_v52 = vpop.f32.mrf.mxu2 }
 0x113   : > { %6363 = vst [vmem:[#allocation21_spill] sm:$0xff] %v5058_v6  ;;  %v5063_v53 = vsel %vm488_vm0, %v6364_v29, %v2218_v54  ;;  %v6365_v51 = vrot.slane %v4908_v30, 2  ;;  %v1295_v58 = vmax.f32 %v1059_v41, %v1273_v17  ;;  %v554_v9 = vpop.f32.mrf.mxu0  ;;  %v1060_v61 = vmax.f32 %v824_v19, %v1038_v50 }
 0x114   : > { %v5077_v54 = vsel %vm1395_vm7, %v2653_v42, %v6320_v27  ;;  %v6368_v49 = vrot.slane %v4844_v8, 4  ;;  %v589_v30 = vmax.f32 %v552_v47, 0.0  ;;  %v6369_v42 = vrot.slane %v4906_v48, 4 }
 0x115   : > { %v5072_v2 = vsel %vm1399_vm8, %v6365_v51, %v2070_v7  ;;  %6367 = vst [vmem:[#allocation23_spill] sm:$0xff] %v5077_v54  ;;  %v803_v19 = vmax.f32 %v766_v12, 0.0  ;;  %v1002_v8 = vadd.f32 %v4530_v60, %v1001_v52  ;;  %v6371_v12 = vrot.slane %v4962_v55, 2 }
 0x116   : > { %6366 = vst [vmem:[#allocation22_spill] sm:$0xff] %v5072_v2  ;;  %v5079_v21 = vld [vmem:[#allocation2 + $0x55] sm:$0x1f]  ;;  %v1471_v34 = vsel %vm488_vm0, %v6368_v49, %v1440_v39  ;;  %v5084_v62 = vld [vmem:[#allocation2 + $0x5b] sm:$0x1f]  ;;  %v1910_v50 = vsel %vm488_vm0, %v6369_v42, %v1884_v40  ;;  %v1234_v7 = vpop.f32.mrf.mxu3  ;;  %v6374_v2 = vrot.slane %v4962_v55, 4 }
 0x117   : > { %1318 = vst.msk [vmem:[#allocation2 + $0x60] sm:$0xff] %vm1305_vm6, %v1295_v58  ;;  %v1443_v41 = vrot.slane %v5079_v21, 2  ;;  %v1368_v51 = vrot.slane %v5084_v62, 5  ;;  %v6321_v29 = vrot.slane %v5084_v62, 2  ;;  %v5094_v39 = vld [vmem:[#allocation2 + $0x56] sm:$0x1f]  ;;  %v1235_v17 = vadd.f32 %v4530_v60, %v1234_v7 }
 0x118   : > { %v1904_v47 = vrot.slane %v5079_v21, 5  ;;  %v2386_v58 = vrot.slane %v5084_v62, 7  ;;  %v768_v40 = vpop.f32.mrf.mxu1  ;;  %v2052_v42 = vrot.slane %v5079_v21, 7  ;;  %v825_v54 = vmax.f32 %v589_v30, %v803_v19 }
 0x119   : > { %v5100_v49 = vsel %vm854_vm2, %v1471_v34, %v1443_v41  ;;  %v1400_v27 = vsel %vm1399_vm8, %v1365_v31, %v1368_v51  ;;  %v1911_v48 = vsel %vm854_vm2, %v1910_v50, %v6321_v29  ;;  %v2520_v31 = vrot.slane %v5079_v21, 4 }
 0x11a   : > { %6370 = vst [vmem:[#allocation24_spill] sm:$0xff] %v5100_v49  ;;  %3901 = vmatmul.msk.f32.gmra.mxu0 %vm1305_vm6, %v5100_v49  ;;  %3916 = vmatmul.msk.f32.gmra.mxu1 %vm1305_vm6, %v1400_v27  ;;  %v5112_v52 = vsel %vm1399_vm8, %v6371_v12, %v1904_v47  ;;  %v5115_v34 = vsel %vm488_vm0, %v2384_v13, %v2386_v58  ;;  %v1274_v51 = vmax.f32 %v1235_v17, 0.0  ;;  %v2237_v50 = vrot.slane %v5094_v39, 5  ;;  %v1004_v27 = vpop.f32.mrf.mxu2 }
 0x11b   : > { %3947 = vmatmul.msk.f32.gmra.mxu3 %vm1305_vm6, %v1911_v48  ;;  %v769_v7 = vadd.f32 %v4530_v60, %v768_v40  ;;  %v555_v29 = vadd.f32 %v4530_v60, %v554_v9  ;;  %v6372_v47 = vrot.slane %v4962_v55, 1  ;;  %v2673_v13 = vrot.slane %v5094_v39, 2  ;;  %v557_v48 = vpop.f32.mrf.mxu0 }
 0x11c   : > { %v1039_v58 = vmax.f32 %v1002_v8, 0.0  ;;  %v1296_v17 = vmax.f32 %v1060_v61, %v1274_v51  ;;  %v2076_v49 = vsel %vm488_vm0, %v6374_v2, %v2052_v42  ;;  %v6375_v9 = vrot.slane %v4977_v24, 2 }
 0x11d   : > { %v5126_v12 = vsel %vm1395_vm7, %v6372_v47, %v2520_v31  ;;  %v5142_v47 = vsel %vm854_vm2, %v2688_v25, %v2673_v13  ;;  %v1005_v61 = vadd.f32 %v4530_v60, %v1004_v27  ;;  %v804_v30 = vmax.f32 %v769_v7, 0.0  ;;  %v5153_v25 = vld [vmem:[%s6288_s2] ss:$0 sm:$0xff] }
 0x11e   : > { %6373 = vst [vmem:[#allocation25_spill] sm:$0xff] %v5126_v12  ;;  %v5132_v10 = vld [vmem:[#allocation2 + $0x62] sm:$0x1f]  ;;  %v5134_v40 = vld [vmem:[#allocation2 + $0x5c] sm:$0x1f]  ;;  %v5139_v28 = vsel %vm1399_vm8, %v6375_v9, %v2237_v50  ;;  %v1237_v19 = vpop.f32.mrf.mxu3  ;;  %v590_v8 = vmax.f32 %v555_v29, 0.0  ;;  %v1061_v50 = vmax.f32 %v825_v54, %v1039_v58  ;;  %v558_v54 = vadd.f32 %v5153_v25, %v557_v48 }
 0x11f   : > { %6376 = vst [vmem:[#allocation26_spill] sm:$0xff] %v5139_v28  ;;  %v1445_v55 = vrot.slane %v5132_v10, 5  ;;  %v1713_v2 = vrot.slane %v5134_v40, 5  ;;  %v6325_v51 = vrot.slane %v5132_v10, 3  ;;  %v6327_v42 = vrot.slane %v5134_v40, 3 }
 0x120   : > { %6377 = vst [vmem:[#allocation27_spill] sm:$0xff] %v5142_v47  ;;  %v6379_v27 = vrot.slane %v5029_v14, 2  ;;  %v5164_v29 = vld [vmem:[#allocation2 + $0x63] sm:$0x1f]  ;;  %v771_v9 = vpop.f32.mrf.mxu1  ;;  %v2522_v48 = vrot.slane %v5132_v10, 7  ;;  %v826_v47 = vmax.f32 %v590_v8, %v804_v30 }
 0x121   : > { %1319 = vst.msk [vmem:[#allocation2 + $0x68] sm:$0xff] %vm1305_vm6, %v1296_v17  ;;  %v1238_v17 = vadd.f32 %v5153_v25, %v1237_v19  ;;  %v5157_v60 = vsel %vm1399_vm8, %v1443_v41, %v1445_v55  ;;  %v5175_v41 = vsel %vm1090_vm4, %v5079_v21, %v6325_v51  ;;  %v5181_v58 = vsel %vm1090_vm4, %v5029_v14, %v6327_v42 }
 0x122   : > { %6378 = vst [vmem:[#allocation28_spill] sm:$0xff] %v5157_v60  ;;  %v5162_v7 = vsel %vm1399_vm8, %v6379_v27, %v1713_v2  ;;  %3902 = vmatmul.msk.f32.gmra.mxu0 %vm1305_vm6, %v5157_v60  ;;  %v2220_v55 = vrot.slane %v5134_v40, 2  ;;  %v1040_v2 = vmax.f32 %v1005_v61, 0.0  ;;  %v2054_v27 = vrot.slane %v5132_v10, 2 }
 0x123   : > { %6380 = vst [vmem:[#allocation29_spill] sm:$0xff] %v5162_v7  ;;  %3932 = vmatmul.msk.f32.gmra.mxu2 %vm1305_vm6, %v5162_v7  ;;  %v1275_v19 = vmax.f32 %v1238_v17, 0.0  ;;  %v1007_v7 = vpop.f32.mrf.mxu2  ;;  %v2657_v51 = vrot.slane %v5134_v40, 7  ;;  %v2675_v60 = vrot.slane %v5164_v29, 5  ;;  %v772_v28 = vadd.f32 %v5153_v25, %v771_v9  ;;  %v560_v12 = vpop.f32.mrf.mxu0 }
 0x124   : > { %v5188_v21 = vsel %vm854_vm2, %v5063_v53, %v2220_v55  ;;  %v5194_v61 = vsel %vm854_vm2, %v2076_v49, %v2054_v27  ;;  %v2534_v30 = vsel %vm488_vm0, %v2520_v31, %v2522_v48  ;;  %v6383_v53 = vrot.slane %v5029_v14, 4 }
 0x125   : > { %6381 = vst [vmem:[#allocation30_spill] sm:$0xff] %v5188_v21  ;;  %v1297_v42 = vmax.f32 %v1061_v50, %v1275_v19  ;;  %v5205_v21 = vsel %vm1399_vm8, %v2673_v13, %v2675_v60  ;;  %v591_v49 = vmax.f32 %v558_v54, 0.0  ;;  %v1062_v9 = vmax.f32 %v826_v47, %v1040_v2 }
 0x126   : > { %6382 = vst [vmem:[#allocation31_spill] sm:$0xff] %v5194_v61  ;;  %v2681_v8 = vsel %vm488_vm0, %v6383_v53, %v2657_v51  ;;  %v1240_v19 = vpop.f32.mrf.mxu3  ;;  %v805_v48 = vmax.f32 %v772_v28, 0.0  ;;  %v1008_v14 = vadd.f32 %v5153_v25, %v1007_v7  ;;  %v6385_v13 = vrot.slane %v5084_v62, 2 }
 0x127   : > { %6384 = vst [vmem:[#allocation32_spill] sm:$0xff] %v5205_v21  ;;  %v1241_v51 = vadd.f32 %v5153_v25, %v1240_v19  ;;  %v561_v53 = vadd.f32 %v5153_v25, %v560_v12 }
 0x128   : > { %v5196_v17 = vld [vmem:[#allocation2 + $0x68] sm:$0x1f]  ;;  %1320 = vst.msk [vmem:[#allocation2 + $0x70] sm:$0xff] %vm1305_vm6, %v1297_v42  ;;  %v774_v60 = vpop.f32.mrf.mxu1  ;;  %v827_v19 = vmax.f32 %v591_v49, %v805_v48  ;;  %v3957_v49 = vld [vmem:[%s6289_s3 + $0x40] sm:$0xff] }
 0x129   : > { %v5198_v20 = vld [vmem:[#allocation2 + $0x69] sm:$0x1f]  ;;  %v1889_v50 = vrot.slane %v5196_v17, 5  ;;  %v6329_v61 = vrot.slane %v5196_v17, 2  ;;  %v1276_v7 = vmax.f32 %v1241_v51, 0.0  ;;  %2155 = vmatpush.msra.mxu0 %v3957_v49  ;;  %v6396_v3 = vrot.slane %v5196_v17, 2 }
 0x12a   : > { %v2222_v6 = vrot.slane %v5198_v20, 5  ;;  %v6328_v31 = vrot.slane %v5198_v20, 3  ;;  %v6331_v62 = vrot.slane %v5198_v20, 2 }
 0x12b   : > { %v1912_v42 = vsel %vm1399_vm8, %v6385_v13, %v1889_v50  ;;  %v5222_v47 = vsel %vm854_vm2, %v5115_v34, %v6329_v61  ;;  %v1010_v2 = vpop.f32.mrf.mxu2  ;;  %v1041_v50 = vmax.f32 %v1008_v14, 0.0  ;;  %v563_v61 = vpop.f32.mrf.mxu0 }
 0x12c   : > { %3948 = vmatmul.msk.f32.gmra.mxu3 %vm1305_vm6, %v1912_v42  ;;  %6386 = vst [vmem:[#allocation33_spill] sm:$0xff] %v5222_v47  ;;  %v5225_v54 = vsel %vm1399_vm8, %v2220_v55, %v2222_v6  ;;  %v5231_v28 = vsel %vm1090_vm4, %v5134_v40, %v6328_v31  ;;  %v5238_v34 = vsel %vm854_vm2, %v2681_v8, %v6331_v62  ;;  %v592_v31 = vmax.f32 %v561_v53, 0.0 }
 0x12d   : > { %6387 = vst [vmem:[#allocation34_spill] sm:$0xff] %v5225_v54  ;;  %v1298_v6 = vmax.f32 %v1062_v9, %v1276_v7  ;;  %v775_v55 = vadd.f32 %v5153_v25, %v774_v60  ;;  %v1011_v14 = vadd.f32 %v5153_v25, %v1010_v2  ;;  %v1063_v9 = vmax.f32 %v827_v19, %v1041_v50 }
 0x12e   : > { %6388 = vst [vmem:[#allocation35_spill] sm:$0xff] %v5231_v28  ;;  %v1243_v51 = vpop.f32.mrf.mxu3  ;;  %v564_v50 = vadd.f32 %v5153_v25, %v563_v61 }
 0x12f   : > { %6389 = vst [vmem:[#allocation36_spill] sm:$0xff] %v5238_v34  ;;  %v5241_v13 = vld [vmem:[#allocation2 + $0x6f] sm:$0x1f]  ;;  %v806_v8 = vmax.f32 %v775_v55, 0.0  ;;  %v1244_v60 = vadd.f32 %v5153_v25, %v1243_v51  ;;  %v1042_v49 = vmax.f32 %v1011_v14, 0.0 }
 0x130   : > { %1321 = vst.msk [vmem:[#allocation2 + $0x78] sm:$0xff] %vm1305_vm6, %v1298_v6  ;;  %v5244_v42 = vld [vmem:[#allocation2 + $0x70] sm:$0x1f]  ;;  %v6330_v12 = vrot.slane %v5241_v13, 2  ;;  %v2056_v21 = vrot.slane %v5241_v13, 5  ;;  %v777_v48 = vpop.f32.mrf.mxu1  ;;  %v593_v34 = vmax.f32 %v564_v50, 0.0 }
 0x131   : > { %v6332_v6 = vrot.slane %v5244_v42, 3  ;;  %v1277_v2 = vmax.f32 %v1244_v60, 0.0  ;;  %v778_v55 = vadd.f32 %v5153_v25, %v777_v48 }
 0x132   : > { %v5256_v7 = vsel %vm854_vm2, %v2534_v30, %v6330_v12  ;;  %v5259_v53 = vsel %vm1399_vm8, %v2054_v27, %v2056_v21  ;;  %v828_v12 = vmax.f32 %v592_v31, %v806_v8  ;;  %v1374_v27 = vrot.slane %v4667_v23, 6 }
 0x133   : > { %6390 = vst [vmem:[#allocation37_spill] sm:$0xff] %v5256_v7  ;;  %v1013_v19 = vpop.f32.mrf.mxu2  ;;  %v5268_v51 = vsel %vm1090_vm4, %v5164_v29, %v6332_v6  ;;  %v1299_v30 = vmax.f32 %v1063_v9, %v1277_v2  ;;  %v807_v28 = vmax.f32 %v778_v55, 0.0 }
 0x134   : > { %6391 = vst [vmem:[#allocation38_spill] sm:$0xff] %v5259_v53  ;;  %v1014_v61 = vadd.f32 %v5153_v25, %v1013_v19  ;;  %v1064_v8 = vmax.f32 %v828_v12, %v1042_v49  ;;  %v5295_v53 = vld [vmem:[#allocation2 + $0x15] sm:$0x1f] }
 0x135   : > { %6392 = vst [vmem:[#allocation39_spill] sm:$0xff] %v5268_v51  ;;  %v1690_v51 = vld [vmem:[#allocation2 + $0x8] sm:$0x1f]  ;;  %v829_v54 = vmax.f32 %v593_v34, %v807_v28 }
 0x136   : > { %1322 = vst.msk [vmem:[#allocation2 + $0x80] sm:$0xff] %vm1305_vm6, %v1299_v30  ;;  %v1246_v6 = vpop.f32.mrf.mxu3  ;;  %v1043_v30 = vmax.f32 %v1014_v61, 0.0  ;;  %v1718_v7 = vrot.slane %v1690_v51, 6  ;;  %v6398_v61 = vrot.slane %v5198_v20, 2 }
 0x137   : > { %v1338_v21 = vld [vmem:[#allocation2 + $0x75] sm:$0x1f]  ;;  %v1247_v9 = vadd.f32 %v5153_v25, %v1246_v6  ;;  %v6395_v6 = vrot.slane %v4661_v18, 1 }
 0x138   : > { %v5271_v62 = vld [vmem:[#allocation2 + $0x76] sm:$0x1f]  ;;  %v1371_v60 = vrot.slane %v1338_v21, 3  ;;  %v2390_v14 = vrot.slane %v1338_v21, 5  ;;  %v780_v50 = vpop.f32.mrf.mxu1 }
 0x139   : > { %v5276_v48 = vrot.slane %v5271_v62, 3  ;;  %v2088_v31 = vrot.slane %v5271_v62, 6  ;;  %v2661_v23 = vrot.slane %v5271_v62, 5  ;;  %v1278_v12 = vmax.f32 %v1247_v9, 0.0 }
 0x13a   : > { %v1401_v2 = vsel %vm1090_vm4, %v5196_v17, %v1371_v60  ;;  %v1402_v55 = vsel %vm1392_vm5, %v1371_v60, %v1374_v27  ;;  %v781_v34 = vadd.f32 %v5153_v25, %v780_v50 }
 0x13b   : > { %6393 = vst [vmem:[#allocation40_spill] sm:$0xff] %v5276_v48  ;;  %v5286_v19 = vsel %vm1090_vm4, %v5198_v20, %v5276_v48  ;;  %3917 = vmatmul.msk.f32.gmra.mxu1 %vm1305_vm6, %v1401_v2  ;;  %v1403_v49 = vsel %vm618_vm3, %v1402_v55, %v6395_v6  ;;  %v1016_v47 = vpop.f32.mrf.mxu2  ;;  %v5300_v2 = vsel %vm1399_vm8, %v6396_v3, %v2390_v14  ;;  %v1721_v3 = vrot.slane %v5295_v53, 1 }
 0x13c   : > { %6394 = vst [vmem:[#allocation41_spill] sm:$0xff] %v5286_v19  ;;  %3933 = vmatmul.msk.f32.gmra.mxu2 %vm1305_vm6, %v5286_v19  ;;  %v6397_v19 = vrot.slane %v5198_v20, 3  ;;  %v5310_v60 = vsel %vm1399_vm8, %v6398_v61, %v2661_v23  ;;  %v1300_v9 = vmax.f32 %v1064_v8, %v1278_v12  ;;  %v1743_v28 = vsel %vm1392_vm5, %v5276_v48, %v1718_v7 }
 0x13d   : > { %6399 = vst [vmem:[#allocation42_spill] sm:$0xff] %v5310_v60  ;;  %v5315_v17 = vld [vmem:[#allocation2 + $0x7c] sm:$0x1f]  ;;  %v5318_v51 = vld [vmem:[#allocation2 + $0x82] sm:$0x1f]  ;;  %v567_v14 = vadd.f32 %v5153_v25, %v4512_v43  ;;  %v1744_v55 = vsel %vm618_vm3, %v1743_v28, %v1721_v3  ;;  %v2226_v12 = vrot.slane %v5295_v53, 6 }
 0x13e   : > { %v5305_v27 = vsel %vm1392_vm5, %v6397_v19, %v2088_v31  ;;  %v1450_v31 = vrot.slane %v4645_v0, 6  ;;  %1323 = vst.msk [vmem:[#allocation2 + $0x88] sm:$0xff] %vm1305_vm6, %v1300_v9  ;;  %v1447_v23 = vrot.slane %v5315_v17, 3  ;;  %v1892_v8 = vrot.slane %v5318_v51, 3  ;;  %v5326_v7 = vld [vmem:[#allocation2 + $0x83] sm:$0x1f]  ;;  %v1249_v50 = vpop.f32.mrf.mxu3 }
 0x13f   : > { %v1065_v19 = vmax.f32 %v829_v54, %v1043_v30  ;;  %v1894_v6 = vrot.slane %v4661_v18, 6  ;;  %v1250_v43 = vadd.f32 %v5153_v25, %v1249_v50  ;;  %v6335_v9 = vrot.slane %v5326_v7, 3 }
 0x140   : > { %v5334_v0 = vsel %vm1090_vm4, %v5241_v13, %v1447_v23  ;;  %v1913_v61 = vsel %vm1090_vm4, %v1338_v21, %v1892_v8  ;;  %v808_v60 = vmax.f32 %v781_v34, 0.0  ;;  %v783_v48 = vpop.f32.mrf.mxu1  ;;  %v1475_v54 = vsel %vm1392_vm5, %v1447_v23, %v1450_v31  ;;  %v5353_v31 = vld [vmem:[#allocation2 + $0x7d] sm:$0x1f] }
 0x141   : > { %3903 = vmatmul.msk.f32.gmra.mxu0 %vm1305_vm6, %v5334_v0  ;;  %v1914_v18 = vsel %vm1392_vm5, %v1892_v8, %v1894_v6  ;;  %v2526_v53 = vrot.slane %v5315_v17, 5  ;;  %v1017_v30 = vadd.f32 %v5153_v25, %v1016_v47  ;;  %v1279_v28 = vmax.f32 %v1250_v43, 0.0  ;;  %3949 = vmatmul.msk.f32.gmra.mxu3 %vm1305_vm6, %v1913_v61 }
 0x142   : > { %v6400_v21 = vrot.slane %v4638_v57, 1  ;;  %v6401_v34 = vrot.slane %v4694_v45, 1  ;;  %v594_v8 = vmax.f32 %v567_v14, 0.0  ;;  %v6402_v50 = vrot.slane %v5241_v13, 2 }
 0x143   : > { %3918 = vmatmul.msk.f32.gmra.mxu1 %vm1305_vm6, %v1403_v49  ;;  %v1301_v6 = vmax.f32 %v1065_v19, %v1279_v28  ;;  %v2247_v57 = vsel %vm1392_vm5, %v6335_v9, %v2226_v12  ;;  %v1019_v43 = vpop.f32.mrf.mxu2  ;;  %v2255_v14 = vrot.slane %v5353_v31, 6  ;;  %v4142_v12 = vld [vmem:[#allocation2 + $0xe] sm:$0x1f] }
 0x144   : > { %3934 = vmatmul.msk.f32.gmra.mxu2 %vm1305_vm6, %v1744_v55  ;;  %v1476_v48 = vsel %vm618_vm3, %v1475_v54, %v6400_v21  ;;  %v1915_v49 = vsel %vm618_vm3, %v1914_v18, %v6401_v34  ;;  %v5358_v47 = vsel %vm1399_vm8, %v6402_v50, %v2526_v53  ;;  %v1724_v55 = vrot.slane %v4774_v56, 4 }
 0x145   : > { %v5364_v61 = vld [vmem:[#allocation2 + $0x89] sm:$0x1f]  ;;  %v6403_v54 = vrot.slane %v4774_v56, 1  ;;  %v830_v21 = vmax.f32 %v594_v8, %v808_v60  ;;  %v1044_v53 = vmax.f32 %v1017_v30, 0.0  ;;  %1324 = vst.msk [vmem:[#allocation2 + $0x90] sm:$0xff] %vm1305_vm6, %v1301_v6  ;;  %v2060_v50 = vrot.slane %v4142_v12, 6 }
 0x146   : > { %v2058_v19 = vrot.slane %v5364_v61, 3  ;;  %v5374_v28 = vld [vmem:[#allocation2 + $0x8a] sm:$0x1f]  ;;  %v1252_v34 = vpop.f32.mrf.mxu3  ;;  %v6404_v43 = vrot.slane %v5244_v42, 3  ;;  %v1745_v60 = vsel %vm1395_vm7, %v1721_v3, %v1724_v55 }
 0x147   : > { %v5369_v18 = vsel %vm618_vm3, %v2247_v57, %v6403_v54  ;;  %v2405_v57 = vrot.slane %v5364_v61, 6  ;;  %v1253_v54 = vadd.f32 %v5153_v25, %v1252_v34  ;;  %v2693_v8 = vrot.slane %v5374_v28, 6 }
 0x148   : > { %v5379_v9 = vsel %vm1392_vm5, %v6404_v43, %v2255_v14  ;;  %v2080_v30 = vsel %vm1392_vm5, %v2058_v19, %v2060_v50  ;;  %v1066_v14 = vmax.f32 %v830_v21, %v1044_v53  ;;  %v6405_v25 = vrot.slane %v4670_v26, 1 }
 0x149   : > { %3904 = vmatmul.msk.f32.gmra.mxu0 %vm1305_vm6, %v1476_v48  ;;  %v5392_v6 = vsel %vm1392_vm5, %v1447_v23, %v2405_v57  ;;  %v1280_v12 = vmax.f32 %v1253_v54, 0.0  ;;  %3950 = vmatmul.msk.f32.gmra.mxu3 %vm1305_vm6, %v1915_v49  ;;  %v2691_v48 = vrot.slane %v5353_v31, 3  ;;  %v1727_v50 = vrot.slane %v4803_v15, 7 }
 0x14a   : > { %v5399_v3 = vsel %vm618_vm3, %v2080_v30, %v6405_v25  ;;  %v1730_v23 = vrot.slane %v4935_v5, 2  ;;  %v2665_v30 = vrot.slane %v4774_v56, 6  ;;  %v4006_v25 = vld [vmem:[%s6289_s3 + $0x78] sm:$0x3] }
 0x14b   : > { %3919 = vmatmul.msk.f32.gmra.mxu1 %vm1305_vm6, %v4715_v63  ;;  %v786_v63 = vpop.f32.mrf.mxu1  ;;  %v1302_v34 = vmax.f32 %v1066_v14, %v1280_v12  ;;  %v5408_v21 = vsel %vm1090_vm4, %v5244_v42, %v2691_v48  ;;  %v5411_v49 = vsel %vm1392_vm5, %v2691_v48, %v2693_v8  ;;  %v1022_v53 = vpop.f32.mrf.mxu2  ;;  %4007 = vmatpush.msk.msrb.mxu3 %vm1392_vm5, %v4006_v25  ;;  %v1756_v48 = vrot.slane %v5353_v31, 1 }
 0x14c   : > { %3935 = vmatmul.msk.f32.gmra.mxu2 %vm1305_vm6, %v1745_v60  ;;  %v5404_v43 = vld [vmem:[#allocation2 + $0x90] sm:$0x1f]  ;;  %v1746_v60 = vsel %vm488_vm0, %v1724_v55, %v1727_v50  ;;  %v6406_v55 = vrot.slane %v4803_v15, 1  ;;  %v1412_v63 = vrot.slane %v5241_v13, 6  ;;  %v1488_v31 = vrot.slane %v5271_v62, 1 }
 0x14d   : > { %1325 = vst.msk [vmem:[#allocation2 + $0x98] sm:$0xff] %vm1305_vm6, %v1302_v34  ;;  %v6336_v54 = vrot.slane %v5404_v43, 3  ;;  %v1747_v5 = vsel %vm854_vm2, %v1746_v60, %v1730_v23  ;;  %v3973_v15 = vld [vmem:[%s6289_s3 + $0x50] sm:$0xff]  ;;  %v6407_v34 = vrot.slane %v5132_v10, 3  ;;  %v1925_v60 = vrot.slane %v5364_v61, 1 }
 0x14e   : > { %v1255_v57 = vpop.f32.mrf.mxu3 }
 0x14f   : > { %v2685_v8 = vsel %vm1392_vm5, %v6336_v54, %v2665_v30  ;;  %v1922_v57 = vrot.slane %v5315_v17, 6  ;;  %v6446_v54 = vld [vmem:[#allocation23_spill] sm:$0xff] }
 0x150   : > { %v5431_v56 = vsel %vm618_vm3, %v2685_v8, %v6406_v55  ;;  %v6415_v8 = vld [vmem:[#allocation25_spill] sm:$0xff]  ;;  %v4021_v55 = vld [vmem:[%s6289_s3 + $0x80] sm:$0xff] }
 0x151   : > { %3905 = vmatmul.msk.f32.gmra.mxu0 %vm1305_vm6, %v4692_v44  ;;  %3951 = vmatmul.msk.f32.gmra.mxu3 %vm1305_vm6, %v4822_v32  ;;  %v1733_v44 = vrot.slane %v4977_v24, 5  ;;  %v3990_v32 = vld [vmem:[%s6289_s3 + $0x68] sm:$0x3]  ;;  %v3989_v24 = vld [vmem:[%s6289_s3 + $0x60] sm:$0xff] }
 0x152   : > { %3991 = vmatpush.msk.msra.mxu2 %vm1392_vm5, %v3990_v32  ;;  %v6416_v32 = vld [vmem:[#allocation31_spill] sm:$0xff] }
 0x153   : > { %3920 = vmatmul.msk.f32.gmra.mxu1 %vm1305_vm6, %v4885_v11  ;;  %v3974_v11 = vld [vmem:[%s6289_s3 + $0x58] sm:$0x3]  ;;  %v1748_v12 = vsel %vm1399_vm8, %v1730_v23, %v1733_v44  ;;  %v5546_v44 = vpop.f32.mrf.mxu2 }
 0x154   : > { %3936 = vmatmul.msk.f32.gmra.mxu2 %vm1305_vm6, %v1747_v5  ;;  %3975 = vmatpush.msk.msrb.mxu1 %vm1392_vm5, %v3974_v11 }
 0x155   : > { %2459 = vmatpush.msra.mxu2 %v3989_v24  ;;  %v6418_v24 = vld [vmem:[#allocation37_spill] sm:$0xff] }
 0x156   : > { %v1258_v14 = vpop.f32.mrf.mxu3  ;;  %2322 = vmatpush.msrb.mxu1 %v3973_v15  ;;  %v6417_v15 = vld [vmem:[#allocation34_spill] sm:$0xff] }
 0x159   : > { %3906 = vmatmul.msk.f32.gmra.mxu0 %vm1305_vm6, %v4896_v59  ;;  %3952 = vmatmul.msk.f32.gmra.mxu3 %vm1305_vm6, %v4993_v38  ;;  %v1750_v59 = vrot.slane %v5164_v29, 3  ;;  %v4022_v29 = vld [vmem:[%s6289_s3 + $0x88] sm:$0x3] }
 0x15a   : > { %4023 = vmatpush.msk.msrb.mxu0 %vm1392_vm5, %v4022_v29  ;;  %v6419_v29 = vrot.slane %v5326_v7, 3 }
 0x15b   : > { %3921 = vmatmul.msk.f32.gmra.mxu1 %vm1305_vm6, %v4987_v22  ;;  %v4005_v22 = vld [vmem:[%s6289_s3 + $0x70] sm:$0xff]  ;;  %v1758_v38 = vsel %vm1090_vm4, %v5094_v39, %v1750_v59  ;;  %v1920_v39 = vrot.slane %v5241_v13, 3  ;;  %v1485_v13 = vrot.slane %v5198_v20, 6 }
 0x15c   : > { %3937 = vmatmul.msk.f32.gmra.mxu2 %vm1305_vm6, %v1748_v12  ;;  %2594 = vmatpush.msrb.mxu3 %v4005_v22  ;;  %v2376_v12 = vld [vmem:[#allocation2 + $0x8f] sm:$0x1f] }
 0x15d   : > { %2760 = vmatpush.msrb.mxu0 %v4021_v55  ;;  %v6435_v55 = vld [vmem:[#allocation26_spill] sm:$0xff] }
 0x15e   : > { %v5560_v25 = vpop.f32.mrf.mxu3 }
 0x161   : > { %3907 = vmatmul.msk.f32.gmra.mxu0 %vm1305_vm6, %v4938_v35  ;;  %3953 = vmatmul.msk.f32.gmra.mxu3 %vm1305_vm6, %v5112_v52  ;;  %v1415_v35 = vrot.slane %v5315_v17, 1  ;;  %v1418_v52 = vsel %vm1392_vm5, %v6407_v34, %v1412_v63  ;;  %v2246_v63 = vsel %vm1090_vm4, %v5271_v62, %v6419_v29 }
 0x163   : > { %3922 = vmatmul.msk.f32.gmra.mxu1 %vm1305_vm6, %v5175_v41  ;;  %v1753_v41 = vrot.slane %v5244_v42, 6  ;;  %v1419_v50 = vsel %vm618_vm3, %v1418_v52, %v1415_v35  ;;  %v1927_v42 = vsel %vm1090_vm4, %v5132_v10, %v1920_v39  ;;  %v1928_v10 = vsel %vm1392_vm5, %v1920_v39, %v1922_v57  ;;  %v6426_v57 = vld [vmem:[#allocation6_spill] sm:$0xff] }
 0x164   : > { %3938 = vmatmul.msk.f32.gmra.mxu2 %vm1305_vm6, %v1758_v38  ;;  %v1929_v20 = vsel %vm618_vm3, %v1928_v10, %v1925_v60  ;;  %v2393_v38 = vrot.slane %v2376_v12, 3 }
 0x165   : > { %v1759_v23 = vsel %vm1392_vm5, %v1750_v59, %v1753_v41  ;;  %v5578_v41 = vld [vmem:[#allocation2 + $0x96] sm:$0x1f] }
 0x166   : > { %v1760_v53 = vsel %vm618_vm3, %v1759_v23, %v1756_v48  ;;  %v2528_v52 = vrot.slane %v5578_v41, 3  ;;  %v6422_v23 = vld [vmem:[#allocation9_spill] sm:$0xff] }
 0x169   : > { %3908 = vmatmul.msk.f32.gmra.mxu0 %vm1305_vm6, %v5181_v58  ;;  %3954 = vmatmul.msk.f32.gmra.mxu3 %vm1305_vm6, %v1927_v42  ;;  %v6408_v58 = vrot.slane %v5134_v40, 3  ;;  %v6410_v40 = vld [vmem:[#allocation21_spill] sm:$0xff]  ;;  %v2537_v42 = vsel %vm1090_vm4, %v5364_v61, %v2528_v52  ;;  %v6425_v61 = vld [vmem:[#allocation10_spill] sm:$0xff] }
 0x16b   : > { %3923 = vmatmul.msk.f32.gmra.mxu1 %vm1305_vm6, %v1419_v50  ;;  %v1491_v30 = vsel %vm1392_vm5, %v6408_v58, %v1485_v13  ;;  %v6421_v50 = vrot.slane %v4694_v45, 6  ;;  %v6427_v58 = vld [vmem:[#allocation11_spill] sm:$0xff] }
 0x16c   : > { %3939 = vmatmul.msk.f32.gmra.mxu2 %vm1305_vm6, %v1760_v53  ;;  %v1492_v5 = vsel %vm618_vm3, %v1491_v30, %v1488_v31  ;;  %v5562_v59 = vpop.f32.mrf.mxu2 }
 0x171   : > { %3909 = vmatmul.msk.f32.gmra.mxu0 %vm1305_vm6, %v1492_v5  ;;  %3955 = vmatmul.msk.f32.gmra.mxu3 %vm1305_vm6, %v1929_v20  ;;  %v6430_v20 = vld [vmem:[#allocation17_spill] sm:$0xff] }
 0x173   : > { %3924 = vmatmul.msk.f32.gmra.mxu1 %vm1305_vm6, %v1415_v35  ;;  %v6420_v35 = vld [vmem:[#allocation38_spill] sm:$0xff] }
 0x174   : > { %3940 = vmatmul.msk.f32.gmra.mxu2 %vm1305_vm6, %v1756_v48 }
 0x179   : > { %3910 = vmatmul.msk.f32.gmra.mxu0 %vm1305_vm6, %v1488_v31  ;;  %3956 = vmatmul.msk.f32.gmra.mxu3 %vm1305_vm6, %v1925_v60 }
 0x17b   : > { %3976 = vmatmul.msk.f32.vlgmr.msrb.gmra.mxu1 %vm1305_vm6, %v4700_v46  ;;  %v6409_v46 = vld [vmem:[#allocation13_spill] sm:$0xff] }
 0x17c   : > { %3992 = vmatmul.msk.f32.vlgmr.msra.gmra.mxu2 %vm1305_vm6, %v4756_v4  ;;  %v6411_v4 = vld [vmem:[#allocation14_spill] sm:$0xff]  ;;  %v5582_v39 = vpop.f32.mrf.mxu3  ;;  %v5584_v62 = vpop.f32.mrf.mxu2 }
 0x181   : > { %3960 = vmatmul.msk.f32.vlgmr.msra.gmra.mxu0 %vm1305_vm6, %v4721_v1  ;;  %4008 = vmatmul.msk.f32.vlgmr.msrb.gmra.mxu3 %vm1305_vm6, %v4828_v36  ;;  %v5531_v1 = vpop.f32.mrf.mxu1  ;;  %v6413_v36 = vld [vmem:[#allocation30_spill] sm:$0xff] }
 0x183   : > { %3977 = vmatmul.msk.f32.gmra.mxu1 %vm1305_vm6, %v4912_v37  ;;  %v5533_v37 = vpop.f32.mrf.mxu0 }
 0x184   : > { %3993 = vmatmul.msk.f32.gmra.mxu2 %vm1305_vm6, %v4951_v33  ;;  %v6412_v33 = vld [vmem:[#allocation16_spill] sm:$0xff] }
 0x189   : > { %3961 = vmatmul.msk.f32.gmra.mxu0 %vm1305_vm6, %v4920_v16  ;;  %4009 = vmatmul.msk.f32.gmra.mxu3 %vm1305_vm6, %v6411_v4  ;;  %v6414_v16 = vld [vmem:[#allocation33_spill] sm:$0xff]  ;;  %v5548_v14 = vpop.f32.mrf.mxu1 }
 0x18b   : > { %3978 = vmatmul.msk.f32.gmra.mxu1 %vm1305_vm6, %v6409_v46  ;;  %v5550_v11 = vpop.f32.mrf.mxu0  ;;  %v6431_v46 = vld [vmem:[#allocation24_spill] sm:$0xff] }
 0x18c   : > { %3994 = vmatmul.msk.f32.gmra.mxu2 %vm1305_vm6, %v6410_v40  ;;  %v6432_v40 = vld [vmem:[#allocation12_spill] sm:$0xff] }
 0x191   : > { %3962 = vmatmul.msk.f32.gmra.mxu0 %vm1305_vm6, %v6412_v33  ;;  %4010 = vmatmul.msk.f32.gmra.mxu3 %vm1305_vm6, %v6415_v8  ;;  %v5564_v22 = vpop.f32.mrf.mxu1  ;;  %v6434_v8 = vld [vmem:[#allocation15_spill] sm:$0xff] }
 0x193   : > { %3979 = vmatmul.msk.f32.gmra.mxu1 %vm1305_vm6, %v6413_v36  ;;  %v5580_v48 = vpop.f32.mrf.mxu0 }
 0x194   : > { %3995 = vmatmul.msk.f32.gmra.mxu2 %vm1305_vm6, %v6414_v16  ;;  %v5605_v45 = vpop.f32.mrf.mxu2 }
 0x199   : > { %3963 = vmatmul.msk.f32.gmra.mxu0 %vm1305_vm6, %v6416_v32  ;;  %4011 = vmatmul.msk.f32.gmra.mxu3 %vm1305_vm6, %v6418_v24  ;;  %v5586_v34 = vpop.f32.mrf.mxu1  ;;  %v6436_v32 = vld [vmem:[#allocation28_spill] sm:$0xff] }
 0x19b   : > { %3980 = vmatmul.msk.f32.gmra.mxu1 %vm1305_vm6, %v6417_v15  ;;  %v5607_v13 = vpop.f32.mrf.mxu0  ;;  %v6437_v15 = vld [vmem:[#allocation20_spill] sm:$0xff] }
 0x19c   : > { %3996 = vmatmul.msk.f32.gmra.mxu2 %vm1305_vm6, %v5300_v2  ;;  %v2402_v2 = vsel %vm1090_vm4, %v5318_v51, %v2393_v38  ;;  %v2403_v51 = vsel %vm1392_vm5, %v2393_v38, %v6421_v50 }
 0x19d   : > { %v2404_v53 = vsel %vm618_vm3, %v2403_v51, %v6422_v23 }
 0x1a1   : > { %3964 = vmatmul.msk.f32.gmra.mxu0 %vm1305_vm6, %v6420_v35  ;;  %4012 = vmatmul.msk.f32.gmra.mxu3 %vm1305_vm6, %v5358_v47  ;;  %v2079_v47 = vsel %vm1090_vm4, %v5315_v17, %v2058_v19  ;;  %v5609_v17 = vpop.f32.mrf.mxu3  ;;  %v5611_v19 = vpop.f32.mrf.mxu1  ;;  %v6439_v35 = vld [vmem:[#allocation39_spill] sm:$0xff] }
 0x1a2   : > { %6423 = vst [vmem:[#allocation13_spill] sm:$0xff] %v5611_v19 }
 0x1a3   : > { %3981 = vmatmul.msk.f32.gmra.mxu1 %vm1305_vm6, %v2246_v63  ;;  %v6438_v63 = vld [vmem:[#allocation22_spill] sm:$0xff] }
 0x1a4   : > { %3997 = vmatmul.msk.f32.gmra.mxu2 %vm1305_vm6, %v2402_v2  ;;  %v6440_v2 = vld [vmem:[#allocation29_spill] sm:$0xff] }
 0x1a6   : > { %v5625_v30 = vpop.f32.mrf.mxu2 }
 0x1a7   : > { %6428 = vst [vmem:[#allocation21_spill] sm:$0xff] %v5625_v30 }
 0x1a9   : > { %3965 = vmatmul.msk.f32.gmra.mxu0 %vm1305_vm6, %v2079_v47  ;;  %4013 = vmatmul.msk.f32.gmra.mxu3 %vm1305_vm6, %v2537_v42  ;;  %v5627_v5 = vpop.f32.mrf.mxu3  ;;  %v2408_v47 = vrot.slane %v5578_v41, 1  ;;  %v2091_v41 = vrot.slane %v5326_v7, 1 }
 0x1ab   : > { %3982 = vmatmul.msk.f32.gmra.mxu1 %vm1305_vm6, %v5369_v18  ;;  %v6424_v18 = vrot.slane %v4670_v26, 6  ;;  %v5629_v26 = vpop.f32.mrf.mxu0 }
 0x1ac   : > { %3998 = vmatmul.msk.f32.gmra.mxu2 %vm1305_vm6, %v2404_v53 }
 0x1ad   : > { %v2538_v31 = vsel %vm1392_vm5, %v2528_v52, %v6424_v18  ;;  %v2258_v52 = vrot.slane %v5374_v28, 1  ;;  %v6441_v18 = vld [vmem:[#allocation35_spill] sm:$0xff]  ;;  %v6442_v28 = vld [vmem:[#allocation41_spill] sm:$0xff] }
 0x1ae   : > { %v2539_v60 = vsel %vm618_vm3, %v2538_v31, %v6426_v57  ;;  %v2540_v31 = vrot.slane %v5326_v7, 6  ;;  %v2543_v57 = vrot.slane %v5404_v43, 1 }
 0x1af   : > { %v2262_v42 = vsel %vm618_vm3, %v5379_v9, %v2258_v52 }
 0x1b1   : > { %3966 = vmatmul.msk.f32.gmra.mxu0 %vm1305_vm6, %v5399_v3  ;;  %4014 = vmatmul.msk.f32.gmra.mxu3 %vm1305_vm6, %v2539_v60  ;;  %v6429_v3 = vld [vmem:[#allocation7_spill] sm:$0xff]  ;;  %v5643_v33 = vpop.f32.mrf.mxu3 }
 0x1b2   : > { %6433 = vst [vmem:[#allocation14_spill] sm:$0xff] %v5643_v33 }
 0x1b3   : > { %3983 = vmatmul.msk.f32.gmra.mxu1 %vm1305_vm6, %v6425_v61 }
 0x1b4   : > { %3999 = vmatmul.msk.f32.gmra.mxu2 %vm1305_vm6, %v6427_v58 }
 0x1b8   : > { %v5631_v10 = vpop.f32.mrf.mxu1 }
 0x1b9   : > { %3967 = vmatmul.msk.f32.gmra.mxu0 %vm1305_vm6, %v6429_v3  ;;  %4015 = vmatmul.msk.f32.gmra.mxu3 %vm1305_vm6, %v6432_v40  ;;  %v6443_v3 = vld [vmem:[#allocation40_spill] sm:$0xff] }
 0x1bb   : > { %3984 = vmatmul.msk.f32.gmra.mxu1 %vm1305_vm6, %v6430_v20  ;;  %v2545_v20 = vsel %vm1392_vm5, %v6443_v3, %v2540_v31 }
 0x1bc   : > { %4000 = vmatmul.msk.f32.gmra.mxu2 %vm1305_vm6, %v6431_v46  ;;  %v2546_v46 = vsel %vm618_vm3, %v2545_v20, %v2543_v57 }
 0x1be   : > { %v5645_v36 = vpop.f32.mrf.mxu0 }
 0x1bf   : > { %v5641_v4 = vpop.f32.mrf.mxu2 }
 0x1c0   : > { %v5647_v16 = vpop.f32.mrf.mxu1 }
 0x1c1   : > { %3968 = vmatmul.msk.f32.gmra.mxu0 %vm1305_vm6, %v6434_v8  ;;  %4016 = vmatmul.msk.f32.gmra.mxu3 %vm1305_vm6, %v6437_v15 }
 0x1c3   : > { %3985 = vmatmul.msk.f32.gmra.mxu1 %vm1305_vm6, %v6435_v55 }
 0x1c4   : > { %4001 = vmatmul.msk.f32.gmra.mxu2 %vm1305_vm6, %v6436_v32  ;;  %v5659_v12 = vpop.f32.mrf.mxu3 }
 0x1c6   : > { %v5661_v38 = vpop.f32.mrf.mxu0 }
 0x1c7   : > { %v5657_v24 = vpop.f32.mrf.mxu2 }
 0x1c8   : > { %v5663_v29 = vpop.f32.mrf.mxu1 }
 0x1c9   : > { %3969 = vmatmul.msk.f32.gmra.mxu0 %vm1305_vm6, %v6438_v63  ;;  %4017 = vmatmul.msk.f32.gmra.mxu3 %vm1305_vm6, %v6440_v2  ;;  %v6444_v2 = vld [vmem:[#allocation8_spill] sm:$0xff] }
 0x1cb   : > { %3986 = vmatmul.msk.f32.gmra.mxu1 %vm1305_vm6, %v6439_v35 }
 0x1cc   : > { %4002 = vmatmul.msk.f32.gmra.mxu2 %vm1305_vm6, %v5334_v0  ;;  %v5676_v51 = vpop.f32.mrf.mxu3  ;;  %v2411_v0 = vsel %vm618_vm3, %v5392_v6, %v2408_v47  ;;  %v2095_v6 = vsel %vm618_vm3, %v5305_v27, %v2091_v41 }
 0x1ce   : > { %v5679_v23 = vpop.f32.mrf.mxu0 }
 0x1cf   : > { %v5674_v50 = vpop.f32.mrf.mxu2 }
 0x1d0   : > { %v5681_v53 = vpop.f32.mrf.mxu1 }
 0x1d1   : > { %3970 = vmatmul.msk.f32.gmra.mxu0 %vm1305_vm6, %v6441_v18  ;;  %4018 = vmatmul.msk.f32.gmra.mxu3 %vm1305_vm6, %v6442_v28  ;;  %v6445_v28 = vld [vmem:[#allocation18_spill] sm:$0xff] }
 0x1d3   : > { %3987 = vmatmul.msk.f32.gmra.mxu1 %vm1305_vm6, %v2262_v42 }
 0x1d4   : > { %4003 = vmatmul.msk.f32.gmra.mxu2 %vm1305_vm6, %v2411_v0  ;;  %v5697_v9 = vpop.f32.mrf.mxu3 }
 0x1d6   : > { %v5700_v60 = vpop.f32.mrf.mxu0 }
 0x1d7   : > { %v5695_v61 = vpop.f32.mrf.mxu2 }
 0x1d8   : > { %v5702_v58 = vpop.f32.mrf.mxu1 }
 0x1d9   : > { %3971 = vmatmul.msk.f32.gmra.mxu0 %vm1305_vm6, %v2095_v6  ;;  %4019 = vmatmul.msk.f32.gmra.mxu3 %vm1305_vm6, %v2546_v46  ;;  %v1652_v46 = vadd.f32 %v5531_v1, %v5533_v37  ;;  %v6447_v37 = vld [vmem:[#allocation36_spill] sm:$0xff] }
 0x1db   : > { %3988 = vmatmul.msk.f32.gmra.mxu1 %vm1305_vm6, %v2258_v52 }
 0x1dc   : > { %4004 = vmatmul.msk.f32.gmra.mxu2 %vm1305_vm6, %v2408_v47  ;;  %v5715_v8 = vpop.f32.mrf.mxu3 }
 0x1de   : > { %v5717_v55 = vpop.f32.mrf.mxu0 }
 0x1df   : > { %v5713_v40 = vpop.f32.mrf.mxu2 }
 0x1e0   : > { %v5719_v27 = vpop.f32.mrf.mxu1 }
 0x1e1   : > { %3972 = vmatmul.msk.f32.gmra.mxu0 %vm1305_vm6, %v2091_v41  ;;  %4020 = vmatmul.msk.f32.gmra.mxu3 %vm1305_vm6, %v2543_v57 }
 0x1e4   : > { %v5725_v15 = vpop.f32.mrf.mxu3 }
 0x1e6   : > { %v5727_v63 = vpop.f32.mrf.mxu0 }
 0x1e7   : > { %v5723_v32 = vpop.f32.mrf.mxu2 }
 0x1e8   : > { %v1684_v35 = vpop.f32.mrf.mxu1 }
 0x1e9   : > { %4024 = vmatmul.msk.f32.vlgmr.msrb.gmra.mxu0 %vm1305_vm6, %v6444_v2 }
 0x1ec   : > { %v5731_v47 = vpop.f32.mrf.mxu3 }
 0x1ee   : > { %v1587_v42 = vpop.f32.mrf.mxu0 }
 0x1ef   : > { %v1855_v52 = vpop.f32.mrf.mxu2  ;;  %v1685_v0 = vadd.f32 %v1684_v35, %v1587_v42  ;;  %v1861_v35 = vadd.f32 %v5546_v44, %v1652_v46 }
 0x1f0   : > { %v1687_v18 = vpop.f32.mrf.mxu1 }
 0x1f1   : > { %4025 = vmatmul.msk.f32.gmra.mxu0 %vm1305_vm6, %v6445_v28  ;;  %v1872_v41 = vadd.f32 %v1855_v52, %v1685_v0  ;;  %v2030_v42 = vadd.f32 %v5560_v25, %v1861_v35  ;;  %v6448_v35 = vld [vmem:[#allocation42_spill] sm:$0xff] }
 0x1f4   : > { %v2024_v57 = vpop.f32.mrf.mxu3 }
 0x1f5   : > { %v5735_v6 = vadd.f32 %v2024_v57, %v1872_v41  ;;  %v1655_v57 = vadd.f32 %v5548_v14, %v5550_v11 }
 0x1f6   : > { %v1590_v3 = vpop.f32.mrf.mxu0 }
 0x1f7   : > { %v1858_v31 = vpop.f32.mrf.mxu2  ;;  %v1688_v2 = vadd.f32 %v1687_v18, %v1590_v3 }
 0x1f8   : > { %v2324_v20 = vpop.f32.mrf.mxu1 }
 0x1f9   : > { %4026 = vmatmul.msk.f32.gmra.mxu0 %vm1305_vm6, %v6446_v54  ;;  %v1873_v33 = vadd.f32 %v1858_v31, %v1688_v2  ;;  %v1862_v54 = vadd.f32 %v5562_v59, %v1655_v57 }
 0x1fb   : > { %v2031_v44 = vadd.f32 %v5582_v39, %v1862_v54  ;;  %v1661_v39 = vadd.f32 %v5586_v34, %v5607_v13 }
 0x1fc   : > { %v2027_v28 = vpop.f32.mrf.mxu3 }
 0x1fd   : > { %v5743_v0 = vadd.f32 %v2027_v28, %v1873_v33  ;;  %v6449_v28 = vrot.slane %v5404_v43, 3 }
 0x1fe   : > { %v2157_v41 = vpop.f32.mrf.mxu0 }
 0x1ff   : > { %v2461_v52 = vpop.f32.mrf.mxu2  ;;  %v2196_v30 = vadd.f32 %v2157_v41, %v2030_v42 }
 0x200   : > { %v2327_v19 = vpop.f32.mrf.mxu1 }
 0x201   : > { %v2363_v1 = vadd.f32 %v2324_v20, %v2196_v30  ;;  %4027 = vmatmul.msk.f32.gmra.mxu0 %vm1305_vm6, %v6447_v37 }
 0x203   : > { %v2500_v18 = vadd.f32 %v2461_v52, %v2363_v1  ;;  %v1864_v52 = vadd.f32 %v5605_v45, %v1661_v39  ;;  %v1667_v45 = vadd.f32 %v5631_v10, %v5645_v36  ;;  %v6451_v39 = vld [vmem:[#allocation27_spill] sm:$0xff] }
 0x204   : > { %v2596_v31 = vpop.f32.mrf.mxu3 }
 0x205   : > { %v5751_v3 = vadd.f32 %v2596_v31, %v2500_v18  ;;  %v2033_v57 = vadd.f32 %v5627_v5, %v1864_v52  ;;  %v6450_v31 = vld [vmem:[#allocation19_spill] sm:$0xff] }
 0x206   : > { %v2160_v33 = vpop.f32.mrf.mxu0 }
 0x207   : > { %v2464_v25 = vpop.f32.mrf.mxu2  ;;  %v2197_v46 = vadd.f32 %v2160_v33, %v2031_v44  ;;  %v1866_v33 = vadd.f32 %v5641_v4, %v1667_v45 }
 0x208   : > { %v5755_v14 = vpop.f32.mrf.mxu1 }
 0x209   : > { %v2364_v2 = vadd.f32 %v2327_v19, %v2197_v46  ;;  %4028 = vmatmul.msk.f32.gmra.mxu0 %vm1305_vm6, %v6448_v35  ;;  %v2684_v19 = vsel %vm1090_vm4, %v5326_v7, %v6449_v28  ;;  %v2035_v46 = vadd.f32 %v5659_v12, %v1866_v33  ;;  %v2648_v12 = vld [vmem:[#allocation2 + $0x97] sm:$0x1f] }
 0x20b   : > { %v2501_v11 = vadd.f32 %v2464_v25, %v2364_v2 }
 0x20c   : > { %v2599_v20 = vpop.f32.mrf.mxu3 }
 0x20d   : > { %v5759_v59 = vadd.f32 %v2599_v20, %v2501_v11 }
 0x20e   : > { %v5761_v42 = vpop.f32.mrf.mxu0 }
 0x20f   : > { %v5757_v30 = vpop.f32.mrf.mxu2 }
 0x210   : > { %v2333_v41 = vpop.f32.mrf.mxu1 }
 0x211   : > { %4029 = vmatmul.msk.f32.gmra.mxu0 %vm1305_vm6, %v2684_v19 }
 0x214   : > { %v5772_v1 = vpop.f32.mrf.mxu3 }
 0x216   : > { %v2166_v54 = vpop.f32.mrf.mxu0 }
 0x217   : > { %v2470_v37 = vpop.f32.mrf.mxu2  ;;  %v2199_v18 = vadd.f32 %v2166_v54, %v2033_v57  ;;  %v2696_v57 = vrot.slane %v2648_v12, 1  ;;  %v2964_v54 = vld [vmem:[%s6291_s5 + $0x24] sm:$0xf] }
 0x218   : > { %v5776_v13 = vpop.f32.mrf.mxu1  ;;  %4039 = vmatpush.msk.msrb.mxu2 %vm1395_vm7, %v2964_v54 }
 0x219   : > { %v2366_v44 = vadd.f32 %v2333_v41, %v2199_v18  ;;  %4030 = vmatmul.msk.f32.gmra.mxu0 %vm1305_vm6, %v5431_v56  ;;  %v6452_v41 = vld [vmem:[#allocation32_spill] sm:$0xff]  ;;  %v2700_v18 = vsel %vm618_vm3, %v5411_v49, %v2696_v57 }
 0x21b   : > { %v2503_v43 = vadd.f32 %v2470_v37, %v2366_v44  ;;  %v2933_v44 = vld [vmem:[%s6291_s5 + $0x10] sm:$0xf] }
 0x21c   : > { %v2605_v34 = vpop.f32.mrf.mxu3  ;;  %4037 = vmatpush.msk.msra.mxu1 %vm1395_vm7, %v2933_v44 }
 0x21d   : > { %v2638_v7 = vadd.f32 %v2605_v34, %v2503_v43  ;;  %v1682_v34 = vadd.f32 %v5719_v27, %v5727_v63  ;;  %v2963_v27 = vld [vmem:[%s6291_s5 + $0x1c] sm:$0xff]  ;;  %v2993_v63 = vld [vmem:[%s6291_s5 + $0x30] sm:$0xff] }
 0x21e   : > { %v5778_v25 = vpop.f32.mrf.mxu0  ;;  %2985 = vmatpush.msrb.mxu2 %v2963_v27 }
 0x21f   : > { %v5782_v5 = vpop.f32.mrf.mxu2  ;;  %v1871_v49 = vadd.f32 %v5723_v32, %v1682_v34  ;;  %v2932_v32 = vld [vmem:[%s6291_s5 + $0x8] sm:$0xff] }
 0x220   : > { %v2339_v11 = vpop.f32.mrf.mxu1  ;;  %2955 = vmatpush.msra.mxu1 %v2932_v32 }
 0x221   : > { %4031 = vmatmul.msk.f32.gmra.mxu0 %vm1305_vm6, %v6450_v31  ;;  %v2040_v45 = vadd.f32 %v5731_v47, %v1871_v49 }
 0x224   : > { %v5788_v56 = vpop.f32.mrf.mxu3 }
 0x226   : > { %v2172_v2 = vpop.f32.mrf.mxu0 }
 0x227   : > { %v2201_v35 = vadd.f32 %v2172_v2, %v2035_v46  ;;  %v2476_v28 = vpop.f32.mrf.mxu2 }
 0x229   : > { %v2368_v20 = vadd.f32 %v2339_v11, %v2201_v35  ;;  %4032 = vmatmul.msk.f32.gmra.mxu0 %vm1305_vm6, %v6451_v39 }
 0x22b   : > { %v2505_v10 = vadd.f32 %v2476_v28, %v2368_v20 }
 0x22c   : > { %v2611_v36 = vpop.f32.mrf.mxu3 }
 0x22d   : > { %v2640_v19 = vadd.f32 %v2611_v36, %v2505_v10  ;;  %v2342_v36 = vpop.f32.mrf.mxu1 }
 0x22e   : > { %v2175_v52 = vpop.f32.mrf.mxu0 }
 0x22f   : > { %v2479_v12 = vpop.f32.mrf.mxu2 }
 0x231   : > { %4033 = vmatmul.msk.f32.gmra.mxu0 %vm1305_vm6, %v6452_v41  ;;  %v1670_v41 = vadd.f32 %v5647_v16, %v5661_v38  ;;  %v2931_v16 = vld [vmem:[%s6291_s5] sm:$0xff]  ;;  %v2992_v38 = vld [vmem:[%s6291_s5 + $0x28] sm:$0xff] }
 0x232   : > { %2956 = vmatpush.msra.mxu1 %v2931_v16 }
 0x235   : > { %v2345_v44 = vpop.f32.mrf.mxu1 }
 0x236   : > { %v2178_v4 = vpop.f32.mrf.mxu0 }
 0x239   : > { %4034 = vmatmul.msk.f32.gmra.mxu0 %vm1305_vm6, %v5408_v21  ;;  %v2994_v21 = vld [vmem:[%s6291_s5 + $0x38] sm:$0xf] }
 0x23a   : > { %4041 = vmatpush.msk.msra.mxu3 %vm1395_vm7, %v2994_v21 }
 0x23c   : > { %3015 = vmatpush.msra.mxu3 %v2993_v63 }
 0x23d   : > { %v2348_v27 = vpop.f32.mrf.mxu1 }
 0x23e   : > { %v5796_v37 = vpop.f32.mrf.mxu0  ;;  %3016 = vmatpush.msra.mxu3 %v2992_v38 }
 0x241   : > { %4035 = vmatmul.msk.f32.gmra.mxu0 %vm1305_vm6, %v2700_v18  ;;  %v1867_v18 = vadd.f32 %v5657_v24, %v1670_v41 }
 0x246   : > { %v5813_v43 = vpop.f32.mrf.mxu0 }
 0x249   : > { %4036 = vmatmul.msk.f32.gmra.mxu0 %vm1305_vm6, %v2696_v57  ;;  %v2614_v57 = vpop.f32.mrf.mxu3 }
 0x24e   : > { %v2187_v31 = vpop.f32.mrf.mxu0 }
 0x24f   : > { %v5820_v33 = vadd.f32 %v2187_v31, %v2040_v45  ;;  %v1676_v31 = vadd.f32 %v5681_v53, %v5700_v60  ;;  %v1658_v53 = vadd.f32 %v5564_v22, %v5580_v48 }
 0x251   : > { %v2617_v45 = vpop.f32.mrf.mxu3 }
 0x256   : > { %v2190_v46 = vpop.f32.mrf.mxu0 }
 0x257   : > { %v5823_v2 = vadd.f32 %v2190_v46, %v5735_v6 }
 0x259   : > { %v2620_v60 = vpop.f32.mrf.mxu3 }
 0x25e   : > { %v2193_v35 = vpop.f32.mrf.mxu0 }
 0x25f   : > { %v5826_v11 = vadd.f32 %v2193_v35, %v5743_v0 }
 0x261   : > { %v2623_v38 = vpop.f32.mrf.mxu3 }
 0x266   : > { %v2762_v47 = vpop.f32.mrf.mxu0 }
 0x267   : > { %v2801_v6 = vadd.f32 %v2762_v47, %v5751_v3  ;;  %v2036_v3 = vadd.f32 %v5676_v51, %v1867_v18 }
 0x269   : > { %v2202_v21 = vadd.f32 %v2175_v52, %v2036_v3  ;;  %v1869_v52 = vadd.f32 %v5695_v61, %v1676_v31  ;;  %v5878_v61 = vld [vmem:[%s6290_s4] ss:$0 sm:$0xff] }
 0x26b   : > { %v2369_v34 = vadd.f32 %v2342_v36, %v2202_v21 }
 0x26d   : > { %v2506_v35 = vadd.f32 %v2479_v12, %v2369_v34 }
 0x26e   : > { %v2765_v0 = vpop.f32.mrf.mxu0 }
 0x26f   : > { %v5839_v20 = vadd.f32 %v2765_v0, %v5759_v59  ;;  %v1673_v59 = vadd.f32 %v5663_v29, %v5679_v23  ;;  %v2482_v29 = vpop.f32.mrf.mxu2  ;;  %v2641_v47 = vadd.f32 %v2614_v57, %v2506_v35 }
 0x271   : > { %v1868_v24 = vadd.f32 %v5674_v50, %v1673_v59  ;;  %v2038_v50 = vadd.f32 %v5715_v8, %v1869_v52  ;;  %v1863_v8 = vadd.f32 %v5584_v62, %v1658_v53 }
 0x273   : > { %v2037_v23 = vadd.f32 %v5697_v9, %v1868_v24  ;;  %v1679_v9 = vadd.f32 %v5702_v58, %v5717_v55  ;;  %v2032_v55 = vadd.f32 %v5609_v17, %v1863_v8 }
 0x275   : > { %v2203_v46 = vadd.f32 %v2178_v4, %v2037_v23  ;;  %v1870_v4 = vadd.f32 %v5713_v40, %v1679_v9  ;;  %v2198_v18 = vadd.f32 %v5761_v42, %v2032_v55 }
 0x276   : > { %v5841_v39 = vpop.f32.mrf.mxu0 }
 0x277   : > { %v2370_v32 = vadd.f32 %v2345_v44, %v2203_v46  ;;  %v2485_v0 = vpop.f32.mrf.mxu2  ;;  %v2039_v22 = vadd.f32 %v5725_v15, %v1870_v4  ;;  %v2365_v17 = vadd.f32 %v5755_v14, %v2198_v18  ;;  %v6453_v46 = vld [vmem:[#allocation13_spill] sm:$0xff] }
 0x278   : > { %v1664_v35 = vadd.f32 %v6453_v46, %v5629_v26 }
 0x279   : > { %v2205_v59 = vadd.f32 %v5813_v43, %v2039_v22  ;;  %v2502_v34 = vadd.f32 %v5757_v30, %v2365_v17 }
 0x27e   : > { %v2771_v28 = vpop.f32.mrf.mxu0 }
 0x27f   : > { %v5843_v10 = vadd.f32 %v2771_v28, %v2638_v7  ;;  %v2962_v7 = vld [vmem:[%s6291_s5 + $0x14] sm:$0xff]  ;;  %v2204_v28 = vadd.f32 %v5796_v37, %v2038_v50  ;;  %v2351_v37 = vpop.f32.mrf.mxu1  ;;  %v2488_v44 = vpop.f32.mrf.mxu2  ;;  %v2637_v50 = vadd.f32 %v5772_v1, %v2502_v34  ;;  %v3054_v1 = vld [vmem:[%s6291_s5 + $0x60] sm:$0xf] }
 0x280   : > { %2986 = vmatpush.msrb.mxu2 %v2962_v7  ;;  %v2818_v7 = vadd.f32 %v5878_v61, %v2801_v6  ;;  %v2372_v24 = vadd.f32 %v2351_v37, %v2205_v59 }
 0x281   : > { %v2371_v12 = vadd.f32 %v2348_v27, %v2204_v28  ;;  %v2819_v27 = vadd.f32 %v5878_v61, %v5839_v20 }
 0x282   : > { %v2509_v6 = vadd.f32 %v2488_v44, %v2372_v24  ;;  %4045 = vmatpush.msk.msra.mxu2 %vm1395_vm7, %v3054_v1  ;;  %v3084_v24 = vld [vmem:[%s6291_s5 + $0x74] sm:$0xf]  ;;  %v3174_v1 = vld [vmem:[%s6291_s5 + $0xb0] sm:$0xf] }
 0x283   : > { %v2508_v3 = vadd.f32 %v2485_v0, %v2371_v12  ;;  %v2832_v53 = vmax.f32 %v2819_v27, 0.0  ;;  %4047 = vmatpush.msk.msrb.mxu3 %vm1395_vm7, %v3084_v24 }
 0x284   : > { %v2644_v0 = vadd.f32 %v2623_v38, %v2509_v6 }
 0x285   : > { %v2643_v21 = vadd.f32 %v2620_v60, %v2508_v3  ;;  %v2803_v60 = vadd.f32 %v5841_v39, %v2637_v50 }
 0x286   : > { %v5847_v54 = vpop.f32.mrf.mxu0 }
 0x287   : > { %v2820_v37 = vadd.f32 %v5878_v61, %v2803_v60 }
 0x28e   : > { %v2777_v51 = vpop.f32.mrf.mxu0 }
 0x28f   : > { %v5864_v49 = vadd.f32 %v2777_v51, %v2640_v19  ;;  %v2507_v19 = vadd.f32 %v2482_v29, %v2370_v32  ;;  %v2831_v29 = vmax.f32 %v2818_v7, 0.0  ;;  %v6454_v32 = vld [vmem:[#allocation21_spill] sm:$0xff] }
 0x291   : > { %v2642_v41 = vadd.f32 %v2617_v45, %v2507_v19  ;;  %v2354_v45 = vpop.f32.mrf.mxu1  ;;  %v6455_v19 = vld [vmem:[#allocation14_spill] sm:$0xff] }
 0x292   : > { %v2373_v30 = vadd.f32 %v2354_v45, %v5820_v33  ;;  %v3024_v33 = vld [vmem:[%s6291_s5 + $0x4c] sm:$0xf]  ;;  %v3082_v45 = vld [vmem:[%s6291_s5 + $0x64] sm:$0xff] }
 0x293   : > { %4043 = vmatpush.msk.msrb.mxu1 %vm1395_vm7, %v3024_v33 }
 0x296   : > { %v2780_v63 = vpop.f32.mrf.mxu0 }
 0x297   : > { %v2807_v36 = vadd.f32 %v2780_v63, %v2641_v47  ;;  %v1865_v63 = vadd.f32 %v6454_v32, %v1664_v35  ;;  %v2491_v47 = vpop.f32.mrf.mxu2 }
 0x298   : > { %v2510_v12 = vadd.f32 %v2491_v47, %v2373_v30 }
 0x299   : > { %v5883_v58 = vadd.f32 %v5878_v61, %v2807_v36  ;;  %v2034_v28 = vadd.f32 %v6455_v19, %v1865_v63  ;;  %v2626_v36 = vpop.f32.mrf.mxu3  ;;  %v2357_v39 = vpop.f32.mrf.mxu1 }
 0x29a   : > { %v2645_v3 = vadd.f32 %v2626_v36, %v2510_v12  ;;  %v2374_v59 = vadd.f32 %v2357_v39, %v5823_v2  ;;  %v3053_v2 = vld [vmem:[%s6291_s5 + $0x58] sm:$0xff]  ;;  %v3114_v36 = vld [vmem:[%s6291_s5 + $0x88] sm:$0xf]  ;;  %v3113_v12 = vld [vmem:[%s6291_s5 + $0x80] sm:$0xff] }
 0x29b   : > { %v2837_v62 = vmax.f32 %v5883_v58, 0.0  ;;  %v2200_v4 = vadd.f32 %v5778_v25, %v2034_v28  ;;  %3075 = vmatpush.msra.mxu2 %v3053_v2 }
 0x29d   : > { %v2851_v15 = vrot.slane %v2837_v62, 2 }
 0x29e   : > { %v2783_v57 = vpop.f32.mrf.mxu0 }
 0x29f   : > { %v2808_v48 = vadd.f32 %v2783_v57, %v2642_v41  ;;  %v2494_v7 = vpop.f32.mrf.mxu2 }
 0x2a0   : > { %v2511_v34 = vadd.f32 %v2494_v7, %v2374_v59  ;;  %v3172_v7 = vld [vmem:[%s6291_s5 + $0xa0] sm:$0xff] }
 0x2a1   : > { %v2825_v40 = vadd.f32 %v5878_v61, %v2808_v48  ;;  %v2367_v48 = vadd.f32 %v5776_v13, %v2200_v4  ;;  %v3023_v13 = vld [vmem:[%s6291_s5 + $0x44] sm:$0xff]  ;;  %v2360_v35 = vpop.f32.mrf.mxu1 }
 0x2a2   : > { %3045 = vmatpush.msrb.mxu1 %v3023_v13  ;;  %v2375_v32 = vadd.f32 %v2360_v35, %v5826_v11  ;;  %v3204_v13 = vld [vmem:[%s6291_s5 + $0xc4] sm:$0xf] }
 0x2a3   : > { %v2838_v16 = vmax.f32 %v2825_v40, 0.0 }
 0x2a5   : > { %v2852_v42 = vrot.slane %v2838_v16, 2  ;;  %v2833_v16 = vmax.f32 %v2820_v37, 0.0  ;;  %v3143_v37 = vld [vmem:[%s6291_s5 + $0x94] sm:$0xff] }
 0x2a6   : > { %v2786_v51 = vpop.f32.mrf.mxu0 }
 0x2a7   : > { %v2853_v43 = vsel %vm854_vm2, %v2851_v15, %v2852_v42  ;;  %v2809_v23 = vadd.f32 %v2786_v51, %v2643_v21  ;;  %v2504_v15 = vadd.f32 %v5782_v5, %v2367_v48  ;;  %v3022_v51 = vld [vmem:[%s6291_s5 + $0x3c] sm:$0xff]  ;;  %v2497_v28 = vpop.f32.mrf.mxu2 }
 0x2a8   : > { %v5897_v31 = vmax.f32 %v2831_v29, %v2853_v43  ;;  %v3083_v43 = vld [vmem:[%s6291_s5 + $0x6c] sm:$0xff]  ;;  %3046 = vmatpush.msrb.mxu1 %v3022_v51  ;;  %v3112_v48 = vld [vmem:[%s6291_s5 + $0x78] sm:$0xff] }
 0x2a9   : > { %v2826_v14 = vadd.f32 %v5878_v61, %v2809_v23  ;;  %v3052_v23 = vld [vmem:[%s6291_s5 + $0x50] sm:$0xff]  ;;  %3105 = vmatpush.msrb.mxu3 %v3083_v43  ;;  %v2639_v46 = vadd.f32 %v5788_v56, %v2504_v15 }
 0x2aa   : > { %v2880_v25 = vrot.slane %v5897_v31, 5  ;;  %3076 = vmatpush.msra.mxu2 %v3052_v23 }
 0x2ab   : > { %v2839_v52 = vmax.f32 %v2826_v14, 0.0  ;;  %3106 = vmatpush.msrb.mxu3 %v3082_v45  ;;  %v3203_v45 = vld [vmem:[%s6291_s5 + $0xbc] sm:$0xff] }
 0x2ad   : > { %v2854_v9 = vrot.slane %v2839_v52, 2 }
 0x2ae   : > { %v2789_v26 = vpop.f32.mrf.mxu0 }
 0x2af   : > { %v2855_v8 = vsel %vm854_vm2, %v2852_v42, %v2854_v9  ;;  %v2810_v20 = vadd.f32 %v2789_v26, %v2644_v0  ;;  %v2629_v42 = vpop.f32.mrf.mxu3  ;;  %v2805_v0 = vadd.f32 %v5847_v54, %v2639_v46  ;;  %v3144_v54 = vld [vmem:[%s6291_s5 + $0x9c] sm:$0xf]  ;;  %v3202_v46 = vld [vmem:[%s6291_s5 + $0xb4] sm:$0xff] }
 0x2b0   : > { %v2872_v41 = vmax.f32 %v2832_v53, %v2855_v8  ;;  %v2646_v52 = vadd.f32 %v2629_v42, %v2511_v34  ;;  %v2512_v53 = vadd.f32 %v2497_v28, %v2375_v32  ;;  %v3234_v42 = vld [vmem:[%s6291_s5 + $0xd8] sm:$0xf]  ;;  %v3264_v34 = vld [vmem:[%s6291_s5 + $0xec] sm:$0xf] }
 0x2b1   : > { %v2827_v55 = vadd.f32 %v5878_v61, %v2810_v20  ;;  %v2822_v8 = vadd.f32 %v5878_v61, %v2805_v0  ;;  %v3232_v32 = vld [vmem:[%s6291_s5 + $0xc8] sm:$0xff] }
 0x2b2   : > { %v2881_v57 = vrot.slane %v2872_v41, 5 }
 0x2b3   : > { %v2840_v22 = vmax.f32 %v2827_v55, 0.0 }
 0x2b4   : > { %v2882_v18 = vsel %vm1399_vm8, %v2880_v25, %v2881_v57  ;;  %v3173_v25 = vld [vmem:[%s6291_s5 + $0xa8] sm:$0xff] }
 0x2b5   : > { %v2884_v40 = vmax.f32 %v5897_v31, %v2882_v18  ;;  %v2856_v44 = vrot.slane %v2840_v22, 2  ;;  %v2821_v31 = vadd.f32 %v5878_v61, %v5843_v10  ;;  %v2835_v18 = vmax.f32 %v2822_v8, 0.0  ;;  %v3292_v8 = vld [vmem:[%s6291_s5 + $0xf0] sm:$0xff] }
 0x2b6   : > { %v2792_v17 = vpop.f32.mrf.mxu0 }
 0x2b7   : > { %v2857_v38 = vsel %vm854_vm2, %v2854_v9, %v2856_v44  ;;  %v2811_v21 = vadd.f32 %v2792_v17, %v2645_v3  ;;  %v2834_v47 = vmax.f32 %v2821_v31, 0.0  ;;  %v2632_v26 = vpop.f32.mrf.mxu3 }
 0x2b8   : > { %v2873_v29 = vmax.f32 %v2833_v16, %v2857_v38 }
 0x2b9   : > { %v2828_v5 = vadd.f32 %v5878_v61, %v2811_v21 }
 0x2ba   : > { %v2886_v6 = vrot.slane %v2873_v29, 5 }
 0x2bb   : > { %v2841_v14 = vmax.f32 %v2828_v5, 0.0 }
 0x2bc   : > { %v2887_v27 = vsel %vm1399_vm8, %v2881_v57, %v2886_v6  ;;  %v2647_v57 = vadd.f32 %v2632_v26, %v2512_v53  ;;  %v3263_v6 = vld [vmem:[%s6291_s5 + $0xe4] sm:$0xff]  ;;  %v3293_v53 = vld [vmem:[%s6291_s5 + $0xf8] sm:$0xff] }
 0x2bd   : > { %v2889_v63 = vmax.f32 %v2872_v41, %v2887_v27  ;;  %v2858_v50 = vrot.slane %v2841_v14, 2 }
 0x2be   : > { %v2795_v10 = vpop.f32.mrf.mxu0 }
 0x2bf   : > { %v2908_v30 = vrot.slane %v2889_v63, 5  ;;  %v2859_v9 = vsel %vm854_vm2, %v2856_v44, %v2858_v50  ;;  %v2812_v19 = vadd.f32 %v2795_v10, %v2646_v52  ;;  %v3142_v44 = vld [vmem:[%s6291_s5 + $0x8c] sm:$0xff]  ;;  %v3262_v63 = vld [vmem:[%s6291_s5 + $0xdc] sm:$0xff] }
 0x2c0   : > { %v2874_v56 = vmax.f32 %v2834_v47, %v2859_v9 }
 0x2c1   : > { %v2829_v11 = vadd.f32 %v5878_v61, %v2812_v19  ;;  %v5963_v60 = vsel %vm1090_vm4, %v2884_v40, %v2908_v30  ;;  %v3294_v19 = vld [vmem:[%s6291_s5 + $0x100] sm:$0xf] }
 0x2c2   : > { %v2891_v20 = vrot.slane %v2874_v56, 5  ;;  %4038 = vmatmul.msk.f32.vlgmr.msra.gmra.mxu1 %vm2934_vm10, %v5963_v60  ;;  %v2965_v4 = vrot.slane %v5963_v60, 1  ;;  %v2995_v41 = vrot.slane %v5963_v60, 2  ;;  %v3025_v24 = vrot.slane %v5963_v60, 3 }
 0x2c3   : > { %v2842_v33 = vmax.f32 %v2829_v11, 0.0  ;;  %4049 = vmatpush.msk.msra.mxu1 %vm1395_vm7, %v3114_v36  ;;  %v3055_v43 = vrot.slane %v5963_v60, 4  ;;  %v3085_v23 = vrot.slane %v5963_v60, 5  ;;  %v3354_v36 = vld [vmem:[%s6291_s5 + $0x128] sm:$0xf] }
 0x2c4   : > { %v2893_v55 = vmax.f32 %v2873_v29, %v2891_v20  ;;  %v2894_v39 = vmax.f32 %v2874_v56, %v2891_v20  ;;  %4040 = vmatmul.msk.f32.vlgmr.msrb.gmra.mxu2 %vm2934_vm10, %v2965_v4  ;;  %4042 = vmatmul.msk.f32.vlgmr.msra.gmra.mxu3 %vm2934_vm10, %v2995_v41  ;;  %v2823_v29 = vadd.f32 %v5878_v61, %v5864_v49  ;;  %v3322_v20 = vld [vmem:[%s6291_s5 + $0x104] sm:$0xff]  ;;  %v3352_v4 = vld [vmem:[%s6291_s5 + $0x118] sm:$0xff] }
 0x2c5   : > { %v2860_v22 = vrot.slane %v2842_v33, 2  ;;  %4051 = vmatpush.msk.msrb.mxu2 %vm1395_vm7, %v3144_v54  ;;  %4053 = vmatpush.msk.msra.mxu3 %vm1395_vm7, %v3174_v1  ;;  %v3353_v54 = vld [vmem:[%s6291_s5 + $0x120] sm:$0xff]  ;;  %v3384_v33 = vld [vmem:[%s6291_s5 + $0x13c] sm:$0xf] }
 0x2c6   : > { %v2912_v3 = vrot.slane %v2893_v55, 2  ;;  %v2913_v59 = vrot.slane %v2894_v39, 2  ;;  %v2798_v40 = vpop.f32.mrf.mxu0  ;;  %3135 = vmatpush.msra.mxu1 %v3113_v12  ;;  %v2836_v35 = vmax.f32 %v2823_v29, 0.0 }
 0x2c7   : > { %v2861_v16 = vsel %vm854_vm2, %v2858_v50, %v2860_v22  ;;  %v2813_v17 = vadd.f32 %v2798_v40, %v2647_v57  ;;  %3165 = vmatpush.msrb.mxu2 %v3143_v37  ;;  %3195 = vmatpush.msra.mxu3 %v3173_v25  ;;  %v3414_v37 = vld [vmem:[%s6291_s5 + $0x150] sm:$0xf]  ;;  %v3444_v25 = vld [vmem:[%s6291_s5 + $0x164] sm:$0xf]  ;;  %v3383_v57 = vld [vmem:[%s6291_s5 + $0x134] sm:$0xff] }
 0x2c8   : > { %v2914_v38 = vsel %vm854_vm2, %v2912_v3, %v2913_v59  ;;  %v2875_v21 = vmax.f32 %v2835_v18, %v2861_v16  ;;  %3136 = vmatpush.msra.mxu1 %v3112_v48  ;;  %v3443_v48 = vld [vmem:[%s6291_s5 + $0x15c] sm:$0xff]  ;;  %v3382_v18 = vld [vmem:[%s6291_s5 + $0x12c] sm:$0xff]  ;;  %v3442_v59 = vld [vmem:[%s6291_s5 + $0x154] sm:$0xff] }
 0x2c9   : > { %v2830_v2 = vadd.f32 %v5878_v61, %v2813_v17  ;;  %3166 = vmatpush.msrb.mxu2 %v3142_v44  ;;  %3196 = vmatpush.msra.mxu3 %v3172_v7  ;;  %v2927_v15 = vsel %vm1392_vm5, %v2908_v30, %v2914_v38  ;;  %v3233_v61 = vld [vmem:[%s6291_s5 + $0xd0] sm:$0xff]  ;;  %v3115_v30 = vrot.slane %v5963_v60, 6  ;;  %v3412_v3 = vld [vmem:[%s6291_s5 + $0x140] sm:$0xff]  ;;  %v3474_v44 = vld [vmem:[%s6291_s5 + $0x178] sm:$0xf] }
 0x2ca   : > { %v2896_v51 = vrot.slane %v2875_v21, 5  ;;  %4044 = vmatmul.msk.f32.vlgmr.msrb.gmra.mxu1 %vm2934_vm10, %v3025_v24  ;;  %v3504_v17 = vld [vmem:[%s6291_s5 + $0x18c] sm:$0xf]  ;;  %v3534_v38 = vld [vmem:[%s6291_s5 + $0x1a0] sm:$0xf]  ;;  %v3503_v24 = vld [vmem:[%s6291_s5 + $0x184] sm:$0xff] }
 0x2cb   : > { %v2843_v5 = vmax.f32 %v2830_v2, 0.0  ;;  %4055 = vmatpush.msk.msrb.mxu1 %vm1395_vm7, %v3204_v13  ;;  %v3533_v13 = vld [vmem:[%s6291_s5 + $0x198] sm:$0xff]  ;;  %v3472_v2 = vld [vmem:[%s6291_s5 + $0x168] sm:$0xff] }
 0x2cc   : > { %v2898_v31 = vmax.f32 %v2874_v56, %v2896_v51  ;;  %v2899_v49 = vmax.f32 %v2875_v21, %v2896_v51  ;;  %4046 = vmatmul.msk.f32.vlgmr.msra.gmra.mxu2 %vm2934_vm10, %v3055_v43  ;;  %4048 = vmatmul.msk.f32.vlgmr.msrb.gmra.mxu3 %vm2934_vm10, %v3085_v23  ;;  %v3324_v56 = vld [vmem:[%s6291_s5 + $0x114] sm:$0xf]  ;;  %v3594_v23 = vld [vmem:[%s6291_s5 + $0x1c8] sm:$0xf] }
 0x2cd   : > { %v2862_v14 = vrot.slane %v2843_v5, 2  ;;  %4057 = vmatpush.msk.msra.mxu2 %vm1395_vm7, %v3234_v42  ;;  %4059 = vmatpush.msk.msrb.mxu3 %vm1395_vm7, %v3264_v34  ;;  %v3473_v21 = vld [vmem:[%s6291_s5 + $0x170] sm:$0xff]  ;;  %v3624_v34 = vld [vmem:[%s6291_s5 + $0x1dc] sm:$0xf] }
 0x2ce   : > { %v2918_v27 = vrot.slane %v2898_v31, 7  ;;  %v2919_v52 = vrot.slane %v2899_v49, 7  ;;  %3225 = vmatpush.msrb.mxu1 %v3203_v45  ;;  %v3532_v42 = vld [vmem:[%s6291_s5 + $0x190] sm:$0xff]  ;;  %v3593_v45 = vld [vmem:[%s6291_s5 + $0x1c0] sm:$0xff] }
 0x2cf   : > { %v2863_v50 = vsel %vm854_vm2, %v2860_v22, %v2862_v14  ;;  %v2877_v47 = vmax.f32 %v2837_v62, %v2862_v14  ;;  %3255 = vmatpush.msra.mxu2 %v3233_v61  ;;  %3285 = vmatpush.msrb.mxu3 %v3263_v6  ;;  %v3145_v62 = vrot.slane %v5963_v60, 7  ;;  %v3323_v60 = vld [vmem:[%s6291_s5 + $0x10c] sm:$0xff]  ;;  %v3564_v51 = vld [vmem:[%s6291_s5 + $0x1b4] sm:$0xf]  ;;  %v3562_v49 = vld [vmem:[%s6291_s5 + $0x1a4] sm:$0xff] }
 0x2d0   : > { %v2920_v0 = vsel %vm488_vm0, %v2918_v27, %v2919_v52  ;;  %v2876_v10 = vmax.f32 %v2836_v35, %v2863_v50  ;;  %v6047_v9 = vsel %vm618_vm3, %v2927_v15, %v2918_v27  ;;  %3226 = vmatpush.msrb.mxu1 %v3202_v46  ;;  %v3413_v22 = vld [vmem:[%s6291_s5 + $0x148] sm:$0xff]  ;;  %v3502_v15 = vld [vmem:[%s6291_s5 + $0x17c] sm:$0xff]  ;;  %v3623_v31 = vld [vmem:[%s6291_s5 + $0x1d4] sm:$0xff] }
 0x2d1   : > { %v2903_v28 = vrot.slane %v2877_v47, 5  ;;  %3256 = vmatpush.msra.mxu2 %v3232_v32  ;;  %3286 = vmatpush.msrb.mxu3 %v3262_v63  ;;  %v3205_v1 = vrot.slane %v6047_v9, 1  ;;  %v3235_v55 = vrot.slane %v6047_v9, 2  ;;  %v3265_v39 = vrot.slane %v6047_v9, 3  ;;  %v3563_v5 = vld [vmem:[%s6291_s5 + $0x1ac] sm:$0xff]  ;;  %v3592_v61 = vld [vmem:[%s6291_s5 + $0x1b8] sm:$0xff] }
 0x2d2   : > { %v2902_v58 = vrot.slane %v2876_v10, 5  ;;  %4050 = vmatmul.msk.f32.vlgmr.msra.gmra.mxu1 %vm2934_vm10, %v3115_v30  ;;  %v3295_v40 = vrot.slane %v6047_v9, 4  ;;  %v3325_v7 = vrot.slane %v6047_v9, 5  ;;  %v3355_v16 = vrot.slane %v6047_v9, 6  ;;  %v3622_v6 = vld [vmem:[%s6291_s5 + $0x1cc] sm:$0xff]  ;;  %v3652_v32 = vld [vmem:[%s6291_s5 + $0x1e0] sm:$0xff] }
 0x2d3   : > { %4061 = vmatpush.msk.msra.mxu1 %vm1395_vm7, %v3294_v19  ;;  %v3385_v29 = vrot.slane %v6047_v9, 7  ;;  %v3654_v46 = vld [vmem:[%s6291_s5 + $0x1f0] sm:$0xf]  ;;  %v3653_v52 = vld [vmem:[%s6291_s5 + $0x1e8] sm:$0xff] }
 0x2d4   : > { %v2904_v11 = vsel %vm1399_vm8, %v2902_v58, %v2903_v28  ;;  %4052 = vmatmul.msk.f32.vlgmr.msrb.gmra.mxu2 %vm2934_vm10, %v3145_v62  ;;  %4054 = vmatmul.msk.f32.vlgmr.msra.gmra.mxu3 %vm2934_vm10, %v6047_v9 }
 0x2d5   : > { %v2906_v26 = vmax.f32 %v2876_v10, %v2904_v11  ;;  %4063 = vmatpush.msk.msrb.mxu2 %vm1395_vm7, %v3324_v56  ;;  %4065 = vmatpush.msk.msra.mxu3 %vm1395_vm7, %v3354_v36  ;;  %v2930_v10 = vld [vmem:[%s6292_s6] sm:$0x1] }
 0x2d6   : > { %3315 = vmatpush.msra.mxu1 %v3293_v53 }
 0x2d7   : > { %v6085_v41 = vrot.slane %v2906_v26, 4  ;;  %3345 = vmatpush.msrb.mxu2 %v3323_v60  ;;  %3375 = vmatpush.msra.mxu3 %v3353_v54 }
 0x2d8   : > { %3316 = vmatpush.msra.mxu1 %v3292_v8 }
 0x2d9   : > { %3346 = vmatpush.msrb.mxu2 %v3322_v20  ;;  %3376 = vmatpush.msra.mxu3 %v3352_v4  ;;  %v6093_v12 = vsel %vm1395_vm7, %v2920_v0, %v6085_v41 }
 0x2da   : > { %4056 = vmatmul.msk.f32.vlgmr.msrb.gmra.mxu1 %vm2934_vm10, %v3205_v1  ;;  %v3445_v43 = vrot.slane %v6093_v12, 1  ;;  %v3475_v14 = vrot.slane %v6093_v12, 2  ;;  %v3505_v35 = vrot.slane %v6093_v12, 3  ;;  %v3535_v27 = vrot.slane %v6093_v12, 4 }
 0x2db   : > { %4067 = vmatpush.msk.msrb.mxu1 %vm1395_vm7, %v3384_v33  ;;  %v3565_v63 = vrot.slane %v6093_v12, 5  ;;  %v3595_v50 = vrot.slane %v6093_v12, 6  ;;  %v3625_v47 = vrot.slane %v6093_v12, 7  ;;  %v3688_v33 = vld [vmem:[%s6293_s7 + $0x30] sm:$0x3] }
 0x2dc   : > { %4058 = vmatmul.msk.f32.vlgmr.msra.gmra.mxu2 %vm2934_vm10, %v3235_v55  ;;  %4060 = vmatmul.msk.f32.vlgmr.msrb.gmra.mxu3 %vm2934_vm10, %v3265_v39 }
 0x2dd   : > { %4069 = vmatpush.msk.msra.mxu2 %vm1395_vm7, %v3414_v37  ;;  %4071 = vmatpush.msk.msrb.mxu3 %vm1395_vm7, %v3444_v25 }
 0x2de   : > { %3405 = vmatpush.msrb.mxu1 %v3383_v57 }
 0x2df   : > { %3435 = vmatpush.msra.mxu2 %v3413_v22  ;;  %3465 = vmatpush.msrb.mxu3 %v3443_v48 }
 0x2e0   : > { %3406 = vmatpush.msrb.mxu1 %v3382_v18  ;;  %v3686_v18 = vld [vmem:[%s6293_s7 + $0x20] sm:$0xff] }
 0x2e1   : > { %3436 = vmatpush.msra.mxu2 %v3412_v3  ;;  %3466 = vmatpush.msrb.mxu3 %v3442_v59  ;;  %v3685_v3 = vld [vmem:[%s6293_s7 + $0x18] sm:$0xff] }
 0x2e2   : > { %4062 = vmatmul.msk.f32.vlgmr.msra.gmra.mxu1 %vm2934_vm10, %v3295_v40 }
 0x2e3   : > { %4073 = vmatpush.msk.msra.mxu1 %vm1395_vm7, %v3474_v44 }
 0x2e4   : > { %4064 = vmatmul.msk.f32.vlgmr.msrb.gmra.mxu2 %vm2934_vm10, %v3325_v7  ;;  %4066 = vmatmul.msk.f32.vlgmr.msra.gmra.mxu3 %vm2934_vm10, %v3355_v16  ;;  %v3684_v16 = vld [vmem:[%s6293_s7 + $0x10] sm:$0xff] }
 0x2e5   : > { %4075 = vmatpush.msk.msrb.mxu2 %vm1395_vm7, %v3504_v17  ;;  %4077 = vmatpush.msk.msra.mxu3 %vm1395_vm7, %v3534_v38  ;;  %v3683_v38 = vld [vmem:[%s6293_s7 + $0x8] sm:$0xff] }
 0x2e6   : > { %3495 = vmatpush.msra.mxu1 %v3473_v21  ;;  %v3682_v21 = vld [vmem:[%s6293_s7] sm:$0xff] }
 0x2e7   : > { %3525 = vmatpush.msrb.mxu2 %v3503_v24  ;;  %3555 = vmatpush.msra.mxu3 %v3533_v13 }
 0x2e8   : > { %3496 = vmatpush.msra.mxu1 %v3472_v2 }
 0x2e9   : > { %3526 = vmatpush.msrb.mxu2 %v3502_v15  ;;  %3556 = vmatpush.msra.mxu3 %v3532_v42 }
 0x2ea   : > { %4068 = vmatmul.msk.f32.vlgmr.msrb.gmra.mxu1 %vm2934_vm10, %v3385_v29 }
 0x2eb   : > { %4079 = vmatpush.msk.msrb.mxu1 %vm1395_vm7, %v3564_v51 }
 0x2ec   : > { %4070 = vmatmul.msk.f32.vlgmr.msra.gmra.mxu2 %vm2934_vm10, %v6093_v12  ;;  %4072 = vmatmul.msk.f32.vlgmr.msrb.gmra.mxu3 %vm2934_vm10, %v3445_v43  ;;  %v3687_v12 = vld [vmem:[%s6293_s7 + $0x28] sm:$0xff] }
 0x2ed   : > { %4081 = vmatpush.msk.msra.mxu2 %vm1395_vm7, %v3594_v23  ;;  %4083 = vmatpush.msk.msrb.mxu3 %vm1395_vm7, %v3624_v34 }
 0x2ee   : > { %3585 = vmatpush.msrb.mxu1 %v3563_v5 }
 0x2ef   : > { %3615 = vmatpush.msra.mxu2 %v3593_v45  ;;  %3645 = vmatpush.msrb.mxu3 %v3623_v31 }
 0x2f0   : > { %3586 = vmatpush.msrb.mxu1 %v3562_v49 }
 0x2f1   : > { %3616 = vmatpush.msra.mxu2 %v3592_v61  ;;  %3646 = vmatpush.msrb.mxu3 %v3622_v6 }
 0x2f2   : > { %4074 = vmatmul.msk.f32.vlgmr.msra.gmra.mxu1 %vm2934_vm10, %v3475_v14 }
 0x2f3   : > { %4085 = vmatpush.msk.msra.mxu1 %vm1395_vm7, %v3654_v46 }
 0x2f4   : > { %4076 = vmatmul.msk.f32.vlgmr.msrb.gmra.mxu2 %vm2934_vm10, %v3505_v35  ;;  %4078 = vmatmul.msk.f32.vlgmr.msra.gmra.mxu3 %vm2934_vm10, %v3535_v27 }
 0x2f5   : > { %3674 = vmatpush.msra.mxu1 %v3653_v52  ;;  %4087 = vmatpush.msk.msrb.mxu2 %vm1392_vm5, %v3688_v33  ;;  %v3689_v52 = vld [vmem:[%s6294_s8] sm:$0x1] }
 0x2f7   : > { %3675 = vmatpush.msra.mxu1 %v3652_v32  ;;  %3707 = vmatpush.msrb.mxu2 %v3687_v12 }
 0x2f9   : > { %3708 = vmatpush.msrb.mxu2 %v3686_v18 }
 0x2fa   : > { %4080 = vmatmul.msk.f32.vlgmr.msrb.gmra.mxu1 %vm2934_vm10, %v3565_v63 }
 0x2fb   : > { %3709 = vmatpush.msrb.mxu2 %v3685_v3 }
 0x2fc   : > { %4082 = vmatmul.msk.f32.vlgmr.msra.gmra.mxu2 %vm2934_vm10, %v3595_v50  ;;  %4084 = vmatmul.msk.f32.vlgmr.msrb.gmra.mxu3 %vm2934_vm10, %v3625_v47 }
 0x2fd   : > { %3710 = vmatpush.msrb.mxu2 %v3684_v16 }
 0x2ff   : > { %3711 = vmatpush.msrb.mxu2 %v3683_v38 }
 0x301   : > { %3712 = vmatpush.msrb.mxu2 %v3682_v21 }
 0x302   : > { %4086 = vmatmul.msk.f32.vlgmr.msra.gmra.mxu1 %vm2934_vm10, %v6085_v41 }
 0x33f   : > { %v2958_v0 = vpop.f32.mrf.mxu1 }
 0x340   : > { %v2961_v30 = vadd.f32 %v2958_v0, %v2930_v10 }
 0x347   : > { %v2988_v9 = vpop.f32.mrf.mxu2  ;;  %v3018_v19 = vpop.f32.mrf.mxu3 }
 0x348   : > { %v2991_v28 = vadd.f32 %v2988_v9, %v2961_v30  ;;  %v3048_v58 = vpop.f32.mrf.mxu1 }
 0x34a   : > { %v3021_v62 = vadd.f32 %v3018_v19, %v2991_v28 }
 0x34c   : > { %v3051_v56 = vadd.f32 %v3048_v58, %v3021_v62 }
 0x34f   : > { %v3078_v36 = vpop.f32.mrf.mxu2  ;;  %v3108_v53 = vpop.f32.mrf.mxu3 }
 0x350   : > { %v3081_v11 = vadd.f32 %v3078_v36, %v3051_v56  ;;  %v3138_v60 = vpop.f32.mrf.mxu1 }
 0x352   : > { %v3111_v54 = vadd.f32 %v3108_v53, %v3081_v11 }
 0x354   : > { %v3141_v26 = vadd.f32 %v3138_v60, %v3111_v54 }
 0x357   : > { %v3168_v8 = vpop.f32.mrf.mxu2  ;;  %v3198_v20 = vpop.f32.mrf.mxu3 }
 0x358   : > { %v3171_v4 = vadd.f32 %v3168_v8, %v3141_v26  ;;  %v3228_v41 = vpop.f32.mrf.mxu1 }
 0x35a   : > { %v3201_v1 = vadd.f32 %v3198_v20, %v3171_v4 }
 0x35c   : > { %v3231_v55 = vadd.f32 %v3228_v41, %v3201_v1 }
 0x35f   : > { %v3258_v39 = vpop.f32.mrf.mxu2  ;;  %v3288_v37 = vpop.f32.mrf.mxu3 }
 0x360   : > { %v3261_v25 = vadd.f32 %v3258_v39, %v3231_v55  ;;  %v3318_v57 = vpop.f32.mrf.mxu1 }
 0x362   : > { %v3291_v22 = vadd.f32 %v3288_v37, %v3261_v25 }
 0x364   : > { %v3321_v48 = vadd.f32 %v3318_v57, %v3291_v22 }
 0x367   : > { %v3348_v59 = vpop.f32.mrf.mxu2  ;;  %v3378_v40 = vpop.f32.mrf.mxu3 }
 0x368   : > { %v3351_v44 = vadd.f32 %v3348_v59, %v3321_v48  ;;  %v3408_v7 = vpop.f32.mrf.mxu1 }
 0x36a   : > { %v3381_v17 = vadd.f32 %v3378_v40, %v3351_v44 }
 0x36c   : > { %v3411_v24 = vadd.f32 %v3408_v7, %v3381_v17 }
 0x36f   : > { %v3438_v13 = vpop.f32.mrf.mxu2  ;;  %v3468_v2 = vpop.f32.mrf.mxu3 }
 0x370   : > { %v3441_v15 = vadd.f32 %v3438_v13, %v3411_v24  ;;  %v3498_v42 = vpop.f32.mrf.mxu1 }
 0x372   : > { %v3471_v29 = vadd.f32 %v3468_v2, %v3441_v15 }
 0x374   : > { %v3501_v51 = vadd.f32 %v3498_v42, %v3471_v29 }
 0x377   : > { %v3528_v43 = vpop.f32.mrf.mxu2  ;;  %v3558_v23 = vpop.f32.mrf.mxu3 }
 0x378   : > { %v3531_v34 = vadd.f32 %v3528_v43, %v3501_v51  ;;  %v3588_v5 = vpop.f32.mrf.mxu1 }
 0x37a   : > { %v3561_v45 = vadd.f32 %v3558_v23, %v3531_v34 }
 0x37c   : > { %v3591_v31 = vadd.f32 %v3588_v5, %v3561_v45 }
 0x37f   : > { %v3618_v49 = vpop.f32.mrf.mxu2  ;;  %v3648_v6 = vpop.f32.mrf.mxu3 }
 0x380   : > { %v3621_v61 = vadd.f32 %v3618_v49, %v3591_v31  ;;  %v3677_v46 = vpop.f32.mrf.mxu1 }
 0x382   : > { %v3651_v14 = vadd.f32 %v3648_v6, %v3621_v61 }
 0x384   : > { %v3680_v35 = vadd.f32 %v3677_v46, %v3651_v14 }
 0x386   : > { %v3681_v27 = vmax.f32 %v3680_v35, 0.0 }
 0x388   : > { %4088 = vmatmul.msk.f32.vlgmr.msrb.gmra.mxu2 %vm3690_vm11, %v3681_v27 }
 0x40b   : > { %v3714_v32 = vpop.f32.mrf.mxu2 }
 0x40c   : > { %v3715_v63 = vadd.f32 %v3714_v32, %v3689_v52 }
 0x40e   : > { %v3717_v50 = vsel %vm1327_vm9, %v3715_v63, -inf }
 0x40f   : > { %3718 = vmax.xlane.f32.xlu0 %v3717_v50 }
 0x482   : > { %v3719_v47 = vpop.xlane.xlu0 %3718 }
 0x483   : > { %v3720_v0 = vsub.f32 %v3715_v63, %v3719_v47 }
 0x485   : > { %v3721_v10 = vmul.f32 1.442695, %v3720_v0 }
 0x487   : > { %4137 = vpow2.f32 %v3721_v10 }
 0x48d   : > { %v4138_v30 = vpop.eup %4137 }
 0x48e   : > { %v3723_v9 = vsel %vm1327_vm9, %v4138_v30, 0.0 }
 0x48f   : > { %3724 = vadd.xlane.f32.xlu0 %v3723_v9 }
 0x502   : > { %v3725_v19 = vpop.xlane.xlu0 %3724 }
 0x503   : > { %4139 = vlog2.f32 %v3725_v19 }
 0x509   : > { %v4140_v28 = vpop.eup %4139 }
 0x50a   : > { %v3727_v58 = vmul.f32 0.6931472, %v4140_v28 }
 0x50c   : > { %v3728_v62 = vsub.f32 %v3720_v0, %v3727_v58 }
 0x50e   : > { %3729 = vst.msk [vmem:[%s324_s28] sm:$0x1] %vm1327_vm9, %v3728_v62 }
 0x50f   : > { %4170 = shalt.err (!%p4167_p3)
}
 0x510   : > { %4096 = dma.vmem_to_hbm [thread:$0]  (%p4295_p5), %s3742_s14, 16, %s3744_s16, %s3731_s17  }
 0x511 PF: > { %p4102_p4 = scmp.ge.s32.totalorder %s4205_s12, 2  ;;  %s3755_s29 = sand.u32 1, %s4193_s30  }
 0x512   : > { %s3756_s27 = scalar_lea.sflag [#allocation4], %s3755_s29 }
 0x513   : > { %p4099_p7 = pnand %p4102_p4, %p4299_p6 }
 0x515   : > { %p4100_p8 = pneg %p4099_p7 }
 0x517   : > { %4188 = dma.done.wait (%p4100_p8), %s3756_s27, 16  }
 0x518   : > { %4190 = vsyncadd (%p4100_p8), %s3756_s27, 4294967280  ;;  %p19_p9 = scmp.ge.s32.totalorder %s4282_s15, 4   ;;  %s6456_s30 = smov %s4197_s10 }
 0x519   : > { %s6457_s10 = smov %s4201_s11  ;;  %s6458_s11 = smov %s4293_s18 }
 0x51a   : > { %s6459_s12 = smov %s4282_s15  ;;  %21 = sbr.rel (!%p19_p9) target bundleno = 3 (0x3), region = 99 }
 0x51f   :  { %3761 = vsyncpa [#allocation4], 1 }
 0x520   :  { %3763 = vsyncpa [#allocation4 + $0x1], 1 }

</bundles_post_ra>
